<compile_context>
chip_gen: v6e
topology: v6e:2x2x1
jax: 0.10.0
libtpu: 0.0.40
codegen_flags: <defaults>
</compile_context>

<pallas_src>
import jax
import jax.numpy as jnp
from jax.experimental import pallas as pl
from jax.experimental.pallas import tpu as pltpu

FEAT_DIM = 512
K = FEAT_DIM // 2          # 256
C, H, W = 512, 4, 4
FLAT = C * H * W           # 8192
BN_EPS = 1e-5
TK = 4096                  # reduction tile for the 8192-dim contraction
KT = FLAT // TK            # 2 grid steps


def _softplus(x):
    # numerically stable log(1 + exp(x)) == F.softplus(x, beta=1)
    return jnp.maximum(x, 0.0) + jnp.log1p(jnp.exp(-jnp.abs(x)))


def ir152_vib_kernel(
    x_ref,        # (KT, Np, TK)  bf16 flattened backbone features, resident
    w1_ref,       # (TK, 512)     int8 quantized folded Linear weight tile
    w1s_ref,      # (1, 512)      f32 per-output-column dequant scale
    b1_ref,       # (1, 512)      f32 folded bias (BN2d/BN1d absorbed)
    wst_ref,      # (512, 512)    bf16 st_layer weight (transposed)
    bst_ref,      # (1, 512)      f32
    wfc_ref,      # (256, NC)     bf16 fc_layer weight (transposed)
    bfc_ref,      # (1, NC)       f32
    eps_ref,      # (Np, 256)     f32 reparameterization noise
    feature_ref,  # (Np, 512)     out 0
    out_ref,      # (Np, NC)      out 1 (softmax probs)
    iden_ref,     # (Np, 1)       out 2 (argmax indices, int32)
    mu_ref,       # (Np, 256)     out 3
    std_ref,      # (Np, 256)     out 4
    acc_ref,      # (Np, 512)     f32 accumulator scratch
):
    k = pl.program_id(0)

    @pl.when(k == 0)
    def _():
        acc_ref[...] = jnp.zeros_like(acc_ref)

    # --- output_layer (BN2d/Dropout/Flatten/Linear/BN1d folded into
    #     w1/w1_scale/b1): stream int8 weights, dequant-cast to bf16 for the
    #     MXU, accumulate in f32.  x chunk selected by dynamic leading index.
    acc_ref[...] += jnp.dot(
        x_ref[k], w1_ref[...].astype(jnp.bfloat16),
        preferred_element_type=jnp.float32)

    @pl.when(k == pl.num_programs(0) - 1)
    def _():
        # Apply per-output-column int8 scale + folded bias once.
        feat = acc_ref[...] * w1s_ref[...] + b1_ref[...]
        feature_ref[...] = feat

        # --- st_layer: Linear(512 -> 2*k), bf16 MXU operands, f32 math ---
        statis = jnp.dot(feat.astype(jnp.bfloat16), wst_ref[...],
                         preferred_element_type=jnp.float32) + bst_ref[...]
        mu = statis[:, :K]
        std = _softplus(statis[:, K:] - 5.0)
        mu_ref[...] = mu
        std_ref[...] = std

        # --- reparameterization: res = mu + std * eps (f32) ---
        res = mu + std * eps_ref[...]

        # --- fc_layer: Linear(k -> n_classes) + Softmax(dim=1) ---
        logits = jnp.dot(res.astype(jnp.bfloat16), wfc_ref[...],
                         preferred_element_type=jnp.float32) + bfc_ref[...]
        m = jnp.max(logits, axis=1, keepdims=True)
        e = jnp.exp(logits - m)
        out_ref[...] = e * pl.reciprocal(
            jnp.sum(e, axis=1, keepdims=True), approx=True)

        # --- torch.max(out, dim=1): argmax on f32 logits (same ordering as
        #     softmax probs), first occurrence on ties. ---
        nc = logits.shape[1]
        col = jax.lax.broadcasted_iota(jnp.int32, logits.shape, 1)
        cand = jnp.where(logits == m, col, jnp.int32(nc))
        iden_ref[...] = jnp.min(cand, axis=1, keepdims=True)


def ir152_vib_forward(x_feat, params, eps_noise):
    """x_feat: (N, 512, 4, 4) float32 backbone output (NCHW)."""
    n = x_feat.shape[0]
    nc = params["bfc"].shape[1]
    x_flat = x_feat.reshape(n, -1)          # matches torch .view(N, -1)

    # Pad batch to a multiple of 16 (bf16 sublane packing / MXU-M alignment).
    n_pad = max(16, ((n + 15) // 16) * 16)
    if n_pad != n:
        x_flat = jnp.pad(x_flat, ((0, n_pad - n), (0, 0)))
        eps = jnp.pad(eps_noise, ((0, n_pad - n), (0, 0)))
    else:
        eps = eps_noise

    # bf16 LHS, laid out as (KT, n_pad, TK) so the kernel keeps it resident
    # and picks the K-chunk with a leading-axis dynamic index.
    x_res = (x_flat.astype(jnp.bfloat16)
             .reshape(n_pad, KT, TK)
             .transpose(1, 0, 2))            # (KT, n_pad, TK)
    eps = eps.astype(jnp.float32)

    out_shapes = (
        jax.ShapeDtypeStruct((n_pad, FEAT_DIM), jnp.float32),  # feature
        jax.ShapeDtypeStruct((n_pad, nc), jnp.float32),        # out (softmax)
        jax.ShapeDtypeStruct((n_pad, 1), jnp.int32),           # iden
        jax.ShapeDtypeStruct((n_pad, K), jnp.float32),         # mu
        jax.ShapeDtypeStruct((n_pad, K), jnp.float32),         # std
    )

    grid_spec = pltpu.PrefetchScalarGridSpec(
        num_scalar_prefetch=0,
        grid=(KT,),
        in_specs=[
            pl.BlockSpec((KT, n_pad, TK), lambda k: (0, 0, 0)),  # x (resident)
            pl.BlockSpec((TK, FEAT_DIM), lambda k: (k, 0)),      # w1 int8 (K-tiled)
            pl.BlockSpec((1, FEAT_DIM), lambda k: (0, 0)),       # w1 scale
            pl.BlockSpec((1, FEAT_DIM), lambda k: (0, 0)),       # b1
            pl.BlockSpec((FEAT_DIM, 2 * K), lambda k: (0, 0)),   # wst
            pl.BlockSpec((1, 2 * K), lambda k: (0, 0)),          # bst
            pl.BlockSpec((K, nc), lambda k: (0, 0)),             # wfc
            pl.BlockSpec((1, nc), lambda k: (0, 0)),             # bfc
            pl.BlockSpec((n_pad, K), lambda k: (0, 0)),          # eps
        ],
        out_specs=[
            pl.BlockSpec((n_pad, FEAT_DIM), lambda k: (0, 0)),
            pl.BlockSpec((n_pad, nc), lambda k: (0, 0)),
            pl.BlockSpec((n_pad, 1), lambda k: (0, 0)),
            pl.BlockSpec((n_pad, K), lambda k: (0, 0)),
            pl.BlockSpec((n_pad, K), lambda k: (0, 0)),
        ],
        scratch_shapes=[pltpu.VMEM((n_pad, FEAT_DIM), jnp.float32)],
    )

    cost = pl.CostEstimate(
        flops=int(2 * n_pad * FLAT * FEAT_DIM
                  + 2 * n_pad * FEAT_DIM * 2 * K
                  + 2 * n_pad * K * nc),
        transcendentals=int(n_pad * (2 * K + nc)),
        bytes_accessed=int(FLAT * FEAT_DIM * 1            # w1 (int8)
                           + n_pad * FLAT * 2             # x (bf16)
                           + FEAT_DIM * 2 * K * 2         # wst (bf16)
                           + K * nc * 2                   # wfc (bf16)
                           + n_pad * (FEAT_DIM + nc + 1 + 2 * K) * 4),
    )

    feature, out, iden, mu, std = pl.pallas_call(
        ir152_vib_kernel,
        out_shape=out_shapes,
        grid_spec=grid_spec,
        compiler_params=pltpu.CompilerParams(
            dimension_semantics=("arbitrary",),   # reduction axis w/ accumulator
            vmem_limit_bytes=32 << 20,            # valid on v5e/v6e/v7x
        ),
        cost_estimate=cost,
    )(
        x_res,
        params["w1"], params["w1_scale"], params["b1"],
        params["wst"], params["bst"],
        params["wfc"], params["bfc"],
        eps,
    )
    return feature[:n], out[:n], iden[:n], mu[:n], std[:n]


def _fold_bn(gamma, beta, rmean, rvar):
    scale = gamma / jnp.sqrt(rvar + BN_EPS)
    shift = beta - rmean * scale
    return scale, shift


def init_params(key, num_classes):
    ks = jax.random.split(key, 14)

    # BatchNorm2d(512), eval mode -> per-channel affine, expanded to the
    # flattened (c*16 + h*4 + w) index order.
    g2 = 1.0 + 0.1 * jax.random.normal(ks[0], (C,), jnp.float32)
    b2 = 0.1 * jax.random.normal(ks[1], (C,), jnp.float32)
    rm2 = 0.1 * jax.random.normal(ks[2], (C,), jnp.float32)
    rv2 = 1.0 + 0.1 * jnp.abs(jax.random.normal(ks[3], (C,), jnp.float32))
    s2, sh2 = _fold_bn(g2, b2, rm2, rv2)
    s2_flat = jnp.repeat(s2, H * W)     # (8192,)
    sh2_flat = jnp.repeat(sh2, H * W)   # (8192,)

    # Linear(8192 -> 512), stored transposed (in, out).
    w1 = jax.random.normal(ks[4], (FLAT, FEAT_DIM), jnp.float32) / jnp.sqrt(FLAT)
    b1 = 0.01 * jax.random.normal(ks[5], (FEAT_DIM,), jnp.float32)

    # BatchNorm1d(512), eval mode.
    g1 = 1.0 + 0.1 * jax.random.normal(ks[6], (FEAT_DIM,), jnp.float32)
    be1 = 0.1 * jax.random.normal(ks[7], (FEAT_DIM,), jnp.float32)
    rm1 = 0.1 * jax.random.normal(ks[8], (FEAT_DIM,), jnp.float32)
    rv1 = 1.0 + 0.1 * jnp.abs(jax.random.normal(ks[9], (FEAT_DIM,), jnp.float32))
    s1, sh1 = _fold_bn(g1, be1, rm1, rv1)

    # Fold BN2d (input side) and BN1d (output side) into the Linear:
    #   feat = (x * s2 + sh2) @ w1 + b1, then * s1 + sh1
    #        = x @ (diag(s2) @ w1 * s1) + ((sh2 @ w1 + b1) * s1 + sh1)
    w1_folded = (s2_flat[:, None] * w1) * s1[None, :]
    b1_folded = (sh2_flat @ w1 + b1) * s1 + sh1

    # Per-output-column symmetric int8 quantization of the folded weight;
    # the dequant scale is applied once to the f32 accumulator in-kernel.
    w1_scale = jnp.maximum(jnp.max(jnp.abs(w1_folded), axis=0) / 127.0, 1e-12)
    w1_q = jnp.clip(jnp.round(w1_folded / w1_scale[None, :]),
                    -127.0, 127.0).astype(jnp.int8)

    # st_layer: Linear(512 -> 2*k) == Linear(512 -> 512)
    wst = jax.random.normal(ks[10], (FEAT_DIM, 2 * K), jnp.float32) / jnp.sqrt(FEAT_DIM)
    bst = 0.01 * jax.random.normal(ks[11], (2 * K,), jnp.float32)

    # fc_layer: Linear(k -> num_classes)
    wfc = jax.random.normal(ks[12], (K, num_classes), jnp.float32) / jnp.sqrt(K)
    bfc = 0.01 * jax.random.normal(ks[13], (num_classes,), jnp.float32)

    return dict(
        w1=w1_q,                                   # int8 weight stream
        w1_scale=w1_scale.reshape(1, -1).astype(jnp.float32),
        b1=b1_folded.reshape(1, -1).astype(jnp.float32),
        wst=wst.astype(jnp.bfloat16),
        bst=bst.reshape(1, -1).astype(jnp.float32),
        wfc=wfc.astype(jnp.bfloat16),
        bfc=bfc.reshape(1, -1).astype(jnp.float32),
    )


if __name__ == "__main__":
    key = jax.random.PRNGKey(0)
    k_param, k_x, k_eps = jax.random.split(key, 3)

    N = 2
    NUM_CLASSES = 128   # small IR152_vib constructor arg

    params = init_params(k_param, NUM_CLASSES)
    # Stand-in for self.feature(x): the IR-152 backbone's (N, 512, 4, 4) output.
    x_feat = jax.random.normal(k_x, (N, C, H, W), jnp.float32)
    # eps ~ N(0,1), torch.FloatTensor(std.size()).normal_() equivalent.
    eps_noise = jax.random.normal(k_eps, (N, K), jnp.float32)

    feature, out, iden, mu, std = ir152_vib_forward(x_feat, params, eps_noise)
    jax.block_until_ready((feature, out, iden, mu, std))

    assert feature.shape == (N, FEAT_DIM)
    assert out.shape == (N, NUM_CLASSES)
    assert iden.shape == (N, 1) and iden.dtype == jnp.int32
    assert mu.shape == (N, K) and std.shape == (N, K)
    assert bool(jnp.all(jnp.isfinite(out)))
    assert bool(jnp.all(jnp.isfinite(feature)))
    print("KERNEL_OK")
</pallas_src>

<mosaic_0001>
module attributes {stable_mosaic.version = 11 : i64} {
  func.func @ir152_vib_kernel(%arg0: i32, %arg1: memref<2x16x4096xbf16, #tpu.memory_space<vmem>>, %arg2: memref<4096x512xi8, #tpu.memory_space<vmem>>, %arg3: memref<1x512xf32, #tpu.memory_space<vmem>>, %arg4: memref<1x512xf32, #tpu.memory_space<vmem>>, %arg5: memref<512x512xbf16, #tpu.memory_space<vmem>>, %arg6: memref<1x512xf32, #tpu.memory_space<vmem>>, %arg7: memref<256x128xbf16, #tpu.memory_space<vmem>>, %arg8: memref<1x128xf32, #tpu.memory_space<vmem>>, %arg9: memref<16x256xf32, #tpu.memory_space<vmem>>, %arg10: memref<16x512xf32, #tpu.memory_space<vmem>>, %arg11: memref<16x128xf32, #tpu.memory_space<vmem>>, %arg12: memref<16x1xi32, #tpu.memory_space<vmem>>, %arg13: memref<16x256xf32, #tpu.memory_space<vmem>>, %arg14: memref<16x256xf32, #tpu.memory_space<vmem>>, %arg15: memref<16x512xf32, #tpu.memory_space<vmem>>) attributes {dimension_semantics = [#tpu.dimension_semantics<arbitrary>], iteration_bounds = array<i64: 2>, scalar_prefetch = 0 : i64, scratch_operands = 1 : i64, tpu.core_type = #tpu.core_type<tc>, window_params = [{pipeline_mode = #tpu.pipeline_mode<synchronous>, transform_indices = @transform_0, window_bounds = array<i64: 2, 16, 4096>}, {transform_indices = @transform_1, window_bounds = array<i64: 4096, 512>}, {pipeline_mode = #tpu.pipeline_mode<synchronous>, transform_indices = @transform_2, window_bounds = array<i64: 1, 512>}, {pipeline_mode = #tpu.pipeline_mode<synchronous>, transform_indices = @transform_3, window_bounds = array<i64: 1, 512>}, {pipeline_mode = #tpu.pipeline_mode<synchronous>, transform_indices = @transform_4, window_bounds = array<i64: 512, 512>}, {pipeline_mode = #tpu.pipeline_mode<synchronous>, transform_indices = @transform_5, window_bounds = array<i64: 1, 512>}, {pipeline_mode = #tpu.pipeline_mode<synchronous>, transform_indices = @transform_6, window_bounds = array<i64: 256, 128>}, {pipeline_mode = #tpu.pipeline_mode<synchronous>, transform_indices = @transform_7, window_bounds = array<i64: 1, 128>}, {pipeline_mode = #tpu.pipeline_mode<synchronous>, transform_indices = @transform_8, window_bounds = array<i64: 16, 256>}, {pipeline_mode = #tpu.pipeline_mode<synchronous>, transform_indices = @transform_9, window_bounds = array<i64: 16, 512>}, {pipeline_mode = #tpu.pipeline_mode<synchronous>, transform_indices = @transform_10, window_bounds = array<i64: 16, 128>}, {pipeline_mode = #tpu.pipeline_mode<synchronous>, transform_indices = @transform_11, window_bounds = array<i64: 16, 1>}, {pipeline_mode = #tpu.pipeline_mode<synchronous>, transform_indices = @transform_12, window_bounds = array<i64: 16, 256>}, {pipeline_mode = #tpu.pipeline_mode<synchronous>, transform_indices = @transform_13, window_bounds = array<i64: 16, 256>}]} {
    %c0_i32 = arith.constant 0 : i32
    %0 = arith.cmpi eq, %arg0, %c0_i32 : i32
    %1 = arith.extui %0 : i1 to i32
    %c0_i32_0 = arith.constant 0 : i32
    %2 = arith.cmpi ne, %1, %c0_i32_0 : i32
    scf.if %2 {
      %cst_9 = arith.constant 0.000000e+00 : f32
      %15 = vector.broadcast %cst_9 : f32 to vector<16x512xf32>
      %c0_10 = arith.constant 0 : index
      %c0_11 = arith.constant 0 : index
      %16 = vector.load %arg15[%c0_10, %c0_11] : memref<16x512xf32, #tpu.memory_space<vmem>>, vector<16x512xf32>
      tpu.vector_store %arg15[%c0_10, %c0_11], %15 {strides = array<i32>} : memref<16x512xf32, #tpu.memory_space<vmem>>, vector<16x512xf32>,
    } else {
    }
    %c0 = arith.constant 0 : index
    %c0_1 = arith.constant 0 : index
    %3 = vector.load %arg15[%c0, %c0_1] : memref<16x512xf32, #tpu.memory_space<vmem>>, vector<16x512xf32>
    %4 = arith.index_cast %arg0 : i32 to index
    %c0_2 = arith.constant 0 : index
    %c0_3 = arith.constant 0 : index
    %5 = vector.load %arg1[%4, %c0_2, %c0_3] : memref<2x16x4096xbf16, #tpu.memory_space<vmem>>, vector<1x16x4096xbf16>
    %6 = vector.shape_cast %5 : vector<1x16x4096xbf16> to vector<16x4096xbf16>
    %c0_4 = arith.constant 0 : index
    %c0_5 = arith.constant 0 : index
    %7 = vector.load %arg2[%c0_4, %c0_5] : memref<4096x512xi8, #tpu.memory_space<vmem>>, vector<4096x512xi8>
    %8 = arith.sitofp %7 : vector<4096x512xi8> to vector<4096x512xbf16>
    %cst = arith.constant dense<0.000000e+00> : vector<16x512xf32>
    %9 = tpu.matmul %6, %8, %cst {dimension_numbers = #tpu.dot_dimension_numbers<[1], [0], [0], [1], [0, 0, 1, 1], [], []>} : vector<16x4096xbf16>, vector<4096x512xbf16>, vector<16x512xf32> -> vector<16x512xf32>
    %10 = arith.addf %3, %9 : vector<16x512xf32>
    %c0_6 = arith.constant 0 : index
    %c0_7 = arith.constant 0 : index
    %11 = vector.load %arg15[%c0_6, %c0_7] : memref<16x512xf32, #tpu.memory_space<vmem>>, vector<16x512xf32>
    tpu.vector_store %arg15[%c0_6, %c0_7], %10 {strides = array<i32>} : memref<16x512xf32, #tpu.memory_space<vmem>>, vector<16x512xf32>,
    %c1_i32 = arith.constant 1 : i32
    %12 = arith.cmpi eq, %arg0, %c1_i32 : i32
    %13 = arith.extui %12 : i1 to i32
    %c0_i32_8 = arith.constant 0 : i32
    %14 = arith.cmpi ne, %13, %c0_i32_8 : i32
    scf.if %14 {
      %c0_9 = arith.constant 0 : index
      %c0_10 = arith.constant 0 : index
      %15 = vector.load %arg15[%c0_9, %c0_10] : memref<16x512xf32, #tpu.memory_space<vmem>>, vector<16x512xf32>
      %c0_11 = arith.constant 0 : index
      %c0_12 = arith.constant 0 : index
      %16 = vector.load %arg3[%c0_11, %c0_12] : memref<1x512xf32, #tpu.memory_space<vmem>>, vector<1x512xf32>
      %17 = vector.broadcast %16 : vector<1x512xf32> to vector<16x512xf32>
      %18 = arith.mulf %15, %17 : vector<16x512xf32>
      %c0_13 = arith.constant 0 : index
      %c0_14 = arith.constant 0 : index
      %19 = vector.load %arg4[%c0_13, %c0_14] : memref<1x512xf32, #tpu.memory_space<vmem>>, vector<1x512xf32>
      %20 = vector.broadcast %19 : vector<1x512xf32> to vector<16x512xf32>
      %21 = arith.addf %18, %20 : vector<16x512xf32>
      %c0_15 = arith.constant 0 : index
      %c0_16 = arith.constant 0 : index
      %22 = vector.load %arg10[%c0_15, %c0_16] : memref<16x512xf32, #tpu.memory_space<vmem>>, vector<16x512xf32>
      tpu.vector_store %arg10[%c0_15, %c0_16], %21 {strides = array<i32>} : memref<16x512xf32, #tpu.memory_space<vmem>>, vector<16x512xf32>,
      %23 = arith.truncf %21 : vector<16x512xf32> to vector<16x512xbf16>
      %c0_17 = arith.constant 0 : index
      %c0_18 = arith.constant 0 : index
      %24 = vector.load %arg5[%c0_17, %c0_18] : memref<512x512xbf16, #tpu.memory_space<vmem>>, vector<512x512xbf16>
      %cst_19 = arith.constant dense<0.000000e+00> : vector<16x512xf32>
      %25 = tpu.matmul %23, %24, %cst_19 {dimension_numbers = #tpu.dot_dimension_numbers<[1], [0], [0], [1], [0, 0, 1, 1], [], []>} : vector<16x512xbf16>, vector<512x512xbf16>, vector<16x512xf32> -> vector<16x512xf32>
      %c0_20 = arith.constant 0 : index
      %c0_21 = arith.constant 0 : index
      %26 = vector.load %arg6[%c0_20, %c0_21] : memref<1x512xf32, #tpu.memory_space<vmem>>, vector<1x512xf32>
      %27 = vector.broadcast %26 : vector<1x512xf32> to vector<16x512xf32>
      %28 = arith.addf %25, %27 : vector<16x512xf32>
      %29 = vector.extract_strided_slice %28 {offsets = [0, 0], sizes = [16, 256], strides = [1, 1]} : vector<16x512xf32> to vector<16x256xf32>
      %30 = vector.extract_strided_slice %28 {offsets = [0, 256], sizes = [16, 256], strides = [1, 1]} : vector<16x512xf32> to vector<16x256xf32>
      %cst_22 = arith.constant 5.000000e+00 : f32
      %31 = vector.broadcast %cst_22 : f32 to vector<16x256xf32>
      %32 = arith.subf %30, %31 : vector<16x256xf32>
      %cst_23 = arith.constant 0.000000e+00 : f32
      %33 = vector.broadcast %cst_23 : f32 to vector<16x256xf32>
      %34 = arith.maximumf %32, %33 : vector<16x256xf32>
      %35 = math.absf %32 : vector<16x256xf32>
      %cst_24 = arith.constant 0.000000e+00 : f32
      %36 = vector.broadcast %cst_24 : f32 to vector<16x256xf32>
      %37 = arith.subf %36, %35 : vector<16x256xf32>
      %38 = math.exp %37 : vector<16x256xf32>
      %39 = math.log1p %38 : vector<16x256xf32>
      %40 = arith.addf %34, %39 : vector<16x256xf32>
      %c0_25 = arith.constant 0 : index
      %c0_26 = arith.constant 0 : index
      %41 = vector.load %arg13[%c0_25, %c0_26] : memref<16x256xf32, #tpu.memory_space<vmem>>, vector<16x256xf32>
      tpu.vector_store %arg13[%c0_25, %c0_26], %29 {strides = array<i32>} : memref<16x256xf32, #tpu.memory_space<vmem>>, vector<16x256xf32>,
      %c0_27 = arith.constant 0 : index
      %c0_28 = arith.constant 0 : index
      %42 = vector.load %arg14[%c0_27, %c0_28] : memref<16x256xf32, #tpu.memory_space<vmem>>, vector<16x256xf32>
      tpu.vector_store %arg14[%c0_27, %c0_28], %40 {strides = array<i32>} : memref<16x256xf32, #tpu.memory_space<vmem>>, vector<16x256xf32>,
      %c0_29 = arith.constant 0 : index
      %c0_30 = arith.constant 0 : index
      %43 = vector.load %arg9[%c0_29, %c0_30] : memref<16x256xf32, #tpu.memory_space<vmem>>, vector<16x256xf32>
      %44 = arith.mulf %40, %43 : vector<16x256xf32>
      %45 = arith.addf %29, %44 : vector<16x256xf32>
      %46 = arith.truncf %45 : vector<16x256xf32> to vector<16x256xbf16>
      %c0_31 = arith.constant 0 : index
      %c0_32 = arith.constant 0 : index
      %47 = vector.load %arg7[%c0_31, %c0_32] : memref<256x128xbf16, #tpu.memory_space<vmem>>, vector<256x128xbf16>
      %cst_33 = arith.constant dense<0.000000e+00> : vector<16x128xf32>
      %48 = tpu.matmul %46, %47, %cst_33 {dimension_numbers = #tpu.dot_dimension_numbers<[1], [0], [0], [1], [0, 0, 1, 1], [], []>} : vector<16x256xbf16>, vector<256x128xbf16>, vector<16x128xf32> -> vector<16x128xf32>
      %c0_34 = arith.constant 0 : index
      %c0_35 = arith.constant 0 : index
      %49 = vector.load %arg8[%c0_34, %c0_35] : memref<1x128xf32, #tpu.memory_space<vmem>>, vector<1x128xf32>
      %50 = vector.broadcast %49 : vector<1x128xf32> to vector<16x128xf32>
      %51 = arith.addf %48, %50 : vector<16x128xf32>
      %cst_36 = arith.constant dense<0xFF800000> : vector<16xf32>
      %52 = vector.multi_reduction <maximumf>, %51, %cst_36 [1] : vector<16x128xf32> to vector<16xf32>
      %53 = vector.shape_cast %52 : vector<16xf32> to vector<16x1xf32>
      %54 = vector.broadcast %53 : vector<16x1xf32> to vector<16x128xf32>
      %55 = arith.subf %51, %54 : vector<16x128xf32>
      %56 = math.exp %55 : vector<16x128xf32>
      %cst_37 = arith.constant dense<0.000000e+00> : vector<16xf32>
      %57 = vector.multi_reduction <add>, %56, %cst_37 [1] : vector<16x128xf32> to vector<16xf32>
      %58 = vector.shape_cast %57 : vector<16xf32> to vector<16x1xf32>
      %59 = tpu.reciprocal %58 {approx = true} : vector<16x1xf32> -> vector<16x1xf32>
      %60 = vector.broadcast %59 : vector<16x1xf32> to vector<16x128xf32>
      %61 = arith.mulf %56, %60 : vector<16x128xf32>
      %c0_38 = arith.constant 0 : index
      %c0_39 = arith.constant 0 : index
      %62 = vector.load %arg11[%c0_38, %c0_39] : memref<16x128xf32, #tpu.memory_space<vmem>>, vector<16x128xf32>
      tpu.vector_store %arg11[%c0_38, %c0_39], %61 {strides = array<i32>} : memref<16x128xf32, #tpu.memory_space<vmem>>, vector<16x128xf32>,
      %63 = tpu.iota {dimensions = array<i32: 1>} : vector<16x128xi32>
      %64 = vector.broadcast %53 : vector<16x1xf32> to vector<16x128xf32>
      %65 = arith.cmpf oeq, %51, %64 : vector<16x128xf32>
      %c128_i32 = arith.constant 128 : i32
      %66 = vector.broadcast %c128_i32 : i32 to vector<16x128xi32>
      %67 = arith.select %65, %63, %66 : vector<16x128xi1>, vector<16x128xi32>
      %cst_40 = arith.constant dense<2147483647> : vector<16xi32>
      %68 = vector.multi_reduction <minsi>, %67, %cst_40 [1] : vector<16x128xi32> to vector<16xi32>
      %69 = vector.shape_cast %68 : vector<16xi32> to vector<16x1xi32>
      %c0_41 = arith.constant 0 : index
      %c0_42 = arith.constant 0 : index
      %70 = vector.load %arg12[%c0_41, %c0_42] : memref<16x1xi32, #tpu.memory_space<vmem>>, vector<16x1xi32>
      tpu.vector_store %arg12[%c0_41, %c0_42], %69 {strides = array<i32>} : memref<16x1xi32, #tpu.memory_space<vmem>>, vector<16x1xi32>,
    } else {
    }
    return
  }
  func.func @transform_0(%arg0: i32) -> (i32, i32, i32) {
    %c0_i32 = arith.constant 0 : i32
    %c0_i32_0 = arith.constant 0 : i32
    %c0_i32_1 = arith.constant 0 : i32
    %c0_i32_2 = arith.constant 0 : i32
    return %c0_i32, %c0_i32_0, %c0_i32_1 : i32, i32, i32
  }
  func.func @transform_1(%arg0: i32) -> (i32, i32) {
    %c0_i32 = arith.constant 0 : i32
    %c0_i32_0 = arith.constant 0 : i32
    return %arg0, %c0_i32 : i32, i32
  }
  func.func @transform_2(%arg0: i32) -> (i32, i32) {
    %c0_i32 = arith.constant 0 : i32
    %c0_i32_0 = arith.constant 0 : i32
    %c0_i32_1 = arith.constant 0 : i32
    return %c0_i32, %c0_i32_0 : i32, i32
  }
  func.func @transform_3(%arg0: i32) -> (i32, i32) {
    %c0_i32 = arith.constant 0 : i32
    %c0_i32_0 = arith.constant 0 : i32
    %c0_i32_1 = arith.constant 0 : i32
    return %c0_i32, %c0_i32_0 : i32, i32
  }
  func.func @transform_4(%arg0: i32) -> (i32, i32) {
    %c0_i32 = arith.constant 0 : i32
    %c0_i32_0 = arith.constant 0 : i32
    %c0_i32_1 = arith.constant 0 : i32
    return %c0_i32, %c0_i32_0 : i32, i32
  }
  func.func @transform_5(%arg0: i32) -> (i32, i32) {
    %c0_i32 = arith.constant 0 : i32
    %c0_i32_0 = arith.constant 0 : i32
    %c0_i32_1 = arith.constant 0 : i32
    return %c0_i32, %c0_i32_0 : i32, i32
  }
  func.func @transform_6(%arg0: i32) -> (i32, i32) {
    %c0_i32 = arith.constant 0 : i32
    %c0_i32_0 = arith.constant 0 : i32
    %c0_i32_1 = arith.constant 0 : i32
    return %c0_i32, %c0_i32_0 : i32, i32
  }
  func.func @transform_7(%arg0: i32) -> (i32, i32) {
    %c0_i32 = arith.constant 0 : i32
    %c0_i32_0 = arith.constant 0 : i32
    %c0_i32_1 = arith.constant 0 : i32
    return %c0_i32, %c0_i32_0 : i32, i32
  }
  func.func @transform_8(%arg0: i32) -> (i32, i32) {
    %c0_i32 = arith.constant 0 : i32
    %c0_i32_0 = arith.constant 0 : i32
    %c0_i32_1 = arith.constant 0 : i32
    return %c0_i32, %c0_i32_0 : i32, i32
  }
  func.func @transform_9(%arg0: i32) -> (i32, i32) {
    %c0_i32 = arith.constant 0 : i32
    %c0_i32_0 = arith.constant 0 : i32
    %c0_i32_1 = arith.constant 0 : i32
    return %c0_i32, %c0_i32_0 : i32, i32
  }
  func.func @transform_10(%arg0: i32) -> (i32, i32) {
    %c0_i32 = arith.constant 0 : i32
    %c0_i32_0 = arith.constant 0 : i32
    %c0_i32_1 = arith.constant 0 : i32
    return %c0_i32, %c0_i32_0 : i32, i32
  }
  func.func @transform_11(%arg0: i32) -> (i32, i32) {
    %c0_i32 = arith.constant 0 : i32
    %c0_i32_0 = arith.constant 0 : i32
    %c0_i32_1 = arith.constant 0 : i32
    return %c0_i32, %c0_i32_0 : i32, i32
  }
  func.func @transform_12(%arg0: i32) -> (i32, i32) {
    %c0_i32 = arith.constant 0 : i32
    %c0_i32_0 = arith.constant 0 : i32
    %c0_i32_1 = arith.constant 0 : i32
    return %c0_i32, %c0_i32_0 : i32, i32
  }
  func.func @transform_13(%arg0: i32) -> (i32, i32) {
    %c0_i32 = arith.constant 0 : i32
    %c0_i32_0 = arith.constant 0 : i32
    %c0_i32_1 = arith.constant 0 : i32
    return %c0_i32, %c0_i32_0 : i32, i32
  }
}

</mosaic_0001>

<bundles_post_ra>
// kernel: tpu_custom_call.1
= control target key start
LH: loop header
LB: loop body
LE: loop exit
PB: predicated region body
PF: predicated region fallthrough
CT: control target
= control target key end

     0   :  { %s7673_s0 = inlined_call_operand.hbm [shape: bf16[2,16,4096], index: 0, kind: input, shape index: {}]   ;;  %s7674_s1 = inlined_call_operand.hbm [shape: s8[8192,512], index: 1, kind: input, shape index: {}]   ;;  %s7675_s2 = inlined_call_operand.hbm [shape: f32[1,512], index: 2, kind: input, shape index: {}]   ;;  %s7676_s3 = inlined_call_operand.hbm [shape: f32[1,512], index: 3, kind: input, shape index: {}]   ;;  %s7677_s4 = inlined_call_operand.hbm [shape: bf16[512,512], index: 4, kind: input, shape index: {}]   ;;  %s7678_s5 = inlined_call_operand.hbm [shape: f32[1,512], index: 5, kind: input, shape index: {}]   ;;  %s7679_s6 = inlined_call_operand.hbm [shape: bf16[256,128], index: 6, kind: input, shape index: {}]   ;;  %s7680_s7 = inlined_call_operand.hbm [shape: f32[1,128], index: 7, kind: input, shape index: {}]   ;;  %s7681_s8 = inlined_call_operand.hbm [shape: f32[16,256], index: 8, kind: input, shape index: {}]   ;;  %s7682_s9 = inlined_call_operand.hbm [shape: f32[16,512], index: 9, kind: output, shape index: {0}]   ;;  %s7683_s10 = inlined_call_operand.hbm [shape: f32[16,128], index: 10, kind: output, shape index: {1}]   ;;  %s7684_s11 = inlined_call_operand.vmem [shape: s32[16,1], index: 11, kind: output, shape index: {2}]   ;;  %s7685_s12 = inlined_call_operand.hbm [shape: f32[16,256], index: 12, kind: output, shape index: {3}]   ;;  %s7686_s13 = inlined_call_operand.hbm [shape: f32[16,256], index: 13, kind: output, shape index: {4}]  }
   0x1   :  { %7702 = sst [smem:[#allocation44_spill]] %s7673_s0 }
   0x2   :  { %7703 = sst [smem:[#allocation45_spill]] %s7675_s2 }
   0x3   :  { %7704 = sst [smem:[#allocation46_spill]] %s7676_s3 }
   0x4   :  { %19 = vsyncpa [#allocation4], 0 }
   0x5   :  { %20 = vsyncpa [#allocation7], 0 }
   0x6   :  { %22 = vsyncpa [#allocation7 + $0x1], 0 }
   0x7   :  { %23 = vsyncpa [#allocation10], 0 }
   0x8   :  { %24 = vsyncpa [#allocation13], 0 }
   0x9   :  { %25 = vsyncpa [#allocation16], 0 }
   0xa   :  { %26 = vsyncpa [#allocation5], 0 }
   0xb   :  { %27 = vsyncpa [#allocation20], 0 }
   0xc   :  { %28 = vsyncpa [#allocation23], 0  ;;  %s6411_s25 = smov 0   ;;  %s6413_s26 = smov 0  }
   0xd   :  { %s6415_s27 = smov 0   ;;  %s6417_s28 = smov 0  }
   0xe LB: > { %s6313_s29 = smov [#allocation8]   ;;  %s6432_s14 = sadd.s32 4294967295, %s6311_s28   ;;  %s6311_s28 = sphi %s6417_s28, %s7753_s28   ;;  %s6307_s27 = sphi %s6415_s27, %s7752_s27   ;;  %s6303_s26 = sphi %s6413_s26, %s7751_s26   ;;  %s6299_s25 = sphi %s6411_s25, %s7750_s25  }
   0xf   : > { %s364_s30 = sshll.u32 %s6313_s29, 4  ;;  %p5274_p0 = scmp.ge.s32.totalorder %s6311_s28, 1  ;;  %s365_s30 = int_to_ptr.vmem [resolvable:$true] %s364_s30 }
  0x10   : > { %p7687_p1 = scmp.eq.s32.totalorder %s6432_s14, 0  ;;  %p338_p2 = scmp.lt.s32.totalorder %s6311_s28, 3 }
  0x11   : > { %s6314_s16 = smov [#allocation9]   ;;  %s6315_s18 = smov [#allocation12]  }
  0x12   : > { %p6438_p4 = pnand %p5274_p0, %p338_p2  ;;  %s375_s17 = sshll.u32 %s6314_s16, 4  ;;  %s376_s17 = int_to_ptr.vmem [resolvable:$true] %s375_s17 }
  0x13   : > { %s399_s19 = sshll.u32 %s6315_s18, 4  ;;  %s6316_s21 = smov [#allocation15]   ;;  %s6450_s19 = int_to_ptr.vmem [resolvable:$true] %s399_s19 }
  0x14   : > { %s7705_s15 = scalar_select %p6438_p4, 1, 0 }
  0x15   : > { %p5568_p5 = pneg %p6438_p4  ;;  %s6452_s22 = sshll.u32 %s6316_s21, 4  ;;  %s424_s22 = int_to_ptr.vmem [resolvable:$true] %s6452_s22 }
  0x16   : > { %s5924_s24 = scalar_lea.vmem %s365_s30, 64  ;;  %p5932_p11 = scmp.lt.s32.totalorder %s365_s30, %s365_s30 }
  0x17   : > { %p6446_p6 = pnand %p5568_p5, %p7687_p1  ;;  %p5925_p8 = scmp.ne.s32.totalorder %s365_s30, %s5924_s24 }
  0x18   : > { %p5933_p12 = scmp.lt.s32.totalorder %s5924_s24, %s5924_s24 }
  0x19   : > { %p6456_p7 = pneg %p6446_p6 }
  0x1a   : > { %p5934_p13 = por %p5933_p12, %p5932_p11 }
  0x1b   : > { %p5927_p9 = pnand %p5925_p8, %p6456_p7 }
  0x1d   : > { %p5928_p10 = pneg %p5927_p9 }
  0x1f   : > { %p5935_p0 = pnand %p5934_p13, %p5928_p10 }
  0x21   : > { %5938 = shalt.err (!%p5935_p0)
}
  0x22   : > { %s7708_s2 = sld [smem:[#allocation45_spill]]  ;;  %s5950_s18 = scalar_lea.vmem %s376_s17, 64 }
  0x23   : > { %p5951_p2 = scmp.ne.s32.totalorder %s376_s17, %s5950_s18  ;;  %p5958_p1 = scmp.lt.s32.totalorder %s376_s17, %s376_s17 }
  0x24   : > { %p5959_p8 = scmp.lt.s32.totalorder %s5950_s18, %s5950_s18 }
  0x25   : > { %p5953_p5 = pnand %p5951_p2, %p6456_p7 }
  0x26   : > { %p5960_p9 = por %p5959_p8, %p5958_p1 }
  0x27   : > { %p5954_p3 = pneg %p5953_p5 }
  0x28   : > { %5574 = dma.hbm_to_vmem [thread:$0]  (!%p6446_p6), %s7708_s2, 64, %s365_s30, [#allocation7]  }
  0x29   : > { %p5961_p4 = pnand %p5960_p9, %p5954_p3 }
  0x2b   : > { %5964 = shalt.err (!%p5961_p4)
}
  0x2c   : > { %s7709_s3 = sld [smem:[#allocation46_spill]]  ;;  %s5976_s30 = scalar_lea.vmem %s6450_s19, 64 }
  0x2d   : > { %p5977_p10 = scmp.ne.s32.totalorder %s6450_s19, %s5976_s30  ;;  %p5984_p13 = scmp.lt.s32.totalorder %s6450_s19, %s6450_s19 }
  0x2e   : > { %p5985_p1 = scmp.lt.s32.totalorder %s5976_s30, %s5976_s30 }
  0x2f   : > { %p5979_p11 = pnand %p5977_p10, %p6456_p7 }
  0x30   : > { %p5986_p3 = por %p5985_p1, %p5984_p13 }
  0x31   : > { %p5980_p12 = pneg %p5979_p11 }
  0x32   : > { %5577 = dma.hbm_to_vmem [thread:$0]  (!%p6446_p6), %s7709_s3, 64, %s376_s17, [#allocation10]  }
  0x33   : > { %p5987_p4 = pnand %p5986_p3, %p5980_p12 }
  0x35   : > { %5990 = shalt.err (!%p5987_p4)
}
  0x36   : > { %5583 = dma.hbm_to_vmem [thread:$0]  (!%p6446_p6), %s7678_s5, 64, %s6450_s19, [#allocation13]  }
  0x37   : > { %s6317_s17 = smov [#allocation3]   ;;  %s6002_s21 = scalar_lea.vmem %s424_s22, 16 }
  0x38   : > { %s350_s18 = sshll.u32 %s6317_s17, 4  ;;  %p6003_p0 = scmp.ne.s32.totalorder %s424_s22, %s6002_s21  ;;  %s351_s18 = int_to_ptr.vmem [resolvable:$true] %s350_s18 }
  0x39   : > { %s6009_s24 = scalar_lea.vmem %s424_s22, 32  ;;  %p6010_p8 = scmp.lt.s32.totalorder %s424_s22, %s424_s22 }
  0x3a   : > { %p6005_p2 = pnand %p6003_p0, %p6456_p7  ;;  %p6011_p9 = scmp.lt.s32.totalorder %s6009_s24, %s6002_s21 }
  0x3c   : > { %p6006_p5 = pneg %p6005_p2  ;;  %p6012_p10 = por %p6011_p9, %p6010_p8 }
  0x3e   : > { %p6013_p11 = pnand %p6012_p10, %p6006_p5 }
  0x40   : > { %6016 = shalt.err (!%p6013_p11)
}
  0x41   : > { %5589 = dma.hbm_to_vmem [thread:$0]  (!%p6446_p6), %s7680_s7, 16, %s424_s22, [#allocation16]  }
  0x42   : > { %s6028_s19 = scalar_lea.vmem %s351_s18, 8192  ;;  %p6036_p3 = scmp.lt.s32.totalorder %s351_s18, %s351_s18 }
  0x43   : > { %p6029_p12 = scmp.ne.s32.totalorder %s351_s18, %s6028_s19  ;;  %p6037_p4 = scmp.lt.s32.totalorder %s6028_s19, %s6028_s19 }
  0x45   : > { %p6031_p13 = pnand %p6029_p12, %p6456_p7  ;;  %p6038_p0 = por %p6037_p4, %p6036_p3 }
  0x47   : > { %p6032_p1 = pneg %p6031_p13 }
  0x49   : > { %p6039_p2 = pnand %p6038_p0, %p6032_p1 }
  0x4b   : > { %6042 = shalt.err (!%p6039_p2)
}
  0x4c   : > { %s6318_s16 = smov 2048   ;;  %s6319_s17 = smov 128  }
  0x4d   : > { %s7710_s0 = sld [smem:[#allocation44_spill]]  ;;  %s6320_s22 = smov [#allocation11]  }
  0x4e   : > { %s385_s30 = sshll.u32 %s6320_s22, 4  ;;  %s386_s30 = int_to_ptr.vmem [resolvable:$true] %s385_s30 }
  0x4f   : > { %s6054_s29 = scalar_lea.vmem %s386_s30, 16384  ;;  %p6062_p10 = scmp.lt.s32.totalorder %s386_s30, %s386_s30 }
  0x50   : > { %p6055_p5 = scmp.ne.s32.totalorder %s386_s30, %s6054_s29  ;;  %p6063_p11 = scmp.lt.s32.totalorder %s6054_s29, %s6054_s29 }
  0x52   : > { %p6057_p8 = pnand %p6055_p5, %p6456_p7  ;;  %p6064_p12 = por %p6063_p11, %p6062_p10 }
  0x53   : > { %5571 = dma.hbm_to_vmem [thread:$0]  (!%p6446_p6), %s7710_s0, 8192, %s351_s18, [#allocation4], %s6318_s16, %s6318_s16, %s6319_s17  }
  0x54   : > { %p6058_p9 = pneg %p6057_p8 }
  0x56   : > { %p6065_p13 = pnand %p6064_p12, %p6058_p9 }
  0x58   : > { %6068 = shalt.err (!%p6065_p13)
}
  0x59   : > { %s7689_s19 = smov 256   ;;  %s6322_s2 = smov 16  }
  0x5a   : > { %5580 = dma.hbm_to_vmem [thread:$0]  (!%p6446_p6), %s7677_s4, 16384, %s386_s30, [#allocation10], %s7689_s19, %s7689_s19, %s6322_s2  }
  0x5b   : > { %s6323_s17 = smov [#allocation14]  }
  0x5c   : > { %s409_s21 = sshll.u32 %s6323_s17, 4  ;;  %s410_s21 = int_to_ptr.vmem [resolvable:$true] %s409_s21 }
  0x5d   : > { %s6080_s24 = scalar_lea.vmem %s410_s21, 2048  ;;  %p6088_p0 = scmp.lt.s32.totalorder %s410_s21, %s410_s21 }
  0x5e   : > { %p6081_p1 = scmp.ne.s32.totalorder %s410_s21, %s6080_s24  ;;  %p6089_p2 = scmp.lt.s32.totalorder %s6080_s24, %s6080_s24 }
  0x60   : > { %p6083_p3 = pnand %p6081_p1, %p6456_p7  ;;  %p6090_p5 = por %p6089_p2, %p6088_p0 }
  0x62   : > { %p6084_p4 = pneg %p6083_p3 }
  0x64   : > { %p6091_p8 = pnand %p6090_p5, %p6084_p4 }
  0x66   : > { %6094 = shalt.err (!%p6091_p8)
}
  0x67   : > { %s6324_s22 = smov 64   ;;  %s6325_s29 = smov 4  }
  0x68   : > { %5586 = dma.hbm_to_vmem [thread:$0]  (!%p6446_p6), %s7679_s6, 2048, %s410_s21, [#allocation13], %s6324_s22, %s6324_s22, %s6325_s29  }
  0x69   : > { %s6326_s16 = smov [#allocation17]  }
  0x6a   : > { %s433_s17 = sshll.u32 %s6326_s16, 4  ;;  %s434_s17 = int_to_ptr.vmem [resolvable:$true] %s433_s17 }
  0x6b   : > { %s6106_s19 = scalar_lea.vmem %s434_s17, 512  ;;  %p6114_p12 = scmp.lt.s32.totalorder %s434_s17, %s434_s17 }
  0x6c   : > { %p6107_p9 = scmp.ne.s32.totalorder %s434_s17, %s6106_s19  ;;  %p6115_p13 = scmp.lt.s32.totalorder %s6106_s19, %s6106_s19 }
  0x6e   : > { %p6109_p10 = pnand %p6107_p9, %p6456_p7  ;;  %p6116_p1 = por %p6115_p13, %p6114_p12 }
  0x70   : > { %p6110_p11 = pneg %p6109_p10 }
  0x72   : > { %p6117_p3 = pnand %p6116_p1, %p6110_p11 }
  0x74   : > { %6120 = shalt.err (!%p6117_p3)
}
  0x75   : > { %s7711_s24 = smov 256   ;;  %s6529_s20 = sadd.s32 1, %s6311_s28  }
  0x76   : > { %5592 = dma.hbm_to_vmem [thread:$0]  (!%p6446_p6), %s7681_s8, 512, %s434_s17, [#allocation16], %s7711_s24, %s7711_s24, %s6322_s2  }
  0x77   : > { %s62_s23 = sadd.s32 1, %s6307_s27  ;;  %s59_s19 = ssub.s32 %s6311_s28, %s6529_s20 }
  0x78   : > { %p69_p7 = scmp.ne.s32.totalorder %s6307_s27, %s6303_s26  ;;  %p60_p4 = scmp.eq.s32.totalorder %s59_s19, 0 }
  0x79   : > { %p70_p0 = scmp.eq.s32.totalorder %s6311_s28, 0  ;;  %p75_p2 = scmp.ne.s32.totalorder %s6303_s26, %s6299_s25 }
  0x7a   : > { %p5605_p5 = scmp.lt.s32.totalorder %s6311_s28, 2  ;;  %p7712_p9 = scmp.eq.s32.totalorder %s6432_s14, 0 }
  0x7b   : > { %s6541_s22 = scalar_select %p60_p4, %s6307_s27, %s62_s23  }
  0x7c   : > { %p71_p8 = por %p70_p0, %p69_p7  ;;  %p6545_p10 = por %p7712_p9, %p75_p2 }
  0x7d   : > { %s447_s30 = sand.u32 1, %s6311_s28   ;;  %s449_s2 = sand.u32 1, %s6307_s27  }
  0x7e   : > { %s7713_s29 = scalar_select %p6545_p10, 1, 0 }
  0x7f   : > { %s5284_s16 = sshll.u32 %s449_s2, 12  ;;  %s5494_s17 = sshll.u32 %s6311_s28, 16 }
  0x80   : > { %s6555_s21 = scalar_lea.hbm %s7674_s1, %s5494_s17  ;;  %s451_s25 = scalar_lea.vmem [#allocation6], %s5284_s16 }
  0x81   : > { %s459_s23 = sshll.u32 %s451_s25, 4  ;;  %p6559_p6 = pnand %p5605_p5, %p71_p8  ;;  %s6557_s23 = int_to_ptr.vmem [resolvable:$true] %s459_s23 }
  0x82   : > { %s6563_s0 = scalar_lea.sflag [#allocation7], %s447_s30  ;;  %s6121_s28 = scalar_lea.hbm %s6555_s21, 65536 }
  0x83   : > { %p6122_p11 = scmp.ne.s32.totalorder %s6555_s21, %s6121_s28  ;;  %p6123_p12 = pneg %p6559_p6 }
  0x84   : > { %s6126_s16 = scalar_lea.hbm %s7674_s1, 131072  ;;  %p6127_p3 = scmp.lt.s32.totalorder %s6555_s21, %s7674_s1 }
  0x85   : > { %p6124_p13 = pnand %p6123_p12, %p6122_p11  ;;  %p6128_p7 = scmp.lt.s32.totalorder %s6126_s16, %s6121_s28 }
  0x87   : > { %p6125_p1 = pneg %p6124_p13  ;;  %p6129_p4 = por %p6128_p7, %p6127_p3 }
  0x89   : > { %p6130_p0 = pnand %p6129_p4, %p6125_p1 }
  0x8b   : > { %6133 = shalt.err (!%p6130_p0)
}
  0x8c   : > { %s6134_s30 = scalar_lea.vmem %s6557_s23, 65536  ;;  %s6327_s25 = smov [#allocation6]  }
  0x8d   : > { %p6135_p2 = scmp.ne.s32.totalorder %s6557_s23, %s6134_s30  ;;  %s6139_s3 = sshll.u32 %s6327_s25, 4  ;;  %s6140_s3 = int_to_ptr.vmem [resolvable:$false] %s6139_s3 }
  0x8e   : > { %s6141_s2 = scalar_lea.vmem %s6140_s3, 131072  ;;  %p6142_p9 = scmp.lt.s32.totalorder %s6557_s23, %s6140_s3 }
  0x8f   : > { %p6137_p5 = pnand %p6135_p2, %p6123_p12  ;;  %p6143_p11 = scmp.lt.s32.totalorder %s6141_s2, %s6134_s30 }
  0x91   : > { %p6138_p8 = pneg %p6137_p5  ;;  %p6144_p13 = por %p6143_p11, %p6142_p9 }
  0x93   : > { %p6145_p10 = pnand %p6144_p13, %p6138_p8 }
  0x95   : > { %6148 = shalt.err (!%p6145_p10)
}
  0x96   : > { %s6328_s28 = smov 512   ;;  %s6329_s17 = smov 32  }
  0x97   : > { %5596 = dma.hbm_to_vmem [thread:$0]  (!%p6559_p6), %s6555_s21, 65536, %s6557_s23, %s6563_s0, %s6328_s28, %s6328_s28, %s6329_s17  }
  0x98   : > { %p7715_p12 = scmp.ne.s32.totalorder %s7705_s15, 0 }
  0x9a   : > { %471 = sbr.rel (%p7715_p12) target bundleno = 2497 (0x9c1), region = 56 }
  0x9f   : > { %p7716_p1 = scmp.eq.s32.totalorder %s6432_s14, 0 }
  0xa1   : > { %6262 = dma.done.wait (%p7716_p1), [#allocation4], 8192   ;;  %p7717_p3 = pmov %p7716_p1 }
  0xa2   : > { %s477_s3 = sand.u32 1, %s6432_s14   ;;  %s479_s16 = sand.u32 1, %s6303_s26  }
  0xa3   : > { %6264 = vsyncadd (%p7717_p3), [#allocation4], 4294959104  ;;  %s5290_s24 = sshll.u32 %s479_s16, 12  ;;  %s478_s18 = scalar_lea.sflag [#allocation7], %s477_s3 }
  0xa4   : > { %s6592_s30 = scalar_lea.vmem [#allocation6], %s5290_s24  ;;  %p7718_p10 = scmp.ne.s32.totalorder %s7713_s29, 0 }
  0xa6   : > { %6266 = dma.done.wait (%p7718_p10), %s478_s18, 65536  }
  0xa7   : > { %6268 = vsyncadd (%p7718_p10), %s478_s18, 4294901760  ;;  %p7719_p6 = pmov %p7716_p1 }
  0xa8   : > { %p7720_p7 = pmov %p7716_p1 }
  0xa9   : > { %6270 = dma.done.wait (%p7719_p6), [#allocation7], 64  }
  0xaa   : > { %6272 = vsyncadd (%p7720_p7), [#allocation7], 4294967232  ;;  %p7721_p4 = pmov %p7716_p1 }
  0xab   : > { %p7722_p0 = pmov %p7716_p1 }
  0xac   : > { %6274 = dma.done.wait (%p7721_p4), [#allocation10], 16448  }
  0xad   : > { %6276 = vsyncadd (%p7722_p0), [#allocation10], 4294950848  ;;  %p7723_p2 = pmov %p7722_p0 }
  0xae   : > { %p7724_p5 = pmov %p7722_p0 }
  0xaf   : > { %6278 = dma.done.wait (%p7723_p2), [#allocation13], 2112  }
  0xb0   : > { %6280 = vsyncadd (%p7724_p5), [#allocation13], 4294965184  ;;  %p7725_p8 = pmov %p7722_p0 }
  0xb1   : > { %p7726_p9 = pmov %p7722_p0 }
  0xb2   : > { %6282 = dma.done.wait (%p7725_p8), [#allocation16], 528  }
  0xb3   : > { %6284 = vsyncadd (%p7726_p9), [#allocation16], 4294966768  ;;  %p7727_p11 = scmp.ne.s32.totalorder %s6432_s14, 0 }
  0xb5   : > { %552 = sbr.rel (%p7727_p11) target bundleno = 191 (0xbf), region = 96 }
  0xba   : > { %v6330_v0 = vmov 0.0  }
  0xbb   : > { %553 = vst [vmem:[#allocation2 + $0x30] sm:$0xff] %v6330_v0  ;;  %554 = vst [vmem:[#allocation2] sm:$0xff] %v6330_v0 }
  0xbc   : > { %555 = vst [vmem:[#allocation2 + $0x18] sm:$0xff] %v6330_v0  ;;  %556 = vst [vmem:[#allocation2 + $0x10] sm:$0xff] %v6330_v0 }
  0xbd   : > { %557 = vst [vmem:[#allocation2 + $0x8] sm:$0xff] %v6330_v0  ;;  %558 = vst [vmem:[#allocation2 + $0x20] sm:$0xff] %v6330_v0 }
  0xbe   : > { %559 = vst [vmem:[#allocation2 + $0x28] sm:$0xff] %v6330_v0  ;;  %560 = vst [vmem:[#allocation2 + $0x38] sm:$0xff] %v6330_v0 }
  0xbf PF: > { %v617_v1 = vld [vmem:[%s6592_s30 + $0x68] sm:$0xff]  ;;  %v616_v3 = vld [vmem:[%s6592_s30 + $0x60] sm:$0xff]  ;;  %s5495_s0 = sshll.u32 %s6432_s14, 8  ;;  %p5333_p13 = scmp.ne.s32.totalorder %s6432_s14, 1 }
  0xc0   : > { %v649_v2 = vld [vmem:[%s6592_s30 + $0x168] sm:$0xff]  ;;  %v1141_v4 = vunpack.c.l.s8.bf16 %v617_v1  ;;  %v1145_v5 = vunpack.c.h.s8.bf16 %v617_v1  ;;  %v648_v8 = vld [vmem:[%s6592_s30 + $0x160] sm:$0xff]  ;;  %v1144_v9 = vunpack.c.h.s8.bf16 %v616_v3  ;;  %v1140_v13 = vunpack.c.l.s8.bf16 %v616_v3  ;;  %s6629_s15 = scalar_lea.vmem [#allocation3], %s5495_s0 }
  0xc1   : > { %v1205_v6 = vunpack.c.l.s8.bf16 %v649_v2  ;;  %v1209_v7 = vunpack.c.h.s8.bf16 %v649_v2  ;;  %v1208_v10 = vunpack.c.h.s8.bf16 %v648_v8  ;;  %v613_v11 = vld [vmem:[%s6592_s30 + $0x48] sm:$0xff]  ;;  %v1204_v14 = vunpack.c.l.s8.bf16 %v648_v8  ;;  %v612_v17 = vld [vmem:[%s6592_s30 + $0x40] sm:$0xff] }
  0xc2   : > { %v645_v12 = vld [vmem:[%s6592_s30 + $0x148] sm:$0xff]  ;;  %2300 = vmatprep.subr.bf16.mxu0 %v1145_v5  ;;  %v1137_v15 = vunpack.c.h.s8.bf16 %v613_v11  ;;  %v644_v18 = vld [vmem:[%s6592_s30 + $0x140] sm:$0xff]  ;;  %v1136_v19 = vunpack.c.h.s8.bf16 %v612_v17  ;;  %v1133_v21 = vunpack.c.l.s8.bf16 %v613_v11  ;;  %v1132_v25 = vunpack.c.l.s8.bf16 %v612_v17 }
  0xc3   : > { %2343 = vmatprep.subr.bf16.mxu1 %v1209_v7  ;;  %2301 = vmatpush1.bf16.msra.mxu0 %v1144_v9  ;;  %v1201_v16 = vunpack.c.h.s8.bf16 %v645_v12  ;;  %v1200_v20 = vunpack.c.h.s8.bf16 %v644_v18  ;;  %v1197_v22 = vunpack.c.l.s8.bf16 %v645_v12  ;;  %v609_v23 = vld [vmem:[%s6592_s30 + $0x28] sm:$0xff]  ;;  %v1196_v26 = vunpack.c.l.s8.bf16 %v644_v18  ;;  %v608_v29 = vld [vmem:[%s6592_s30 + $0x20] sm:$0xff] }
  0xc4   : > { %2344 = vmatpush1.bf16.msra.mxu1 %v1208_v10  ;;  %2302 = vmatprep.subr.bf16.mxu0 %v1141_v4  ;;  %v641_v24 = vld [vmem:[%s6592_s30 + $0x128] sm:$0xff]  ;;  %v1129_v27 = vunpack.c.h.s8.bf16 %v609_v23  ;;  %v640_v30 = vld [vmem:[%s6592_s30 + $0x120] sm:$0xff]  ;;  %v1128_v35 = vunpack.c.h.s8.bf16 %v608_v29  ;;  %v1125_v37 = vunpack.c.l.s8.bf16 %v609_v23  ;;  %v1124_v43 = vunpack.c.l.s8.bf16 %v608_v29 }
  0xc5   : > { %2345 = vmatprep.subr.bf16.mxu1 %v1205_v6  ;;  %v1193_v28 = vunpack.c.h.s8.bf16 %v641_v24  ;;  %v6632_v31 = vld [vmem:[%s6629_s15] sm:$0xff]  ;;  %v6638_v33 = vld [vmem:[%s6629_s15 + $0x8] sm:$0xff]  ;;  %v1192_v36 = vunpack.c.h.s8.bf16 %v640_v30  ;;  %v1189_v38 = vunpack.c.l.s8.bf16 %v641_v24  ;;  %v1188_v44 = vunpack.c.l.s8.bf16 %v640_v30 }
  0xc6   : > { %v6635_v32 = vld [vmem:[%s6629_s15 + $0x80] sm:$0xff]  ;;  %v6641_v34 = vld [vmem:[%s6629_s15 + $0x88] sm:$0xff] }
  0xc7   : > { %2303 = vmatpush1.bf16.msra.mxu0 %v1140_v13  ;;  %v6645_v39 = vcombine.high %v6632_v31, %v6635_v32  ;;  %v605_v40 = vld [vmem:[%s6592_s30 + $0x8] sm:$0xff]  ;;  %v6651_v42 = vcombine.high %v6638_v33, %v6641_v34  ;;  %v604_v47 = vld [vmem:[%s6592_s30] sm:$0xff] }
  0xc8   : > { %2346 = vmatpush1.bf16.msra.mxu1 %v1204_v14  ;;  %2304 = vmatprep.subr.bf16.mxu0 %v1137_v15  ;;  %v637_v41 = vld [vmem:[%s6592_s30 + $0x108] sm:$0xff]  ;;  %v1121_v45 = vunpack.c.h.s8.bf16 %v605_v40  ;;  %v636_v48 = vld [vmem:[%s6592_s30 + $0x100] sm:$0xff]  ;;  %v1120_v49 = vunpack.c.h.s8.bf16 %v604_v47  ;;  %v1117_v51 = vunpack.c.l.s8.bf16 %v605_v40  ;;  %v1116_v55 = vunpack.c.l.s8.bf16 %v604_v47 }
  0xc9   : > { %2347 = vmatprep.subr.bf16.mxu1 %v1201_v16  ;;  %2332 = vmatprep.mubr.bf16.mxu0 %v6645_v39  ;;  %v1185_v46 = vunpack.c.h.s8.bf16 %v637_v41  ;;  %v1184_v50 = vunpack.c.h.s8.bf16 %v636_v48  ;;  %v1181_v52 = vunpack.c.l.s8.bf16 %v637_v41  ;;  %v633_v53 = vld [vmem:[%s6592_s30 + $0xe8] sm:$0xff]  ;;  %v1180_v56 = vunpack.c.l.s8.bf16 %v636_v48  ;;  %v632_v59 = vld [vmem:[%s6592_s30 + $0xe0] sm:$0xff] }
  0xca   : > { %2375 = vmatprep.mubr.bf16.mxu1 %v6651_v42  ;;  %v665_v54 = vld [vmem:[%s6592_s30 + $0x1e8] sm:$0xff]  ;;  %v1177_v57 = vunpack.c.h.s8.bf16 %v633_v53  ;;  %v664_v60 = vld [vmem:[%s6592_s30 + $0x1e0] sm:$0xff]  ;;  %v1176_v61 = vunpack.c.h.s8.bf16 %v632_v59  ;;  %v1173_v63 = vunpack.c.l.s8.bf16 %v633_v53  ;;  %v1172_v3 = vunpack.c.l.s8.bf16 %v632_v59 }
  0xcb   : > { %2305 = vmatpush1.bf16.msra.mxu0 %v1136_v19  ;;  %v1241_v58 = vunpack.c.h.s8.bf16 %v665_v54  ;;  %v1240_v62 = vunpack.c.h.s8.bf16 %v664_v60  ;;  %v1237_v0 = vunpack.c.l.s8.bf16 %v665_v54  ;;  %v629_v1 = vld [vmem:[%s6592_s30 + $0xc8] sm:$0xff]  ;;  %v1236_v4 = vunpack.c.l.s8.bf16 %v664_v60  ;;  %v628_v7 = vld [vmem:[%s6592_s30 + $0xc0] sm:$0xff]  ;;  %v6689_v54 = vld [vmem:[%s6629_s15 + $0x90] sm:$0xff] }
  0xcc   : > { %2348 = vmatpush1.bf16.msra.mxu1 %v1200_v20  ;;  %2306 = vmatprep.subr.bf16.mxu0 %v1133_v21  ;;  %v661_v2 = vld [vmem:[%s6592_s30 + $0x1c8] sm:$0xff]  ;;  %v1169_v5 = vunpack.c.h.s8.bf16 %v629_v1  ;;  %v660_v8 = vld [vmem:[%s6592_s30 + $0x1c0] sm:$0xff]  ;;  %v1168_v9 = vunpack.c.h.s8.bf16 %v628_v7  ;;  %v1165_v11 = vunpack.c.l.s8.bf16 %v629_v1  ;;  %v1164_v15 = vunpack.c.l.s8.bf16 %v628_v7 }
  0xcd   : > { %2349 = vmatprep.subr.bf16.mxu1 %v1197_v22  ;;  %v1233_v6 = vunpack.c.h.s8.bf16 %v661_v2  ;;  %v1232_v10 = vunpack.c.h.s8.bf16 %v660_v8  ;;  %v1229_v12 = vunpack.c.l.s8.bf16 %v661_v2  ;;  %v625_v13 = vld [vmem:[%s6592_s30 + $0xa8] sm:$0xff]  ;;  %v1228_v16 = vunpack.c.l.s8.bf16 %v660_v8  ;;  %v624_v19 = vld [vmem:[%s6592_s30 + $0xa0] sm:$0xff] }
  0xce   : > { %v657_v14 = vld [vmem:[%s6592_s30 + $0x1a8] sm:$0xff]  ;;  %v1161_v17 = vunpack.c.h.s8.bf16 %v625_v13  ;;  %v656_v20 = vld [vmem:[%s6592_s30 + $0x1a0] sm:$0xff]  ;;  %v1160_v21 = vunpack.c.h.s8.bf16 %v624_v19  ;;  %v1157_v23 = vunpack.c.l.s8.bf16 %v625_v13  ;;  %v6686_v53 = vcombine.low %v6638_v33, %v6641_v34 }
  0xcf   : > { %2307 = vmatpush1.bf16.msra.mxu0 %v1132_v25  ;;  %v1225_v18 = vunpack.c.h.s8.bf16 %v657_v14  ;;  %v1224_v22 = vunpack.c.h.s8.bf16 %v656_v20  ;;  %v1221_v24 = vunpack.c.l.s8.bf16 %v657_v14  ;;  %v621_v25 = vld [vmem:[%s6592_s30 + $0x88] sm:$0xff]  ;;  %v676_v1 = vld [vmem:[%s6592_s30 + $0x240] sm:$0xff] }
  0xd0   : > { %2350 = vmatpush1.bf16.msra.mxu1 %v1196_v26  ;;  %2308 = vmatprep.subr.bf16.mxu0 %v1129_v27  ;;  %v653_v26 = vld [vmem:[%s6592_s30 + $0x188] sm:$0xff]  ;;  %v1156_v27 = vunpack.c.l.s8.bf16 %v624_v19  ;;  %v1153_v29 = vunpack.c.h.s8.bf16 %v621_v25  ;;  %v1149_v40 = vunpack.c.l.s8.bf16 %v621_v25  ;;  %v708_v2 = vld [vmem:[%s6592_s30 + $0x340] sm:$0xff] }
  0xd1   : > { %2351 = vmatprep.subr.bf16.mxu1 %v1193_v28  ;;  %v1220_v28 = vunpack.c.l.s8.bf16 %v656_v20  ;;  %v1217_v30 = vunpack.c.h.s8.bf16 %v653_v26  ;;  %v1213_v41 = vunpack.c.l.s8.bf16 %v653_v26  ;;  %v709_v60 = vld [vmem:[%s6592_s30 + $0x348] sm:$0xff]  ;;  %v672_v13 = vld [vmem:[%s6592_s30 + $0x220] sm:$0xff] }
  0xd2   : > { %v673_v7 = vld [vmem:[%s6592_s30 + $0x228] sm:$0xff]  ;;  %v704_v14 = vld [vmem:[%s6592_s30 + $0x320] sm:$0xff] }
  0xd3   : > { %2309 = vmatpush1.bf16.msra.mxu0 %v1128_v35  ;;  %v620_v35 = vld [vmem:[%s6592_s30 + $0x80] sm:$0xff]  ;;  %v705_v8 = vld [vmem:[%s6592_s30 + $0x328] sm:$0xff] }
  0xd4   : > { %2352 = vmatpush1.bf16.msra.mxu1 %v1192_v36  ;;  %2310 = vmatprep.subr.bf16.mxu0 %v1125_v37  ;;  %v652_v36 = vld [vmem:[%s6592_s30 + $0x180] sm:$0xff]  ;;  %v1152_v37 = vunpack.c.h.s8.bf16 %v620_v35  ;;  %v669_v19 = vld [vmem:[%s6592_s30 + $0x208] sm:$0xff] }
  0xd5   : > { %2353 = vmatprep.subr.bf16.mxu1 %v1189_v38  ;;  %v1216_v38 = vunpack.c.h.s8.bf16 %v652_v36  ;;  %v701_v20 = vld [vmem:[%s6592_s30 + $0x308] sm:$0xff]  ;;  %v668_v25 = vld [vmem:[%s6592_s30 + $0x200] sm:$0xff] }
  0xd6   : > { %v700_v26 = vld [vmem:[%s6592_s30 + $0x300] sm:$0xff] }
  0xd7   : > { %2311 = vmatpush1.bf16.msra.mxu0 %v1124_v43  ;;  %v681_v43 = vld [vmem:[%s6592_s30 + $0x268] sm:$0xff] }
  0xd8   : > { %2354 = vmatpush1.bf16.msra.mxu1 %v1188_v44  ;;  %2312 = vmatprep.subr.bf16.mxu0 %v1121_v45  ;;  %v713_v44 = vld [vmem:[%s6592_s30 + $0x368] sm:$0xff]  ;;  %v1148_v45 = vunpack.c.l.s8.bf16 %v620_v35  ;;  %v1273_v47 = vunpack.c.h.s8.bf16 %v681_v43  ;;  %v1269_v59 = vunpack.c.l.s8.bf16 %v681_v43  ;;  %v696_v43 = vld [vmem:[%s6592_s30 + $0x2e0] sm:$0xff] }
  0xd9   : > { %2355 = vmatprep.subr.bf16.mxu1 %v1185_v46  ;;  %v1212_v46 = vunpack.c.l.s8.bf16 %v652_v36  ;;  %v1337_v48 = vunpack.c.h.s8.bf16 %v713_v44  ;;  %v697_v35 = vld [vmem:[%s6592_s30 + $0x2e8] sm:$0xff] }
  0xda   : > { %v729_v36 = vld [vmem:[%s6592_s30 + $0x3e8] sm:$0xff] }
  0xdb   : > { %2313 = vmatpush1.bf16.msra.mxu0 %v1120_v49  ;;  %v680_v49 = vld [vmem:[%s6592_s30 + $0x260] sm:$0xff] }
  0xdc   : > { %2356 = vmatpush1.bf16.msra.mxu1 %v1184_v50  ;;  %2314 = vmatprep.subr.bf16.mxu0 %v1117_v51  ;;  %v712_v50 = vld [vmem:[%s6592_s30 + $0x360] sm:$0xff]  ;;  %v6678_v51 = vld [vmem:[%s6629_s15 + $0x10] sm:$0xff] }
  0xdd   : > { %2357 = vmatprep.subr.bf16.mxu1 %v1181_v52  ;;  %v6682_v52 = vcombine.low %v6632_v31, %v6635_v32  ;;  %v1333_v31 = vunpack.c.l.s8.bf16 %v713_v44  ;;  %v677_v32 = vld [vmem:[%s6592_s30 + $0x248] sm:$0xff]  ;;  %v6701_v33 = vcombine.high %v6678_v51, %v6689_v54  ;;  %v728_v44 = vld [vmem:[%s6592_s30 + $0x3e0] sm:$0xff] }
  0xdf   : > { %2315 = vmatpush1.bf16.msra.mxu0 %v1116_v55  ;;  %v6692_v55 = vld [vmem:[%s6629_s15 + $0x18] sm:$0xff] }
  0xe0   : > { %2358 = vmatpush1.bf16.msra.mxu1 %v1180_v56  ;;  %2316 = vmatprep.subr.bf16.mxu0 %v1177_v57  ;;  %v6695_v56 = vld [vmem:[%s6629_s15 + $0x98] sm:$0xff]  ;;  %v1272_v57 = vunpack.c.h.s8.bf16 %v680_v49 }
  0xe1   : > { %2359 = vmatprep.subr.bf16.mxu1 %v1241_v58  ;;  %v1336_v58 = vunpack.c.h.s8.bf16 %v712_v50  ;;  %v6705_v34 = vcombine.high %v6692_v55, %v6695_v56 }
  0xe3   : > { %2317 = vmatpush2.bf16.msra.mxu0 %v1176_v61  ;;  %v1268_v61 = vunpack.c.l.s8.bf16 %v680_v49  ;;  %v693_v49 = vld [vmem:[%s6592_s30 + $0x2c8] sm:$0xff] }
  0xe4   : > { %2360 = vmatpush2.bf16.msra.mxu1 %v1240_v62  ;;  %2318 = vmatprep.subr.bf16.mxu0 %v1173_v63  ;;  %v1332_v62 = vunpack.c.l.s8.bf16 %v712_v50  ;;  %v1265_v63 = vunpack.c.h.s8.bf16 %v677_v32  ;;  %v725_v50 = vld [vmem:[%s6592_s30 + $0x3c8] sm:$0xff] }
  0xe5   : > { %2361 = vmatprep.subr.bf16.mxu1 %v1237_v0  ;;  %v1329_v0 = vunpack.c.h.s8.bf16 %v709_v60 }
  0xe7   : > { %2319 = vmatpush2.bf16.msra.mxu0 %v1172_v3  ;;  %v1264_v3 = vunpack.c.h.s8.bf16 %v676_v1 }
  0xe8   : > { %2362 = vmatpush2.bf16.msra.mxu1 %v1236_v4  ;;  %2320 = vmatprep.subr.bf16.mxu0 %v1169_v5  ;;  %v1328_v4 = vunpack.c.h.s8.bf16 %v708_v2  ;;  %v1261_v5 = vunpack.c.l.s8.bf16 %v677_v32  ;;  %v692_v32 = vld [vmem:[%s6592_s30 + $0x2c0] sm:$0xff] }
  0xe9   : > { %2363 = vmatprep.subr.bf16.mxu1 %v1233_v6  ;;  %v1325_v6 = vunpack.c.l.s8.bf16 %v709_v60  ;;  %v724_v60 = vld [vmem:[%s6592_s30 + $0x3c0] sm:$0xff] }
  0xeb   : > { %2321 = vmatpush2.bf16.msra.mxu0 %v1168_v9  ;;  %v1260_v9 = vunpack.c.l.s8.bf16 %v676_v1  ;;  %v689_v1 = vld [vmem:[%s6592_s30 + $0x2a8] sm:$0xff] }
  0xec   : > { %2364 = vmatpush2.bf16.msra.mxu1 %v1232_v10  ;;  %2322 = vmatprep.subr.bf16.mxu0 %v1165_v11  ;;  %v1324_v10 = vunpack.c.l.s8.bf16 %v708_v2  ;;  %v1257_v11 = vunpack.c.h.s8.bf16 %v673_v7  ;;  %v721_v2 = vld [vmem:[%s6592_s30 + $0x3a8] sm:$0xff] }
  0xed   : > { %2365 = vmatprep.subr.bf16.mxu1 %v1229_v12  ;;  %v1321_v12 = vunpack.c.h.s8.bf16 %v705_v8 }
  0xef   : > { %2323 = vmatpush2.bf16.msra.mxu0 %v1164_v15  ;;  %v1256_v15 = vunpack.c.h.s8.bf16 %v672_v13 }
  0xf0   : > { %2366 = vmatpush2.bf16.msra.mxu1 %v1228_v16  ;;  %2324 = vmatprep.subr.bf16.mxu0 %v1161_v17  ;;  %v1320_v16 = vunpack.c.h.s8.bf16 %v704_v14  ;;  %v1253_v17 = vunpack.c.l.s8.bf16 %v673_v7  ;;  %v688_v7 = vld [vmem:[%s6592_s30 + $0x2a0] sm:$0xff] }
  0xf1   : > { %2367 = vmatprep.subr.bf16.mxu1 %v1225_v18  ;;  %v1317_v18 = vunpack.c.l.s8.bf16 %v705_v8  ;;  %v720_v8 = vld [vmem:[%s6592_s30 + $0x3a0] sm:$0xff] }
  0xf3   : > { %2325 = vmatpush2.bf16.msra.mxu0 %v1160_v21  ;;  %v1252_v21 = vunpack.c.l.s8.bf16 %v672_v13  ;;  %v685_v13 = vld [vmem:[%s6592_s30 + $0x288] sm:$0xff] }
  0xf4   : > { %2368 = vmatpush2.bf16.msra.mxu1 %v1224_v22  ;;  %2326 = vmatprep.subr.bf16.mxu0 %v1157_v23  ;;  %v1316_v22 = vunpack.c.l.s8.bf16 %v704_v14  ;;  %v1249_v23 = vunpack.c.h.s8.bf16 %v669_v19  ;;  %v717_v14 = vld [vmem:[%s6592_s30 + $0x388] sm:$0xff] }
  0xf5   : > { %2369 = vmatprep.subr.bf16.mxu1 %v1221_v24  ;;  %v1313_v24 = vunpack.c.h.s8.bf16 %v701_v20 }
  0xf7   : > { %2327 = vmatpush2.bf16.msra.mxu0 %v1156_v27  ;;  %v1248_v27 = vunpack.c.h.s8.bf16 %v668_v25 }
  0xf8   : > { %2370 = vmatpush2.bf16.msra.mxu1 %v1220_v28  ;;  %2328 = vmatprep.subr.bf16.mxu0 %v1153_v29  ;;  %v1312_v28 = vunpack.c.h.s8.bf16 %v700_v26  ;;  %v1245_v29 = vunpack.c.l.s8.bf16 %v669_v19  ;;  %v684_v19 = vld [vmem:[%s6592_s30 + $0x280] sm:$0xff] }
  0xf9   : > { %2371 = vmatprep.subr.bf16.mxu1 %v1217_v30  ;;  %v1309_v30 = vunpack.c.l.s8.bf16 %v701_v20  ;;  %v716_v20 = vld [vmem:[%s6592_s30 + $0x380] sm:$0xff] }
  0xfb   : > { %2329 = vmatpush2.bf16.msra.mxu0 %v1152_v37  ;;  %v1244_v37 = vunpack.c.l.s8.bf16 %v668_v25  ;;  %v745_v25 = vld [vmem:[%s6592_s30 + $0x468] sm:$0xff] }
  0xfc   : > { %2372 = vmatpush2.bf16.msra.mxu1 %v1216_v38  ;;  %2330 = vmatprep.subr.bf16.mxu0 %v1149_v40  ;;  %v1308_v38 = vunpack.c.l.s8.bf16 %v700_v26  ;;  %v1305_v40 = vunpack.c.h.s8.bf16 %v697_v35  ;;  %v777_v26 = vld [vmem:[%s6592_s30 + $0x568] sm:$0xff] }
  0xfd   : > { %2373 = vmatprep.subr.bf16.mxu1 %v1213_v41  ;;  %v1369_v41 = vunpack.c.h.s8.bf16 %v729_v36 }
  0xff   : > { %2331 = vmatpush2.bf16.msra.mxu0 %v1148_v45  ;;  %v1304_v45 = vunpack.c.h.s8.bf16 %v696_v43 }
 0x100   : > { %2374 = vmatpush2.bf16.msra.mxu1 %v1212_v46  ;;  %2386 = vmatprep.subr.bf16.mxu0 %v1273_v47  ;;  %v1368_v46 = vunpack.c.h.s8.bf16 %v728_v44  ;;  %v1301_v47 = vunpack.c.l.s8.bf16 %v697_v35  ;;  %v744_v35 = vld [vmem:[%s6592_s30 + $0x460] sm:$0xff] }
 0x101   : > { %2429 = vmatprep.subr.bf16.mxu1 %v1337_v48  ;;  %v1365_v48 = vunpack.c.l.s8.bf16 %v729_v36  ;;  %v776_v36 = vld [vmem:[%s6592_s30 + $0x560] sm:$0xff] }
 0x102   : > { %2333 = vmatmul.mubr.bf16.vlgmr.msra.gmra.mxu0 %v6682_v52 }
 0x103   : > { %2376 = vmatmul.mubr.bf16.vlgmr.msra.gmra.mxu1 %v6686_v53  ;;  %2387 = vmatpush1.bf16.msra.mxu0 %v1272_v57  ;;  %v1300_v57 = vunpack.c.l.s8.bf16 %v696_v43  ;;  %v6756_v43 = vld [vmem:[%s6629_s15 + $0x28] sm:$0xff] }
 0x104   : > { %2430 = vmatpush1.bf16.msra.mxu1 %v1336_v58  ;;  %2388 = vmatprep.subr.bf16.mxu0 %v1269_v59  ;;  %v1364_v58 = vunpack.c.l.s8.bf16 %v728_v44  ;;  %v1297_v59 = vunpack.c.h.s8.bf16 %v693_v49  ;;  %v6759_v44 = vld [vmem:[%s6629_s15 + $0xa8] sm:$0xff] }
 0x105   : > { %2431 = vmatprep.subr.bf16.mxu1 %v1333_v31  ;;  %2418 = vmatprep.mubr.bf16.mxu0 %v6701_v33  ;;  %v1361_v31 = vunpack.c.h.s8.bf16 %v725_v50 }
 0x106   : > { %2461 = vmatprep.mubr.bf16.mxu1 %v6705_v34 }
 0x107   : > { %2389 = vmatpush1.bf16.msra.mxu0 %v1268_v61  ;;  %v1296_v61 = vunpack.c.h.s8.bf16 %v692_v32 }
 0x108   : > { %2432 = vmatpush1.bf16.msra.mxu1 %v1332_v62  ;;  %2390 = vmatprep.subr.bf16.mxu0 %v1265_v63  ;;  %v1360_v62 = vunpack.c.h.s8.bf16 %v724_v60  ;;  %v1293_v63 = vunpack.c.l.s8.bf16 %v693_v49  ;;  %v1396_v49 = vunpack.c.l.s8.bf16 %v744_v35 }
 0x109   : > { %2433 = vmatprep.subr.bf16.mxu1 %v1329_v0  ;;  %v1357_v0 = vunpack.c.l.s8.bf16 %v725_v50  ;;  %v1460_v50 = vunpack.c.l.s8.bf16 %v776_v36 }
 0x10b   : > { %2391 = vmatpush1.bf16.msra.mxu0 %v1264_v3  ;;  %v1292_v3 = vunpack.c.l.s8.bf16 %v692_v32 }
 0x10c   : > { %2434 = vmatpush1.bf16.msra.mxu1 %v1328_v4  ;;  %2392 = vmatprep.subr.bf16.mxu0 %v1261_v5  ;;  %v1356_v4 = vunpack.c.l.s8.bf16 %v724_v60  ;;  %v1289_v5 = vunpack.c.h.s8.bf16 %v689_v1 }
 0x10d   : > { %2435 = vmatprep.subr.bf16.mxu1 %v1325_v6  ;;  %v1353_v6 = vunpack.c.h.s8.bf16 %v721_v2 }
 0x10f   : > { %2393 = vmatpush1.bf16.msra.mxu0 %v1260_v9  ;;  %v1288_v9 = vunpack.c.h.s8.bf16 %v688_v7 }
 0x110   : > { %2436 = vmatpush1.bf16.msra.mxu1 %v1324_v10  ;;  %2394 = vmatprep.subr.bf16.mxu0 %v1257_v11  ;;  %v1352_v10 = vunpack.c.h.s8.bf16 %v720_v8  ;;  %v1285_v11 = vunpack.c.l.s8.bf16 %v689_v1 }
 0x111   : > { %2437 = vmatprep.subr.bf16.mxu1 %v1321_v12  ;;  %v1349_v12 = vunpack.c.l.s8.bf16 %v721_v2 }
 0x113   : > { %2395 = vmatpush1.bf16.msra.mxu0 %v1256_v15  ;;  %v1284_v15 = vunpack.c.l.s8.bf16 %v688_v7 }
 0x114   : > { %2438 = vmatpush1.bf16.msra.mxu1 %v1320_v16  ;;  %2396 = vmatprep.subr.bf16.mxu0 %v1253_v17  ;;  %v1348_v16 = vunpack.c.l.s8.bf16 %v720_v8  ;;  %v1281_v17 = vunpack.c.h.s8.bf16 %v685_v13 }
 0x115   : > { %2439 = vmatprep.subr.bf16.mxu1 %v1317_v18  ;;  %v1345_v18 = vunpack.c.h.s8.bf16 %v717_v14 }
 0x117   : > { %2397 = vmatpush1.bf16.msra.mxu0 %v1252_v21  ;;  %v1280_v21 = vunpack.c.h.s8.bf16 %v684_v19 }
 0x118   : > { %2440 = vmatpush1.bf16.msra.mxu1 %v1316_v22  ;;  %2398 = vmatprep.subr.bf16.mxu0 %v1249_v23  ;;  %v1344_v22 = vunpack.c.h.s8.bf16 %v716_v20  ;;  %v1277_v23 = vunpack.c.l.s8.bf16 %v685_v13 }
 0x119   : > { %2441 = vmatprep.subr.bf16.mxu1 %v1313_v24  ;;  %v1341_v24 = vunpack.c.l.s8.bf16 %v717_v14 }
 0x11b   : > { %2399 = vmatpush1.bf16.msra.mxu0 %v1248_v27  ;;  %v1276_v27 = vunpack.c.l.s8.bf16 %v684_v19 }
 0x11c   : > { %2442 = vmatpush1.bf16.msra.mxu1 %v1312_v28  ;;  %2400 = vmatprep.subr.bf16.mxu0 %v1245_v29  ;;  %v1340_v28 = vunpack.c.l.s8.bf16 %v716_v20  ;;  %v1401_v29 = vunpack.c.h.s8.bf16 %v745_v25 }
 0x11d   : > { %2443 = vmatprep.subr.bf16.mxu1 %v1309_v30  ;;  %v1465_v30 = vunpack.c.h.s8.bf16 %v777_v26 }
 0x11f   : > { %2401 = vmatpush1.bf16.msra.mxu0 %v1244_v37  ;;  %v6742_v37 = vld [vmem:[%s6629_s15 + $0x20] sm:$0xff] }
 0x120   : > { %2444 = vmatpush1.bf16.msra.mxu1 %v1308_v38  ;;  %2402 = vmatprep.subr.bf16.mxu0 %v1305_v40  ;;  %v6746_v38 = vcombine.low %v6678_v51, %v6689_v54  ;;  %v6750_v40 = vcombine.low %v6692_v55, %v6695_v56  ;;  %v1461_v51 = vunpack.c.l.s8.bf16 %v777_v26  ;;  %v741_v54 = vld [vmem:[%s6592_s30 + $0x448] sm:$0xff]  ;;  %v6769_v56 = vcombine.high %v6756_v43, %v6759_v44 }
 0x121   : > { %2445 = vmatprep.subr.bf16.mxu1 %v1369_v41  ;;  %v6753_v41 = vld [vmem:[%s6629_s15 + $0xa0] sm:$0xff] }
 0x122   : > { %v6765_v55 = vcombine.high %v6742_v37, %v6753_v41 }
 0x123   : > { %2403 = vmatpush2.bf16.msra.mxu0 %v1304_v45  ;;  %v1400_v45 = vunpack.c.h.s8.bf16 %v744_v35 }
 0x124   : > { %2446 = vmatpush2.bf16.msra.mxu1 %v1368_v46  ;;  %2404 = vmatprep.subr.bf16.mxu0 %v1301_v47  ;;  %v1464_v46 = vunpack.c.h.s8.bf16 %v776_v36  ;;  %v1397_v47 = vunpack.c.l.s8.bf16 %v745_v25 }
 0x125   : > { %2447 = vmatprep.subr.bf16.mxu1 %v1365_v48  ;;  %v773_v48 = vld [vmem:[%s6592_s30 + $0x548] sm:$0xff] }
 0x127   : > { %2405 = vmatpush2.bf16.msra.mxu0 %v1300_v57  ;;  %v1393_v57 = vunpack.c.h.s8.bf16 %v741_v54 }
 0x128   : > { %2448 = vmatpush2.bf16.msra.mxu1 %v1364_v58  ;;  %2406 = vmatprep.subr.bf16.mxu0 %v1297_v59  ;;  %v1457_v58 = vunpack.c.h.s8.bf16 %v773_v48  ;;  %v740_v59 = vld [vmem:[%s6592_s30 + $0x440] sm:$0xff] }
 0x129   : > { %2449 = vmatprep.subr.bf16.mxu1 %v1361_v31  ;;  %v772_v31 = vld [vmem:[%s6592_s30 + $0x540] sm:$0xff]  ;;  %v1392_v32 = vunpack.c.h.s8.bf16 %v740_v59  ;;  %v1388_v1 = vunpack.c.l.s8.bf16 %v740_v59 }
 0x12a   : > { %v1456_v60 = vunpack.c.h.s8.bf16 %v772_v31  ;;  %v1452_v2 = vunpack.c.l.s8.bf16 %v772_v31 }
 0x12b   : > { %2407 = vmatpush2.bf16.msra.mxu0 %v1296_v61  ;;  %v1389_v61 = vunpack.c.l.s8.bf16 %v741_v54 }
 0x12c   : > { %2450 = vmatpush2.bf16.msra.mxu1 %v1360_v62  ;;  %2408 = vmatprep.subr.bf16.mxu0 %v1293_v63  ;;  %v1453_v62 = vunpack.c.l.s8.bf16 %v773_v48  ;;  %v737_v63 = vld [vmem:[%s6592_s30 + $0x428] sm:$0xff] }
 0x12d   : > { %2451 = vmatprep.subr.bf16.mxu1 %v1357_v0  ;;  %v769_v0 = vld [vmem:[%s6592_s30 + $0x528] sm:$0xff] }
 0x12f   : > { %2409 = vmatpush2.bf16.msra.mxu0 %v1292_v3  ;;  %v1385_v3 = vunpack.c.h.s8.bf16 %v737_v63 }
 0x130   : > { %2452 = vmatpush2.bf16.msra.mxu1 %v1356_v4  ;;  %2410 = vmatprep.subr.bf16.mxu0 %v1289_v5  ;;  %v1449_v4 = vunpack.c.h.s8.bf16 %v769_v0  ;;  %v736_v5 = vld [vmem:[%s6592_s30 + $0x420] sm:$0xff] }
 0x131   : > { %2453 = vmatprep.subr.bf16.mxu1 %v1353_v6  ;;  %v768_v6 = vld [vmem:[%s6592_s30 + $0x520] sm:$0xff]  ;;  %v1384_v7 = vunpack.c.h.s8.bf16 %v736_v5  ;;  %v1380_v13 = vunpack.c.l.s8.bf16 %v736_v5 }
 0x132   : > { %v1448_v8 = vunpack.c.h.s8.bf16 %v768_v6  ;;  %v1444_v14 = vunpack.c.l.s8.bf16 %v768_v6 }
 0x133   : > { %2411 = vmatpush2.bf16.msra.mxu0 %v1288_v9  ;;  %v1381_v9 = vunpack.c.l.s8.bf16 %v737_v63 }
 0x134   : > { %2454 = vmatpush2.bf16.msra.mxu1 %v1352_v10  ;;  %2412 = vmatprep.subr.bf16.mxu0 %v1285_v11  ;;  %v1445_v10 = vunpack.c.l.s8.bf16 %v769_v0  ;;  %v733_v11 = vld [vmem:[%s6592_s30 + $0x408] sm:$0xff] }
 0x135   : > { %2455 = vmatprep.subr.bf16.mxu1 %v1349_v12  ;;  %v765_v12 = vld [vmem:[%s6592_s30 + $0x508] sm:$0xff] }
 0x137   : > { %2413 = vmatpush2.bf16.msra.mxu0 %v1284_v15  ;;  %v1377_v15 = vunpack.c.h.s8.bf16 %v733_v11 }
 0x138   : > { %2456 = vmatpush2.bf16.msra.mxu1 %v1348_v16  ;;  %2414 = vmatprep.subr.bf16.mxu0 %v1281_v17  ;;  %v1441_v16 = vunpack.c.h.s8.bf16 %v765_v12  ;;  %v732_v17 = vld [vmem:[%s6592_s30 + $0x400] sm:$0xff] }
 0x139   : > { %2457 = vmatprep.subr.bf16.mxu1 %v1345_v18  ;;  %v764_v18 = vld [vmem:[%s6592_s30 + $0x500] sm:$0xff]  ;;  %v1376_v19 = vunpack.c.h.s8.bf16 %v732_v17  ;;  %v1372_v25 = vunpack.c.l.s8.bf16 %v732_v17 }
 0x13a   : > { %v1440_v20 = vunpack.c.h.s8.bf16 %v764_v18  ;;  %v1436_v26 = vunpack.c.l.s8.bf16 %v764_v18 }
 0x13b   : > { %2415 = vmatpush2.bf16.msra.mxu0 %v1280_v21  ;;  %v1373_v21 = vunpack.c.l.s8.bf16 %v733_v11 }
 0x13c   : > { %2458 = vmatpush2.bf16.msra.mxu1 %v1344_v22  ;;  %2416 = vmatprep.subr.bf16.mxu0 %v1277_v23  ;;  %v1437_v22 = vunpack.c.l.s8.bf16 %v765_v12  ;;  %v761_v23 = vld [vmem:[%s6592_s30 + $0x4e8] sm:$0xff] }
 0x13d   : > { %2459 = vmatprep.subr.bf16.mxu1 %v1341_v24  ;;  %v793_v24 = vld [vmem:[%s6592_s30 + $0x5e8] sm:$0xff] }
 0x13f   : > { %2417 = vmatpush2.bf16.msra.mxu0 %v1276_v27  ;;  %v1433_v27 = vunpack.c.h.s8.bf16 %v761_v23 }
 0x140   : > { %2460 = vmatpush2.bf16.msra.mxu1 %v1340_v28  ;;  %2472 = vmatprep.subr.bf16.mxu0 %v1401_v29  ;;  %v1497_v28 = vunpack.c.h.s8.bf16 %v793_v24  ;;  %v760_v29 = vld [vmem:[%s6592_s30 + $0x4e0] sm:$0xff] }
 0x141   : > { %2515 = vmatprep.subr.bf16.mxu1 %v1465_v30  ;;  %v792_v30 = vld [vmem:[%s6592_s30 + $0x5e0] sm:$0xff]  ;;  %v1432_v35 = vunpack.c.h.s8.bf16 %v760_v29  ;;  %v1428_v54 = vunpack.c.l.s8.bf16 %v760_v29  ;;  %v6806_v29 = vld [vmem:[%s6629_s15 + $0x30] sm:$0xff] }
 0x142   : > { %2419 = vmatmul.mubr.bf16.vlgmr.msra.gmra.mxu0 %v6746_v38  ;;  %v1496_v36 = vunpack.c.h.s8.bf16 %v792_v30  ;;  %v1492_v48 = vunpack.c.l.s8.bf16 %v792_v30  ;;  %v6810_v30 = vcombine.low %v6742_v37, %v6753_v41  ;;  %v805_v41 = vld [vmem:[%s6592_s30 + $0x648] sm:$0xff] }
 0x143   : > { %2462 = vmatmul.mubr.bf16.vlgmr.msra.gmra.mxu1 %v6750_v40  ;;  %2473 = vmatpush1.bf16.msra.mxu0 %v1400_v45  ;;  %v1429_v45 = vunpack.c.l.s8.bf16 %v761_v23 }
 0x144   : > { %2516 = vmatpush1.bf16.msra.mxu1 %v1464_v46  ;;  %2474 = vmatprep.subr.bf16.mxu0 %v1397_v47  ;;  %v1493_v46 = vunpack.c.l.s8.bf16 %v793_v24  ;;  %v757_v47 = vld [vmem:[%s6592_s30 + $0x4c8] sm:$0xff] }
 0x145   : > { %2517 = vmatprep.subr.bf16.mxu1 %v1461_v51  ;;  %2504 = vmatprep.mubr.bf16.mxu0 %v6765_v55  ;;  %v789_v51 = vld [vmem:[%s6592_s30 + $0x5c8] sm:$0xff] }
 0x146   : > { %2547 = vmatprep.mubr.bf16.mxu1 %v6769_v56 }
 0x147   : > { %2475 = vmatpush1.bf16.msra.mxu0 %v1396_v49  ;;  %v1425_v49 = vunpack.c.h.s8.bf16 %v757_v47 }
 0x148   : > { %2518 = vmatpush1.bf16.msra.mxu1 %v1460_v50  ;;  %2476 = vmatprep.subr.bf16.mxu0 %v1393_v57  ;;  %v1489_v50 = vunpack.c.h.s8.bf16 %v789_v51  ;;  %v756_v57 = vld [vmem:[%s6592_s30 + $0x4c0] sm:$0xff] }
 0x149   : > { %2519 = vmatprep.subr.bf16.mxu1 %v1457_v58  ;;  %v788_v58 = vld [vmem:[%s6592_s30 + $0x5c0] sm:$0xff]  ;;  %v1424_v59 = vunpack.c.h.s8.bf16 %v756_v57  ;;  %v1420_v63 = vunpack.c.l.s8.bf16 %v756_v57  ;;  %v1521_v57 = vunpack.c.h.s8.bf16 %v805_v41 }
 0x14a   : > { %v1488_v31 = vunpack.c.h.s8.bf16 %v788_v58  ;;  %v1484_v0 = vunpack.c.l.s8.bf16 %v788_v58 }
 0x14b   : > { %2477 = vmatpush1.bf16.msra.mxu0 %v1392_v32  ;;  %v1421_v32 = vunpack.c.l.s8.bf16 %v757_v47 }
 0x14c   : > { %2520 = vmatpush1.bf16.msra.mxu1 %v1456_v60  ;;  %2478 = vmatprep.subr.bf16.mxu0 %v1389_v61  ;;  %v1485_v60 = vunpack.c.l.s8.bf16 %v789_v51  ;;  %v753_v61 = vld [vmem:[%s6592_s30 + $0x4a8] sm:$0xff] }
 0x14d   : > { %2521 = vmatprep.subr.bf16.mxu1 %v1453_v62  ;;  %v785_v62 = vld [vmem:[%s6592_s30 + $0x5a8] sm:$0xff] }
 0x14f   : > { %2479 = vmatpush1.bf16.msra.mxu0 %v1388_v1  ;;  %v1417_v1 = vunpack.c.h.s8.bf16 %v753_v61 }
 0x150   : > { %2522 = vmatpush1.bf16.msra.mxu1 %v1452_v2  ;;  %2480 = vmatprep.subr.bf16.mxu0 %v1385_v3  ;;  %v1481_v2 = vunpack.c.h.s8.bf16 %v785_v62  ;;  %v752_v3 = vld [vmem:[%s6592_s30 + $0x4a0] sm:$0xff] }
 0x151   : > { %2523 = vmatprep.subr.bf16.mxu1 %v1449_v4  ;;  %v784_v4 = vld [vmem:[%s6592_s30 + $0x5a0] sm:$0xff]  ;;  %v1416_v5 = vunpack.c.h.s8.bf16 %v752_v3  ;;  %v1412_v11 = vunpack.c.l.s8.bf16 %v752_v3 }
 0x152   : > { %v1480_v6 = vunpack.c.h.s8.bf16 %v784_v4  ;;  %v1476_v12 = vunpack.c.l.s8.bf16 %v784_v4 }
 0x153   : > { %2481 = vmatpush1.bf16.msra.mxu0 %v1384_v7  ;;  %v1413_v7 = vunpack.c.l.s8.bf16 %v753_v61  ;;  %v1517_v61 = vunpack.c.l.s8.bf16 %v805_v41 }
 0x154   : > { %2524 = vmatpush1.bf16.msra.mxu1 %v1448_v8  ;;  %2482 = vmatprep.subr.bf16.mxu0 %v1381_v9  ;;  %v1477_v8 = vunpack.c.l.s8.bf16 %v785_v62  ;;  %v749_v9 = vld [vmem:[%s6592_s30 + $0x488] sm:$0xff] }
 0x155   : > { %2525 = vmatprep.subr.bf16.mxu1 %v1445_v10  ;;  %v781_v10 = vld [vmem:[%s6592_s30 + $0x588] sm:$0xff] }
 0x157   : > { %2483 = vmatpush1.bf16.msra.mxu0 %v1380_v13  ;;  %v1409_v13 = vunpack.c.h.s8.bf16 %v749_v9 }
 0x158   : > { %2526 = vmatpush1.bf16.msra.mxu1 %v1444_v14  ;;  %2484 = vmatprep.subr.bf16.mxu0 %v1377_v15  ;;  %v1473_v14 = vunpack.c.h.s8.bf16 %v781_v10  ;;  %v748_v15 = vld [vmem:[%s6592_s30 + $0x480] sm:$0xff] }
 0x159   : > { %2527 = vmatprep.subr.bf16.mxu1 %v1441_v16  ;;  %v780_v16 = vld [vmem:[%s6592_s30 + $0x580] sm:$0xff]  ;;  %v1408_v17 = vunpack.c.h.s8.bf16 %v748_v15  ;;  %v1404_v23 = vunpack.c.l.s8.bf16 %v748_v15 }
 0x15a   : > { %v1472_v18 = vunpack.c.h.s8.bf16 %v780_v16  ;;  %v1468_v24 = vunpack.c.l.s8.bf16 %v780_v16 }
 0x15b   : > { %2485 = vmatpush1.bf16.msra.mxu0 %v1376_v19  ;;  %v1405_v19 = vunpack.c.l.s8.bf16 %v749_v9 }
 0x15c   : > { %2528 = vmatpush1.bf16.msra.mxu1 %v1440_v20  ;;  %2486 = vmatprep.subr.bf16.mxu0 %v1373_v21  ;;  %v1469_v20 = vunpack.c.l.s8.bf16 %v781_v10  ;;  %v809_v21 = vld [vmem:[%s6592_s30 + $0x668] sm:$0xff] }
 0x15d   : > { %2529 = vmatprep.subr.bf16.mxu1 %v1437_v22  ;;  %v841_v22 = vld [vmem:[%s6592_s30 + $0x768] sm:$0xff] }
 0x15e   : > { %v1589_v37 = vunpack.c.l.s8.bf16 %v841_v22 }
 0x15f   : > { %2487 = vmatpush1.bf16.msra.mxu0 %v1372_v25  ;;  %v1529_v25 = vunpack.c.h.s8.bf16 %v809_v21 }
 0x160   : > { %2530 = vmatpush1.bf16.msra.mxu1 %v1436_v26  ;;  %2488 = vmatprep.subr.bf16.mxu0 %v1433_v27  ;;  %v1593_v26 = vunpack.c.h.s8.bf16 %v841_v22  ;;  %v808_v27 = vld [vmem:[%s6592_s30 + $0x660] sm:$0xff] }
 0x161   : > { %2531 = vmatprep.subr.bf16.mxu1 %v1497_v28  ;;  %v840_v28 = vld [vmem:[%s6592_s30 + $0x760] sm:$0xff]  ;;  %v1528_v47 = vunpack.c.h.s8.bf16 %v808_v27 }
 0x162   : > { %v1592_v51 = vunpack.c.h.s8.bf16 %v840_v28 }
 0x163   : > { %2489 = vmatpush2.bf16.msra.mxu0 %v1432_v35  ;;  %v6814_v35 = vcombine.low %v6756_v43, %v6759_v44 }
 0x164   : > { %2532 = vmatpush2.bf16.msra.mxu1 %v1496_v36  ;;  %2490 = vmatprep.subr.bf16.mxu0 %v1429_v45  ;;  %v6817_v36 = vld [vmem:[%s6629_s15 + $0xb0] sm:$0xff]  ;;  %v6820_v45 = vld [vmem:[%s6629_s15 + $0x38] sm:$0xff] }
 0x165   : > { %2533 = vmatprep.subr.bf16.mxu1 %v1493_v46  ;;  %v6823_v46 = vld [vmem:[%s6629_s15 + $0xb8] sm:$0xff]  ;;  %v6829_v43 = vcombine.high %v6806_v29, %v6817_v36 }
 0x166   : > { %v6833_v44 = vcombine.high %v6820_v45, %v6823_v46 }
 0x167   : > { %2491 = vmatpush2.bf16.msra.mxu0 %v1428_v54  ;;  %v1525_v54 = vunpack.c.l.s8.bf16 %v809_v21 }
 0x168   : > { %2534 = vmatpush2.bf16.msra.mxu1 %v1492_v48  ;;  %2492 = vmatprep.subr.bf16.mxu0 %v1425_v49  ;;  %v837_v48 = vld [vmem:[%s6592_s30 + $0x748] sm:$0xff]  ;;  %v1524_v49 = vunpack.c.l.s8.bf16 %v808_v27 }
 0x169   : > { %2535 = vmatprep.subr.bf16.mxu1 %v1489_v50  ;;  %v1588_v50 = vunpack.c.l.s8.bf16 %v840_v28  ;;  %v1585_v58 = vunpack.c.h.s8.bf16 %v837_v48  ;;  %v1581_v62 = vunpack.c.l.s8.bf16 %v837_v48 }
 0x16b   : > { %2493 = vmatpush2.bf16.msra.mxu0 %v1424_v59  ;;  %v804_v59 = vld [vmem:[%s6592_s30 + $0x640] sm:$0xff] }
 0x16c   : > { %2536 = vmatpush2.bf16.msra.mxu1 %v1488_v31  ;;  %2494 = vmatprep.subr.bf16.mxu0 %v1421_v32  ;;  %v836_v31 = vld [vmem:[%s6592_s30 + $0x740] sm:$0xff]  ;;  %v1520_v32 = vunpack.c.h.s8.bf16 %v804_v59 }
 0x16d   : > { %2537 = vmatprep.subr.bf16.mxu1 %v1485_v60  ;;  %v1584_v60 = vunpack.c.h.s8.bf16 %v836_v31 }
 0x16f   : > { %2495 = vmatpush2.bf16.msra.mxu0 %v1420_v63  ;;  %v801_v63 = vld [vmem:[%s6592_s30 + $0x628] sm:$0xff] }
 0x170   : > { %2538 = vmatpush2.bf16.msra.mxu1 %v1484_v0  ;;  %2496 = vmatprep.subr.bf16.mxu0 %v1417_v1  ;;  %v833_v0 = vld [vmem:[%s6592_s30 + $0x728] sm:$0xff]  ;;  %v1516_v1 = vunpack.c.l.s8.bf16 %v804_v59  ;;  %v1513_v3 = vunpack.c.h.s8.bf16 %v801_v63  ;;  %v1509_v9 = vunpack.c.l.s8.bf16 %v801_v63 }
 0x171   : > { %2539 = vmatprep.subr.bf16.mxu1 %v1481_v2  ;;  %v1580_v2 = vunpack.c.l.s8.bf16 %v836_v31  ;;  %v1577_v4 = vunpack.c.h.s8.bf16 %v833_v0  ;;  %v1573_v10 = vunpack.c.l.s8.bf16 %v833_v0 }
 0x173   : > { %2497 = vmatpush2.bf16.msra.mxu0 %v1416_v5  ;;  %v800_v5 = vld [vmem:[%s6592_s30 + $0x620] sm:$0xff] }
 0x174   : > { %2540 = vmatpush2.bf16.msra.mxu1 %v1480_v6  ;;  %2498 = vmatprep.subr.bf16.mxu0 %v1413_v7  ;;  %v832_v6 = vld [vmem:[%s6592_s30 + $0x720] sm:$0xff]  ;;  %v1512_v7 = vunpack.c.h.s8.bf16 %v800_v5 }
 0x175   : > { %2541 = vmatprep.subr.bf16.mxu1 %v1477_v8  ;;  %v1576_v8 = vunpack.c.h.s8.bf16 %v832_v6 }
 0x177   : > { %2499 = vmatpush2.bf16.msra.mxu0 %v1412_v11  ;;  %v797_v11 = vld [vmem:[%s6592_s30 + $0x608] sm:$0xff] }
 0x178   : > { %2542 = vmatpush2.bf16.msra.mxu1 %v1476_v12  ;;  %2500 = vmatprep.subr.bf16.mxu0 %v1409_v13  ;;  %v829_v12 = vld [vmem:[%s6592_s30 + $0x708] sm:$0xff]  ;;  %v1508_v13 = vunpack.c.l.s8.bf16 %v800_v5  ;;  %v1505_v15 = vunpack.c.h.s8.bf16 %v797_v11  ;;  %v1501_v21 = vunpack.c.l.s8.bf16 %v797_v11 }
 0x179   : > { %2543 = vmatprep.subr.bf16.mxu1 %v1473_v14  ;;  %v1572_v14 = vunpack.c.l.s8.bf16 %v832_v6  ;;  %v1569_v16 = vunpack.c.h.s8.bf16 %v829_v12  ;;  %v1565_v22 = vunpack.c.l.s8.bf16 %v829_v12 }
 0x17b   : > { %2501 = vmatpush2.bf16.msra.mxu0 %v1408_v17  ;;  %v796_v17 = vld [vmem:[%s6592_s30 + $0x600] sm:$0xff] }
 0x17c   : > { %2544 = vmatpush2.bf16.msra.mxu1 %v1472_v18  ;;  %2502 = vmatprep.subr.bf16.mxu0 %v1405_v19  ;;  %v828_v18 = vld [vmem:[%s6592_s30 + $0x700] sm:$0xff]  ;;  %v1504_v19 = vunpack.c.h.s8.bf16 %v796_v17 }
 0x17d   : > { %2545 = vmatprep.subr.bf16.mxu1 %v1469_v20  ;;  %v1568_v20 = vunpack.c.h.s8.bf16 %v828_v18 }
 0x17f   : > { %2503 = vmatpush2.bf16.msra.mxu0 %v1404_v23  ;;  %v825_v23 = vld [vmem:[%s6592_s30 + $0x6e8] sm:$0xff] }
 0x180   : > { %2546 = vmatpush2.bf16.msra.mxu1 %v1468_v24  ;;  %2558 = vmatprep.subr.bf16.mxu0 %v1529_v25  ;;  %v857_v24 = vld [vmem:[%s6592_s30 + $0x7e8] sm:$0xff]  ;;  %v1500_v25 = vunpack.c.l.s8.bf16 %v796_v17  ;;  %v1561_v27 = vunpack.c.h.s8.bf16 %v825_v23  ;;  %v1557_v41 = vunpack.c.l.s8.bf16 %v825_v23 }
 0x181   : > { %2601 = vmatprep.subr.bf16.mxu1 %v1593_v26  ;;  %v1564_v26 = vunpack.c.l.s8.bf16 %v828_v18  ;;  %v1625_v28 = vunpack.c.h.s8.bf16 %v857_v24  ;;  %v1621_v48 = vunpack.c.l.s8.bf16 %v857_v24 }
 0x182   : > { %2505 = vmatmul.mubr.bf16.vlgmr.msra.gmra.mxu0 %v6810_v30 }
 0x183   : > { %2548 = vmatmul.mubr.bf16.vlgmr.msra.gmra.mxu1 %v6814_v35  ;;  %2559 = vmatpush1.bf16.msra.mxu0 %v1528_v47  ;;  %v824_v47 = vld [vmem:[%s6592_s30 + $0x6e0] sm:$0xff] }
 0x184   : > { %2602 = vmatpush1.bf16.msra.mxu1 %v1592_v51  ;;  %2560 = vmatprep.subr.bf16.mxu0 %v1525_v54  ;;  %v856_v51 = vld [vmem:[%s6592_s30 + $0x7e0] sm:$0xff]  ;;  %v1560_v54 = vunpack.c.h.s8.bf16 %v824_v47 }
 0x185   : > { %2603 = vmatprep.subr.bf16.mxu1 %v1589_v37  ;;  %2590 = vmatprep.mubr.bf16.mxu0 %v6829_v43  ;;  %v1624_v37 = vunpack.c.h.s8.bf16 %v856_v51 }
 0x186   : > { %2633 = vmatprep.mubr.bf16.mxu1 %v6833_v44 }
 0x187   : > { %2561 = vmatpush1.bf16.msra.mxu0 %v1524_v49  ;;  %v821_v49 = vld [vmem:[%s6592_s30 + $0x6c8] sm:$0xff] }
 0x188   : > { %2604 = vmatpush1.bf16.msra.mxu1 %v1588_v50  ;;  %2562 = vmatprep.subr.bf16.mxu0 %v1521_v57  ;;  %v853_v50 = vld [vmem:[%s6592_s30 + $0x7c8] sm:$0xff]  ;;  %v1556_v57 = vunpack.c.l.s8.bf16 %v824_v47  ;;  %v1553_v59 = vunpack.c.h.s8.bf16 %v821_v49  ;;  %v1549_v63 = vunpack.c.l.s8.bf16 %v821_v49  ;;  %v6878_v49 = vcombine.low %v6820_v45, %v6823_v46 }
 0x189   : > { %2605 = vmatprep.subr.bf16.mxu1 %v1585_v58  ;;  %v1620_v58 = vunpack.c.l.s8.bf16 %v856_v51  ;;  %v1617_v31 = vunpack.c.h.s8.bf16 %v853_v50  ;;  %v1613_v0 = vunpack.c.l.s8.bf16 %v853_v50  ;;  %v6881_v50 = vld [vmem:[%s6629_s15 + $0xc0] sm:$0xff] }
 0x18b   : > { %2563 = vmatpush1.bf16.msra.mxu0 %v1520_v32  ;;  %v820_v32 = vld [vmem:[%s6592_s30 + $0x6c0] sm:$0xff] }
 0x18c   : > { %2606 = vmatpush1.bf16.msra.mxu1 %v1584_v60  ;;  %2564 = vmatprep.subr.bf16.mxu0 %v1517_v61  ;;  %v852_v60 = vld [vmem:[%s6592_s30 + $0x7c0] sm:$0xff]  ;;  %v1552_v61 = vunpack.c.h.s8.bf16 %v820_v32 }
 0x18d   : > { %2607 = vmatprep.subr.bf16.mxu1 %v1581_v62  ;;  %v1616_v62 = vunpack.c.h.s8.bf16 %v852_v60 }
 0x18f   : > { %2565 = vmatpush1.bf16.msra.mxu0 %v1516_v1  ;;  %v817_v1 = vld [vmem:[%s6592_s30 + $0x6a8] sm:$0xff] }
 0x190   : > { %2608 = vmatpush1.bf16.msra.mxu1 %v1580_v2  ;;  %2566 = vmatprep.subr.bf16.mxu0 %v1513_v3  ;;  %v849_v2 = vld [vmem:[%s6592_s30 + $0x7a8] sm:$0xff]  ;;  %v1548_v3 = vunpack.c.l.s8.bf16 %v820_v32  ;;  %v1545_v5 = vunpack.c.h.s8.bf16 %v817_v1  ;;  %v1541_v11 = vunpack.c.l.s8.bf16 %v817_v1  ;;  %v868_v1 = vld [vmem:[%s6592_s30 + $0x840] sm:$0xff] }
 0x191   : > { %2609 = vmatprep.subr.bf16.mxu1 %v1577_v4  ;;  %v1612_v4 = vunpack.c.l.s8.bf16 %v852_v60  ;;  %v1609_v6 = vunpack.c.h.s8.bf16 %v849_v2  ;;  %v1605_v12 = vunpack.c.l.s8.bf16 %v849_v2  ;;  %v901_v60 = vld [vmem:[%s6592_s30 + $0x948] sm:$0xff]  ;;  %v900_v2 = vld [vmem:[%s6592_s30 + $0x940] sm:$0xff] }
 0x193   : > { %2567 = vmatpush1.bf16.msra.mxu0 %v1512_v7  ;;  %v816_v7 = vld [vmem:[%s6592_s30 + $0x6a0] sm:$0xff] }
 0x194   : > { %2610 = vmatpush1.bf16.msra.mxu1 %v1576_v8  ;;  %2568 = vmatprep.subr.bf16.mxu0 %v1509_v9  ;;  %v848_v8 = vld [vmem:[%s6592_s30 + $0x7a0] sm:$0xff]  ;;  %v1544_v9 = vunpack.c.h.s8.bf16 %v816_v7 }
 0x195   : > { %2611 = vmatprep.subr.bf16.mxu1 %v1573_v10  ;;  %v1608_v10 = vunpack.c.h.s8.bf16 %v848_v8 }
 0x197   : > { %2569 = vmatpush1.bf16.msra.mxu0 %v1508_v13  ;;  %v813_v13 = vld [vmem:[%s6592_s30 + $0x688] sm:$0xff] }
 0x198   : > { %2612 = vmatpush1.bf16.msra.mxu1 %v1572_v14  ;;  %2570 = vmatprep.subr.bf16.mxu0 %v1505_v15  ;;  %v845_v14 = vld [vmem:[%s6592_s30 + $0x788] sm:$0xff]  ;;  %v1540_v15 = vunpack.c.l.s8.bf16 %v816_v7  ;;  %v1537_v17 = vunpack.c.h.s8.bf16 %v813_v13  ;;  %v1533_v23 = vunpack.c.l.s8.bf16 %v813_v13  ;;  %v864_v13 = vld [vmem:[%s6592_s30 + $0x820] sm:$0xff] }
 0x199   : > { %2613 = vmatprep.subr.bf16.mxu1 %v1569_v16  ;;  %v1604_v16 = vunpack.c.l.s8.bf16 %v848_v8  ;;  %v1601_v18 = vunpack.c.h.s8.bf16 %v845_v14  ;;  %v1597_v24 = vunpack.c.l.s8.bf16 %v845_v14  ;;  %v865_v7 = vld [vmem:[%s6592_s30 + $0x828] sm:$0xff]  ;;  %v896_v14 = vld [vmem:[%s6592_s30 + $0x920] sm:$0xff] }
 0x19a   : > { %v897_v8 = vld [vmem:[%s6592_s30 + $0x928] sm:$0xff] }
 0x19b   : > { %2571 = vmatpush1.bf16.msra.mxu0 %v1504_v19  ;;  %v812_v19 = vld [vmem:[%s6592_s30 + $0x680] sm:$0xff] }
 0x19c   : > { %2614 = vmatpush1.bf16.msra.mxu1 %v1568_v20  ;;  %2572 = vmatprep.subr.bf16.mxu0 %v1501_v21  ;;  %v844_v20 = vld [vmem:[%s6592_s30 + $0x780] sm:$0xff]  ;;  %v1536_v21 = vunpack.c.h.s8.bf16 %v812_v19 }
 0x19d   : > { %2615 = vmatprep.subr.bf16.mxu1 %v1565_v22  ;;  %v1600_v22 = vunpack.c.h.s8.bf16 %v844_v20 }
 0x19f   : > { %2573 = vmatpush1.bf16.msra.mxu0 %v1500_v25  ;;  %v873_v25 = vld [vmem:[%s6592_s30 + $0x868] sm:$0xff] }
 0x1a0   : > { %2616 = vmatpush1.bf16.msra.mxu1 %v1564_v26  ;;  %2574 = vmatprep.subr.bf16.mxu0 %v1561_v27  ;;  %v905_v26 = vld [vmem:[%s6592_s30 + $0x968] sm:$0xff]  ;;  %v1532_v27 = vunpack.c.l.s8.bf16 %v812_v19  ;;  %v1657_v47 = vunpack.c.h.s8.bf16 %v873_v25  ;;  %v1653_v32 = vunpack.c.l.s8.bf16 %v873_v25  ;;  %v860_v25 = vld [vmem:[%s6592_s30 + $0x800] sm:$0xff] }
 0x1a1   : > { %2617 = vmatprep.subr.bf16.mxu1 %v1625_v28  ;;  %v1596_v28 = vunpack.c.l.s8.bf16 %v844_v20  ;;  %v1721_v51 = vunpack.c.h.s8.bf16 %v905_v26  ;;  %v861_v19 = vld [vmem:[%s6592_s30 + $0x808] sm:$0xff] }
 0x1a2   : > { %v893_v20 = vld [vmem:[%s6592_s30 + $0x908] sm:$0xff] }
 0x1a3   : > { %2575 = vmatpush2.bf16.msra.mxu0 %v1560_v54  ;;  %v872_v54 = vld [vmem:[%s6592_s30 + $0x860] sm:$0xff] }
 0x1a4   : > { %2618 = vmatpush2.bf16.msra.mxu1 %v1624_v37  ;;  %2576 = vmatprep.subr.bf16.mxu0 %v1557_v41  ;;  %v904_v37 = vld [vmem:[%s6592_s30 + $0x960] sm:$0xff] }
 0x1a5   : > { %2619 = vmatprep.subr.bf16.mxu1 %v1621_v48  ;;  %v6870_v41 = vld [vmem:[%s6629_s15 + $0x40] sm:$0xff]  ;;  %v6874_v48 = vcombine.low %v6806_v29, %v6817_v36  ;;  %v1717_v29 = vunpack.c.l.s8.bf16 %v905_v26  ;;  %v869_v36 = vld [vmem:[%s6592_s30 + $0x848] sm:$0xff] }
 0x1a6   : > { %v6893_v45 = vcombine.high %v6870_v41, %v6881_v50  ;;  %v892_v26 = vld [vmem:[%s6592_s30 + $0x900] sm:$0xff] }
 0x1a7   : > { %2577 = vmatpush2.bf16.msra.mxu0 %v1556_v57  ;;  %v6884_v57 = vld [vmem:[%s6629_s15 + $0x48] sm:$0xff] }
 0x1a8   : > { %2620 = vmatpush2.bf16.msra.mxu1 %v1620_v58  ;;  %2578 = vmatprep.subr.bf16.mxu0 %v1553_v59  ;;  %v6887_v58 = vld [vmem:[%s6629_s15 + $0xc8] sm:$0xff]  ;;  %v1656_v59 = vunpack.c.h.s8.bf16 %v872_v54 }
 0x1a9   : > { %2621 = vmatprep.subr.bf16.mxu1 %v1617_v31  ;;  %v1720_v31 = vunpack.c.h.s8.bf16 %v904_v37  ;;  %v6897_v46 = vcombine.high %v6884_v57, %v6887_v58 }
 0x1ab   : > { %2579 = vmatpush2.bf16.msra.mxu0 %v1552_v61  ;;  %v1652_v61 = vunpack.c.l.s8.bf16 %v872_v54  ;;  %v889_v54 = vld [vmem:[%s6592_s30 + $0x8e8] sm:$0xff] }
 0x1ac   : > { %2622 = vmatpush2.bf16.msra.mxu1 %v1616_v62  ;;  %2580 = vmatprep.subr.bf16.mxu0 %v1549_v63  ;;  %v1716_v62 = vunpack.c.l.s8.bf16 %v904_v37  ;;  %v1649_v63 = vunpack.c.h.s8.bf16 %v869_v36  ;;  %v921_v37 = vld [vmem:[%s6592_s30 + $0x9e8] sm:$0xff] }
 0x1ad   : > { %2623 = vmatprep.subr.bf16.mxu1 %v1613_v0  ;;  %v1713_v0 = vunpack.c.h.s8.bf16 %v901_v60 }
 0x1af   : > { %2581 = vmatpush2.bf16.msra.mxu0 %v1548_v3  ;;  %v1648_v3 = vunpack.c.h.s8.bf16 %v868_v1 }
 0x1b0   : > { %2624 = vmatpush2.bf16.msra.mxu1 %v1612_v4  ;;  %2582 = vmatprep.subr.bf16.mxu0 %v1545_v5  ;;  %v1712_v4 = vunpack.c.h.s8.bf16 %v900_v2  ;;  %v1645_v5 = vunpack.c.l.s8.bf16 %v869_v36  ;;  %v888_v36 = vld [vmem:[%s6592_s30 + $0x8e0] sm:$0xff] }
 0x1b1   : > { %2625 = vmatprep.subr.bf16.mxu1 %v1609_v6  ;;  %v1709_v6 = vunpack.c.l.s8.bf16 %v901_v60  ;;  %v920_v60 = vld [vmem:[%s6592_s30 + $0x9e0] sm:$0xff] }
 0x1b3   : > { %2583 = vmatpush2.bf16.msra.mxu0 %v1544_v9  ;;  %v1644_v9 = vunpack.c.l.s8.bf16 %v868_v1  ;;  %v885_v1 = vld [vmem:[%s6592_s30 + $0x8c8] sm:$0xff] }
 0x1b4   : > { %2626 = vmatpush2.bf16.msra.mxu1 %v1608_v10  ;;  %2584 = vmatprep.subr.bf16.mxu0 %v1541_v11  ;;  %v1708_v10 = vunpack.c.l.s8.bf16 %v900_v2  ;;  %v1641_v11 = vunpack.c.h.s8.bf16 %v865_v7  ;;  %v917_v2 = vld [vmem:[%s6592_s30 + $0x9c8] sm:$0xff] }
 0x1b5   : > { %2627 = vmatprep.subr.bf16.mxu1 %v1605_v12  ;;  %v1705_v12 = vunpack.c.h.s8.bf16 %v897_v8 }
 0x1b7   : > { %2585 = vmatpush2.bf16.msra.mxu0 %v1540_v15  ;;  %v1640_v15 = vunpack.c.h.s8.bf16 %v864_v13 }
 0x1b8   : > { %2628 = vmatpush2.bf16.msra.mxu1 %v1604_v16  ;;  %2586 = vmatprep.subr.bf16.mxu0 %v1537_v17  ;;  %v1704_v16 = vunpack.c.h.s8.bf16 %v896_v14  ;;  %v1637_v17 = vunpack.c.l.s8.bf16 %v865_v7  ;;  %v884_v7 = vld [vmem:[%s6592_s30 + $0x8c0] sm:$0xff] }
 0x1b9   : > { %2629 = vmatprep.subr.bf16.mxu1 %v1601_v18  ;;  %v1701_v18 = vunpack.c.l.s8.bf16 %v897_v8  ;;  %v916_v8 = vld [vmem:[%s6592_s30 + $0x9c0] sm:$0xff] }
 0x1bb   : > { %2587 = vmatpush2.bf16.msra.mxu0 %v1536_v21  ;;  %v1636_v21 = vunpack.c.l.s8.bf16 %v864_v13  ;;  %v881_v13 = vld [vmem:[%s6592_s30 + $0x8a8] sm:$0xff] }
 0x1bc   : > { %2630 = vmatpush2.bf16.msra.mxu1 %v1600_v22  ;;  %2588 = vmatprep.subr.bf16.mxu0 %v1533_v23  ;;  %v1700_v22 = vunpack.c.l.s8.bf16 %v896_v14  ;;  %v1633_v23 = vunpack.c.h.s8.bf16 %v861_v19  ;;  %v913_v14 = vld [vmem:[%s6592_s30 + $0x9a8] sm:$0xff] }
 0x1bd   : > { %2631 = vmatprep.subr.bf16.mxu1 %v1597_v24  ;;  %v1697_v24 = vunpack.c.h.s8.bf16 %v893_v20 }
 0x1bf   : > { %2589 = vmatpush2.bf16.msra.mxu0 %v1532_v27  ;;  %v1632_v27 = vunpack.c.h.s8.bf16 %v860_v25 }
 0x1c0   : > { %2632 = vmatpush2.bf16.msra.mxu1 %v1596_v28  ;;  %2644 = vmatprep.subr.bf16.mxu0 %v1657_v47  ;;  %v1696_v28 = vunpack.c.h.s8.bf16 %v892_v26  ;;  %v1629_v47 = vunpack.c.l.s8.bf16 %v861_v19  ;;  %v880_v19 = vld [vmem:[%s6592_s30 + $0x8a0] sm:$0xff] }
 0x1c1   : > { %2687 = vmatprep.subr.bf16.mxu1 %v1721_v51  ;;  %v1693_v51 = vunpack.c.l.s8.bf16 %v893_v20  ;;  %v912_v20 = vld [vmem:[%s6592_s30 + $0x9a0] sm:$0xff] }
 0x1c2   : > { %2591 = vmatmul.mubr.bf16.vlgmr.msra.gmra.mxu0 %v6874_v48 }
 0x1c3   : > { %2634 = vmatmul.mubr.bf16.vlgmr.msra.gmra.mxu1 %v6878_v49  ;;  %2645 = vmatpush1.bf16.msra.mxu0 %v1656_v59  ;;  %v1628_v59 = vunpack.c.l.s8.bf16 %v860_v25  ;;  %v877_v25 = vld [vmem:[%s6592_s30 + $0x888] sm:$0xff] }
 0x1c4   : > { %2688 = vmatpush1.bf16.msra.mxu1 %v1720_v31  ;;  %2646 = vmatprep.subr.bf16.mxu0 %v1653_v32  ;;  %v1692_v31 = vunpack.c.l.s8.bf16 %v892_v26  ;;  %v1689_v32 = vunpack.c.h.s8.bf16 %v889_v54  ;;  %v909_v26 = vld [vmem:[%s6592_s30 + $0x988] sm:$0xff] }
 0x1c5   : > { %2689 = vmatprep.subr.bf16.mxu1 %v1717_v29  ;;  %2676 = vmatprep.mubr.bf16.mxu0 %v6893_v45  ;;  %v1753_v29 = vunpack.c.h.s8.bf16 %v921_v37 }
 0x1c6   : > { %2719 = vmatprep.mubr.bf16.mxu1 %v6897_v46 }
 0x1c7   : > { %2647 = vmatpush1.bf16.msra.mxu0 %v1652_v61  ;;  %v1688_v61 = vunpack.c.h.s8.bf16 %v888_v36 }
 0x1c8   : > { %2690 = vmatpush1.bf16.msra.mxu1 %v1716_v62  ;;  %2648 = vmatprep.subr.bf16.mxu0 %v1649_v63  ;;  %v1752_v62 = vunpack.c.h.s8.bf16 %v920_v60  ;;  %v1685_v63 = vunpack.c.l.s8.bf16 %v889_v54  ;;  %v876_v54 = vld [vmem:[%s6592_s30 + $0x880] sm:$0xff] }
 0x1c9   : > { %2691 = vmatprep.subr.bf16.mxu1 %v1713_v0  ;;  %v1749_v0 = vunpack.c.l.s8.bf16 %v921_v37  ;;  %v908_v37 = vld [vmem:[%s6592_s30 + $0x980] sm:$0xff] }
 0x1cb   : > { %2649 = vmatpush1.bf16.msra.mxu0 %v1648_v3  ;;  %v1684_v3 = vunpack.c.l.s8.bf16 %v888_v36  ;;  %v937_v36 = vld [vmem:[%s6592_s30 + $0xa68] sm:$0xff] }
 0x1cc   : > { %2692 = vmatpush1.bf16.msra.mxu1 %v1712_v4  ;;  %2650 = vmatprep.subr.bf16.mxu0 %v1645_v5  ;;  %v1748_v4 = vunpack.c.l.s8.bf16 %v920_v60  ;;  %v1681_v5 = vunpack.c.h.s8.bf16 %v885_v1  ;;  %v969_v60 = vld [vmem:[%s6592_s30 + $0xb68] sm:$0xff] }
 0x1cd   : > { %2693 = vmatprep.subr.bf16.mxu1 %v1709_v6  ;;  %v1745_v6 = vunpack.c.h.s8.bf16 %v917_v2 }
 0x1cf   : > { %2651 = vmatpush1.bf16.msra.mxu0 %v1644_v9  ;;  %v1680_v9 = vunpack.c.h.s8.bf16 %v884_v7 }
 0x1d0   : > { %2694 = vmatpush1.bf16.msra.mxu1 %v1708_v10  ;;  %2652 = vmatprep.subr.bf16.mxu0 %v1641_v11  ;;  %v1744_v10 = vunpack.c.h.s8.bf16 %v916_v8  ;;  %v1677_v11 = vunpack.c.l.s8.bf16 %v885_v1  ;;  %v936_v1 = vld [vmem:[%s6592_s30 + $0xa60] sm:$0xff] }
 0x1d1   : > { %2695 = vmatprep.subr.bf16.mxu1 %v1705_v12  ;;  %v1741_v12 = vunpack.c.l.s8.bf16 %v917_v2  ;;  %v968_v2 = vld [vmem:[%s6592_s30 + $0xb60] sm:$0xff] }
 0x1d3   : > { %2653 = vmatpush1.bf16.msra.mxu0 %v1640_v15  ;;  %v1676_v15 = vunpack.c.l.s8.bf16 %v884_v7  ;;  %v6948_v7 = vld [vmem:[%s6629_s15 + $0x58] sm:$0xff] }
 0x1d4   : > { %2696 = vmatpush1.bf16.msra.mxu1 %v1704_v16  ;;  %2654 = vmatprep.subr.bf16.mxu0 %v1637_v17  ;;  %v1740_v16 = vunpack.c.l.s8.bf16 %v916_v8  ;;  %v1673_v17 = vunpack.c.h.s8.bf16 %v881_v13  ;;  %v6951_v8 = vld [vmem:[%s6629_s15 + $0xd8] sm:$0xff] }
 0x1d5   : > { %2697 = vmatprep.subr.bf16.mxu1 %v1701_v18  ;;  %v1737_v18 = vunpack.c.h.s8.bf16 %v913_v14 }
 0x1d7   : > { %2655 = vmatpush1.bf16.msra.mxu0 %v1636_v21  ;;  %v1672_v21 = vunpack.c.h.s8.bf16 %v880_v19 }
 0x1d8   : > { %2698 = vmatpush1.bf16.msra.mxu1 %v1700_v22  ;;  %2656 = vmatprep.subr.bf16.mxu0 %v1633_v23  ;;  %v1736_v22 = vunpack.c.h.s8.bf16 %v912_v20  ;;  %v1669_v23 = vunpack.c.l.s8.bf16 %v881_v13  ;;  %v1780_v13 = vunpack.c.l.s8.bf16 %v936_v1 }
 0x1d9   : > { %2699 = vmatprep.subr.bf16.mxu1 %v1697_v24  ;;  %v1733_v24 = vunpack.c.l.s8.bf16 %v913_v14  ;;  %v1844_v14 = vunpack.c.l.s8.bf16 %v968_v2 }
 0x1db   : > { %2657 = vmatpush1.bf16.msra.mxu0 %v1632_v27  ;;  %v1668_v27 = vunpack.c.l.s8.bf16 %v880_v19 }
 0x1dc   : > { %2700 = vmatpush1.bf16.msra.mxu1 %v1696_v28  ;;  %2658 = vmatprep.subr.bf16.mxu0 %v1629_v47  ;;  %v1732_v28 = vunpack.c.l.s8.bf16 %v912_v20  ;;  %v1665_v47 = vunpack.c.h.s8.bf16 %v877_v25 }
 0x1dd   : > { %2701 = vmatprep.subr.bf16.mxu1 %v1693_v51  ;;  %v1729_v51 = vunpack.c.h.s8.bf16 %v909_v26 }
 0x1df   : > { %2659 = vmatpush1.bf16.msra.mxu0 %v1628_v59  ;;  %v1664_v59 = vunpack.c.h.s8.bf16 %v876_v54 }
 0x1e0   : > { %2702 = vmatpush1.bf16.msra.mxu1 %v1692_v31  ;;  %2660 = vmatprep.subr.bf16.mxu0 %v1689_v32  ;;  %v1728_v31 = vunpack.c.h.s8.bf16 %v908_v37  ;;  %v1661_v32 = vunpack.c.l.s8.bf16 %v877_v25 }
 0x1e1   : > { %2703 = vmatprep.subr.bf16.mxu1 %v1753_v29  ;;  %v1725_v29 = vunpack.c.l.s8.bf16 %v909_v26 }
 0x1e3   : > { %2661 = vmatpush2.bf16.msra.mxu0 %v1688_v61  ;;  %v1660_v61 = vunpack.c.l.s8.bf16 %v876_v54 }
 0x1e4   : > { %2704 = vmatpush2.bf16.msra.mxu1 %v1752_v62  ;;  %2662 = vmatprep.subr.bf16.mxu0 %v1685_v63  ;;  %v1724_v62 = vunpack.c.l.s8.bf16 %v908_v37  ;;  %v1785_v63 = vunpack.c.h.s8.bf16 %v937_v36 }
 0x1e5   : > { %2705 = vmatprep.subr.bf16.mxu1 %v1749_v0  ;;  %v1849_v0 = vunpack.c.h.s8.bf16 %v969_v60 }
 0x1e7   : > { %2663 = vmatpush2.bf16.msra.mxu0 %v1684_v3  ;;  %v6934_v3 = vld [vmem:[%s6629_s15 + $0x50] sm:$0xff] }
 0x1e8   : > { %2706 = vmatpush2.bf16.msra.mxu1 %v1748_v4  ;;  %2664 = vmatprep.subr.bf16.mxu0 %v1681_v5  ;;  %v6938_v4 = vcombine.low %v6870_v41, %v6881_v50  ;;  %v6942_v5 = vcombine.low %v6884_v57, %v6887_v58  ;;  %v1845_v41 = vunpack.c.l.s8.bf16 %v969_v60  ;;  %v933_v50 = vld [vmem:[%s6592_s30 + $0xa48] sm:$0xff]  ;;  %v6961_v58 = vcombine.high %v6948_v7, %v6951_v8 }
 0x1e9   : > { %2707 = vmatprep.subr.bf16.mxu1 %v1745_v6  ;;  %v6945_v6 = vld [vmem:[%s6629_s15 + $0xd0] sm:$0xff] }
 0x1ea   : > { %v6957_v57 = vcombine.high %v6934_v3, %v6945_v6  ;;  %7728 = vst [vmem:[#allocation33_spill] sm:$0xff] %v6961_v58 }
 0x1eb   : > { %2665 = vmatpush2.bf16.msra.mxu0 %v1680_v9  ;;  %v1784_v9 = vunpack.c.h.s8.bf16 %v936_v1 }
 0x1ec   : > { %2708 = vmatpush2.bf16.msra.mxu1 %v1744_v10  ;;  %2666 = vmatprep.subr.bf16.mxu0 %v1677_v11  ;;  %v1848_v10 = vunpack.c.h.s8.bf16 %v968_v2  ;;  %v1781_v11 = vunpack.c.l.s8.bf16 %v937_v36 }
 0x1ed   : > { %2709 = vmatprep.subr.bf16.mxu1 %v1741_v12  ;;  %v965_v12 = vld [vmem:[%s6592_s30 + $0xb48] sm:$0xff] }
 0x1ef   : > { %2667 = vmatpush2.bf16.msra.mxu0 %v1676_v15  ;;  %v1777_v15 = vunpack.c.h.s8.bf16 %v933_v50 }
 0x1f0   : > { %2710 = vmatpush2.bf16.msra.mxu1 %v1740_v16  ;;  %2668 = vmatprep.subr.bf16.mxu0 %v1673_v17  ;;  %v1841_v16 = vunpack.c.h.s8.bf16 %v965_v12  ;;  %v932_v17 = vld [vmem:[%s6592_s30 + $0xa40] sm:$0xff] }
 0x1f1   : > { %2711 = vmatprep.subr.bf16.mxu1 %v1737_v18  ;;  %v964_v18 = vld [vmem:[%s6592_s30 + $0xb40] sm:$0xff]  ;;  %v1776_v19 = vunpack.c.h.s8.bf16 %v932_v17  ;;  %v1772_v25 = vunpack.c.l.s8.bf16 %v932_v17 }
 0x1f2   : > { %v1840_v20 = vunpack.c.h.s8.bf16 %v964_v18  ;;  %v1836_v26 = vunpack.c.l.s8.bf16 %v964_v18 }
 0x1f3   : > { %2669 = vmatpush2.bf16.msra.mxu0 %v1672_v21  ;;  %v1773_v21 = vunpack.c.l.s8.bf16 %v933_v50 }
 0x1f4   : > { %2712 = vmatpush2.bf16.msra.mxu1 %v1736_v22  ;;  %2670 = vmatprep.subr.bf16.mxu0 %v1669_v23  ;;  %v1837_v22 = vunpack.c.l.s8.bf16 %v965_v12  ;;  %v929_v23 = vld [vmem:[%s6592_s30 + $0xa28] sm:$0xff] }
 0x1f5   : > { %2713 = vmatprep.subr.bf16.mxu1 %v1733_v24  ;;  %v961_v24 = vld [vmem:[%s6592_s30 + $0xb28] sm:$0xff] }
 0x1f7   : > { %2671 = vmatpush2.bf16.msra.mxu0 %v1668_v27  ;;  %v1769_v27 = vunpack.c.h.s8.bf16 %v929_v23 }
 0x1f8   : > { %2714 = vmatpush2.bf16.msra.mxu1 %v1732_v28  ;;  %2672 = vmatprep.subr.bf16.mxu0 %v1665_v47  ;;  %v1833_v28 = vunpack.c.h.s8.bf16 %v961_v24  ;;  %v928_v47 = vld [vmem:[%s6592_s30 + $0xa20] sm:$0xff] }
 0x1f9   : > { %2715 = vmatprep.subr.bf16.mxu1 %v1729_v51  ;;  %v960_v51 = vld [vmem:[%s6592_s30 + $0xb20] sm:$0xff]  ;;  %v1768_v54 = vunpack.c.h.s8.bf16 %v928_v47  ;;  %v1764_v36 = vunpack.c.l.s8.bf16 %v928_v47 }
 0x1fa   : > { %v1832_v37 = vunpack.c.h.s8.bf16 %v960_v51  ;;  %v1828_v60 = vunpack.c.l.s8.bf16 %v960_v51 }
 0x1fb   : > { %2673 = vmatpush2.bf16.msra.mxu0 %v1664_v59  ;;  %v1765_v59 = vunpack.c.l.s8.bf16 %v929_v23 }
 0x1fc   : > { %2716 = vmatpush2.bf16.msra.mxu1 %v1728_v31  ;;  %2674 = vmatprep.subr.bf16.mxu0 %v1661_v32  ;;  %v1829_v31 = vunpack.c.l.s8.bf16 %v961_v24  ;;  %v925_v32 = vld [vmem:[%s6592_s30 + $0xa08] sm:$0xff] }
 0x1fd   : > { %2717 = vmatprep.subr.bf16.mxu1 %v1725_v29  ;;  %v957_v29 = vld [vmem:[%s6592_s30 + $0xb08] sm:$0xff] }
 0x1ff   : > { %2675 = vmatpush2.bf16.msra.mxu0 %v1660_v61  ;;  %v1761_v61 = vunpack.c.h.s8.bf16 %v925_v32 }
 0x200   : > { %2718 = vmatpush2.bf16.msra.mxu1 %v1724_v62  ;;  %2730 = vmatprep.subr.bf16.mxu0 %v1785_v63  ;;  %v1825_v62 = vunpack.c.h.s8.bf16 %v957_v29  ;;  %v924_v63 = vld [vmem:[%s6592_s30 + $0xa00] sm:$0xff] }
 0x201   : > { %2773 = vmatprep.subr.bf16.mxu1 %v1849_v0  ;;  %v956_v0 = vld [vmem:[%s6592_s30 + $0xb00] sm:$0xff]  ;;  %v1760_v1 = vunpack.c.h.s8.bf16 %v924_v63  ;;  %v1756_v50 = vunpack.c.l.s8.bf16 %v924_v63 }
 0x202   : > { %2677 = vmatmul.mubr.bf16.vlgmr.msra.gmra.mxu0 %v6938_v4  ;;  %v1824_v2 = vunpack.c.h.s8.bf16 %v956_v0  ;;  %v1820_v12 = vunpack.c.l.s8.bf16 %v956_v0 }
 0x203   : > { %2720 = vmatmul.mubr.bf16.vlgmr.msra.gmra.mxu1 %v6942_v5  ;;  %2731 = vmatpush1.bf16.msra.mxu0 %v1784_v9  ;;  %v1757_v9 = vunpack.c.l.s8.bf16 %v925_v32 }
 0x204   : > { %2774 = vmatpush1.bf16.msra.mxu1 %v1848_v10  ;;  %2732 = vmatprep.subr.bf16.mxu0 %v1781_v11  ;;  %v1821_v10 = vunpack.c.l.s8.bf16 %v957_v29  ;;  %v953_v11 = vld [vmem:[%s6592_s30 + $0xae8] sm:$0xff] }
 0x205   : > { %2775 = vmatprep.subr.bf16.mxu1 %v1845_v41  ;;  %2762 = vmatprep.mubr.bf16.mxu0 %v6957_v57  ;;  %v985_v41 = vld [vmem:[%s6592_s30 + $0xbe8] sm:$0xff] }
 0x206   : > { %2805 = vmatprep.mubr.bf16.mxu1 %v6961_v58  ;;  %v794_v58 = vld [vmem:[%s6592_s30 + $0x5f0] sm:$0xff] }
 0x207   : > { %2733 = vmatpush1.bf16.msra.mxu0 %v1780_v13  ;;  %v1817_v13 = vunpack.c.h.s8.bf16 %v953_v11 }
 0x208   : > { %2776 = vmatpush1.bf16.msra.mxu1 %v1844_v14  ;;  %2734 = vmatprep.subr.bf16.mxu0 %v1777_v15  ;;  %v1881_v14 = vunpack.c.h.s8.bf16 %v985_v41  ;;  %v952_v15 = vld [vmem:[%s6592_s30 + $0xae0] sm:$0xff] }
 0x209   : > { %2777 = vmatprep.subr.bf16.mxu1 %v1841_v16  ;;  %v984_v16 = vld [vmem:[%s6592_s30 + $0xbe0] sm:$0xff]  ;;  %v1816_v17 = vunpack.c.h.s8.bf16 %v952_v15  ;;  %v1812_v23 = vunpack.c.l.s8.bf16 %v952_v15 }
 0x20a   : > { %v1880_v18 = vunpack.c.h.s8.bf16 %v984_v16  ;;  %v1876_v24 = vunpack.c.l.s8.bf16 %v984_v16 }
 0x20b   : > { %2735 = vmatpush1.bf16.msra.mxu0 %v1776_v19  ;;  %v1813_v19 = vunpack.c.l.s8.bf16 %v953_v11 }
 0x20c   : > { %2778 = vmatpush1.bf16.msra.mxu1 %v1840_v20  ;;  %2736 = vmatprep.subr.bf16.mxu0 %v1773_v21  ;;  %v1877_v20 = vunpack.c.l.s8.bf16 %v985_v41  ;;  %v949_v21 = vld [vmem:[%s6592_s30 + $0xac8] sm:$0xff] }
 0x20d   : > { %2779 = vmatprep.subr.bf16.mxu1 %v1837_v22  ;;  %v981_v22 = vld [vmem:[%s6592_s30 + $0xbc8] sm:$0xff] }
 0x20f   : > { %2737 = vmatpush1.bf16.msra.mxu0 %v1772_v25  ;;  %v1809_v25 = vunpack.c.h.s8.bf16 %v949_v21 }
 0x210   : > { %2780 = vmatpush1.bf16.msra.mxu1 %v1836_v26  ;;  %2738 = vmatprep.subr.bf16.mxu0 %v1769_v27  ;;  %v1873_v26 = vunpack.c.h.s8.bf16 %v981_v22  ;;  %v948_v27 = vld [vmem:[%s6592_s30 + $0xac0] sm:$0xff] }
 0x211   : > { %2781 = vmatprep.subr.bf16.mxu1 %v1833_v28  ;;  %v980_v28 = vld [vmem:[%s6592_s30 + $0xbc0] sm:$0xff]  ;;  %v1808_v47 = vunpack.c.h.s8.bf16 %v948_v27  ;;  %v1804_v32 = vunpack.c.l.s8.bf16 %v948_v27 }
 0x212   : > { %v1872_v51 = vunpack.c.h.s8.bf16 %v980_v28  ;;  %v1868_v29 = vunpack.c.l.s8.bf16 %v980_v28  ;;  %v6998_v27 = vld [vmem:[%s6629_s15 + $0x60] sm:$0xff]  ;;  %v7002_v28 = vcombine.low %v6934_v3, %v6945_v6  ;;  %v997_v6 = vld [vmem:[%s6592_s30 + $0xc48] sm:$0xff] }
 0x213   : > { %2739 = vmatpush1.bf16.msra.mxu0 %v1768_v54  ;;  %v1805_v54 = vunpack.c.l.s8.bf16 %v949_v21 }
 0x214   : > { %2782 = vmatpush1.bf16.msra.mxu1 %v1832_v37  ;;  %2740 = vmatprep.subr.bf16.mxu0 %v1765_v59  ;;  %v1869_v37 = vunpack.c.l.s8.bf16 %v981_v22  ;;  %v945_v59 = vld [vmem:[%s6592_s30 + $0xaa8] sm:$0xff]  ;;  %7729 = vst [vmem:[#allocation34_spill] sm:$0xff] %v7002_v28 }
 0x215   : > { %2783 = vmatprep.subr.bf16.mxu1 %v1829_v31  ;;  %v977_v31 = vld [vmem:[%s6592_s30 + $0xba8] sm:$0xff] }
 0x217   : > { %2741 = vmatpush1.bf16.msra.mxu0 %v1764_v36  ;;  %v1801_v36 = vunpack.c.h.s8.bf16 %v945_v59 }
 0x218   : > { %2784 = vmatpush1.bf16.msra.mxu1 %v1828_v60  ;;  %2742 = vmatprep.subr.bf16.mxu0 %v1761_v61  ;;  %v1865_v60 = vunpack.c.h.s8.bf16 %v977_v31  ;;  %v944_v61 = vld [vmem:[%s6592_s30 + $0xaa0] sm:$0xff] }
 0x219   : > { %2785 = vmatprep.subr.bf16.mxu1 %v1825_v62  ;;  %v976_v62 = vld [vmem:[%s6592_s30 + $0xba0] sm:$0xff]  ;;  %v1800_v63 = vunpack.c.h.s8.bf16 %v944_v61  ;;  %v1796_v11 = vunpack.c.l.s8.bf16 %v944_v61  ;;  %v1905_v61 = vunpack.c.h.s8.bf16 %v997_v6 }
 0x21a   : > { %v1864_v0 = vunpack.c.h.s8.bf16 %v976_v62  ;;  %v1860_v41 = vunpack.c.l.s8.bf16 %v976_v62 }
 0x21b   : > { %2743 = vmatpush1.bf16.msra.mxu0 %v1760_v1  ;;  %v1797_v1 = vunpack.c.l.s8.bf16 %v945_v59 }
 0x21c   : > { %2786 = vmatpush1.bf16.msra.mxu1 %v1824_v2  ;;  %2744 = vmatprep.subr.bf16.mxu0 %v1757_v9  ;;  %v1861_v2 = vunpack.c.l.s8.bf16 %v977_v31  ;;  %v941_v9 = vld [vmem:[%s6592_s30 + $0xa88] sm:$0xff] }
 0x21d   : > { %2787 = vmatprep.subr.bf16.mxu1 %v1821_v10  ;;  %v973_v10 = vld [vmem:[%s6592_s30 + $0xb88] sm:$0xff] }
 0x21f   : > { %2745 = vmatpush1.bf16.msra.mxu0 %v1756_v50  ;;  %v1793_v50 = vunpack.c.h.s8.bf16 %v941_v9 }
 0x220   : > { %2788 = vmatpush1.bf16.msra.mxu1 %v1820_v12  ;;  %2746 = vmatprep.subr.bf16.mxu0 %v1817_v13  ;;  %v1857_v12 = vunpack.c.h.s8.bf16 %v973_v10  ;;  %v940_v13 = vld [vmem:[%s6592_s30 + $0xa80] sm:$0xff] }
 0x221   : > { %2789 = vmatprep.subr.bf16.mxu1 %v1881_v14  ;;  %v972_v14 = vld [vmem:[%s6592_s30 + $0xb80] sm:$0xff]  ;;  %v1792_v15 = vunpack.c.h.s8.bf16 %v940_v13  ;;  %v1788_v21 = vunpack.c.l.s8.bf16 %v940_v13 }
 0x222   : > { %v1856_v16 = vunpack.c.h.s8.bf16 %v972_v14  ;;  %v1852_v22 = vunpack.c.l.s8.bf16 %v972_v14 }
 0x223   : > { %2747 = vmatpush2.bf16.msra.mxu0 %v1816_v17  ;;  %v1789_v17 = vunpack.c.l.s8.bf16 %v941_v9  ;;  %v1901_v9 = vunpack.c.l.s8.bf16 %v997_v6 }
 0x224   : > { %2790 = vmatpush2.bf16.msra.mxu1 %v1880_v18  ;;  %2748 = vmatprep.subr.bf16.mxu0 %v1813_v19  ;;  %v1853_v18 = vunpack.c.l.s8.bf16 %v973_v10  ;;  %v1001_v19 = vld [vmem:[%s6592_s30 + $0xc68] sm:$0xff] }
 0x225   : > { %2791 = vmatprep.subr.bf16.mxu1 %v1877_v20  ;;  %v1033_v20 = vld [vmem:[%s6592_s30 + $0xd68] sm:$0xff] }
 0x226   : > { %v1973_v3 = vunpack.c.l.s8.bf16 %v1033_v20 }
 0x227   : > { %2749 = vmatpush2.bf16.msra.mxu0 %v1812_v23  ;;  %v1913_v23 = vunpack.c.h.s8.bf16 %v1001_v19 }
 0x228   : > { %2792 = vmatpush2.bf16.msra.mxu1 %v1876_v24  ;;  %2750 = vmatprep.subr.bf16.mxu0 %v1809_v25  ;;  %v1977_v24 = vunpack.c.h.s8.bf16 %v1033_v20  ;;  %v1000_v25 = vld [vmem:[%s6592_s30 + $0xc60] sm:$0xff] }
 0x229   : > { %2793 = vmatprep.subr.bf16.mxu1 %v1873_v26  ;;  %v1032_v26 = vld [vmem:[%s6592_s30 + $0xd60] sm:$0xff]  ;;  %v1912_v59 = vunpack.c.h.s8.bf16 %v1000_v25 }
 0x22a   : > { %v1976_v31 = vunpack.c.h.s8.bf16 %v1032_v26 }
 0x22b   : > { %2751 = vmatpush2.bf16.msra.mxu0 %v1808_v47  ;;  %v7006_v47 = vcombine.low %v6948_v7, %v6951_v8 }
 0x22c   : > { %2794 = vmatpush2.bf16.msra.mxu1 %v1872_v51  ;;  %2752 = vmatprep.subr.bf16.mxu0 %v1805_v54  ;;  %v7009_v51 = vld [vmem:[%s6629_s15 + $0xe0] sm:$0xff]  ;;  %v7012_v54 = vld [vmem:[%s6629_s15 + $0x68] sm:$0xff] }
 0x22d   : > { %2795 = vmatprep.subr.bf16.mxu1 %v1869_v37  ;;  %7730 = vst [vmem:[#allocation35_spill] sm:$0xff] %v7006_v47  ;;  %v7015_v37 = vld [vmem:[%s6629_s15 + $0xe8] sm:$0xff]  ;;  %v7021_v7 = vcombine.high %v6998_v27, %v7009_v51 }
 0x22e   : > { %v7025_v8 = vcombine.high %v7012_v54, %v7015_v37 }
 0x22f   : > { %2753 = vmatpush2.bf16.msra.mxu0 %v1804_v32  ;;  %v1909_v32 = vunpack.c.l.s8.bf16 %v1001_v19  ;;  %7731 = vst [vmem:[#allocation36_spill] sm:$0xff] %v7021_v7 }
 0x230   : > { %2796 = vmatpush2.bf16.msra.mxu1 %v1868_v29  ;;  %2754 = vmatprep.subr.bf16.mxu0 %v1801_v36  ;;  %v1029_v29 = vld [vmem:[%s6592_s30 + $0xd48] sm:$0xff]  ;;  %7732 = vst [vmem:[#allocation37_spill] sm:$0xff] %v7025_v8  ;;  %v1908_v36 = vunpack.c.l.s8.bf16 %v1000_v25 }
 0x231   : > { %2797 = vmatprep.subr.bf16.mxu1 %v1865_v60  ;;  %v1972_v60 = vunpack.c.l.s8.bf16 %v1032_v26  ;;  %v1969_v62 = vunpack.c.h.s8.bf16 %v1029_v29  ;;  %v1965_v10 = vunpack.c.l.s8.bf16 %v1029_v29 }
 0x233   : > { %2755 = vmatpush2.bf16.msra.mxu0 %v1800_v63  ;;  %v996_v63 = vld [vmem:[%s6592_s30 + $0xc40] sm:$0xff] }
 0x234   : > { %2798 = vmatpush2.bf16.msra.mxu1 %v1864_v0  ;;  %2756 = vmatprep.subr.bf16.mxu0 %v1797_v1  ;;  %v1028_v0 = vld [vmem:[%s6592_s30 + $0xd40] sm:$0xff]  ;;  %v1904_v1 = vunpack.c.h.s8.bf16 %v996_v63 }
 0x235   : > { %2799 = vmatprep.subr.bf16.mxu1 %v1861_v2  ;;  %v1968_v2 = vunpack.c.h.s8.bf16 %v1028_v0 }
 0x237   : > { %2757 = vmatpush2.bf16.msra.mxu0 %v1796_v11  ;;  %v993_v11 = vld [vmem:[%s6592_s30 + $0xc28] sm:$0xff] }
 0x238   : > { %2800 = vmatpush2.bf16.msra.mxu1 %v1860_v41  ;;  %2758 = vmatprep.subr.bf16.mxu0 %v1793_v50  ;;  %v1025_v41 = vld [vmem:[%s6592_s30 + $0xd28] sm:$0xff]  ;;  %v1900_v50 = vunpack.c.l.s8.bf16 %v996_v63  ;;  %v1897_v13 = vunpack.c.h.s8.bf16 %v993_v11  ;;  %v1893_v19 = vunpack.c.l.s8.bf16 %v993_v11 }
 0x239   : > { %2801 = vmatprep.subr.bf16.mxu1 %v1857_v12  ;;  %v1964_v12 = vunpack.c.l.s8.bf16 %v1028_v0  ;;  %v1961_v14 = vunpack.c.h.s8.bf16 %v1025_v41  ;;  %v1957_v20 = vunpack.c.l.s8.bf16 %v1025_v41 }
 0x23b   : > { %2759 = vmatpush2.bf16.msra.mxu0 %v1792_v15  ;;  %v992_v15 = vld [vmem:[%s6592_s30 + $0xc20] sm:$0xff] }
 0x23c   : > { %2802 = vmatpush2.bf16.msra.mxu1 %v1856_v16  ;;  %2760 = vmatprep.subr.bf16.mxu0 %v1789_v17  ;;  %v1024_v16 = vld [vmem:[%s6592_s30 + $0xd20] sm:$0xff]  ;;  %v1896_v17 = vunpack.c.h.s8.bf16 %v992_v15 }
 0x23d   : > { %2803 = vmatprep.subr.bf16.mxu1 %v1853_v18  ;;  %v1960_v18 = vunpack.c.h.s8.bf16 %v1024_v16 }
 0x23f   : > { %2761 = vmatpush2.bf16.msra.mxu0 %v1788_v21  ;;  %v989_v21 = vld [vmem:[%s6592_s30 + $0xc08] sm:$0xff] }
 0x240   : > { %2804 = vmatpush2.bf16.msra.mxu1 %v1852_v22  ;;  %2816 = vmatprep.subr.bf16.mxu0 %v1913_v23  ;;  %v1021_v22 = vld [vmem:[%s6592_s30 + $0xd08] sm:$0xff]  ;;  %v1892_v23 = vunpack.c.l.s8.bf16 %v992_v15  ;;  %v1889_v25 = vunpack.c.h.s8.bf16 %v989_v21  ;;  %v1885_v6 = vunpack.c.l.s8.bf16 %v989_v21 }
 0x241   : > { %2859 = vmatprep.subr.bf16.mxu1 %v1977_v24  ;;  %v1956_v24 = vunpack.c.l.s8.bf16 %v1024_v16  ;;  %v1953_v26 = vunpack.c.h.s8.bf16 %v1021_v22  ;;  %v1949_v29 = vunpack.c.l.s8.bf16 %v1021_v22 }
 0x242   : > { %2763 = vmatmul.mubr.bf16.vlgmr.msra.gmra.mxu0 %v7002_v28 }
 0x243   : > { %2806 = vmatmul.mubr.bf16.vlgmr.msra.gmra.mxu1 %v7006_v47  ;;  %2817 = vmatpush1.bf16.msra.mxu0 %v1912_v59  ;;  %v988_v59 = vld [vmem:[%s6592_s30 + $0xc00] sm:$0xff] }
 0x244   : > { %2860 = vmatpush1.bf16.msra.mxu1 %v1976_v31  ;;  %2818 = vmatprep.subr.bf16.mxu0 %v1909_v32  ;;  %v1020_v31 = vld [vmem:[%s6592_s30 + $0xd00] sm:$0xff]  ;;  %v1888_v32 = vunpack.c.h.s8.bf16 %v988_v59 }
 0x245   : > { %2861 = vmatprep.subr.bf16.mxu1 %v1973_v3  ;;  %2848 = vmatprep.mubr.bf16.mxu0 %v7021_v7  ;;  %v1952_v3 = vunpack.c.h.s8.bf16 %v1020_v31 }
 0x246   : > { %2891 = vmatprep.mubr.bf16.mxu1 %v7025_v8 }
 0x247   : > { %2819 = vmatpush1.bf16.msra.mxu0 %v1908_v36  ;;  %v1017_v36 = vld [vmem:[%s6592_s30 + $0xce8] sm:$0xff] }
 0x248   : > { %2862 = vmatpush1.bf16.msra.mxu1 %v1972_v60  ;;  %2820 = vmatprep.subr.bf16.mxu0 %v1905_v61  ;;  %v1049_v60 = vld [vmem:[%s6592_s30 + $0xde8] sm:$0xff]  ;;  %v1884_v61 = vunpack.c.l.s8.bf16 %v988_v59  ;;  %v1945_v63 = vunpack.c.h.s8.bf16 %v1017_v36  ;;  %v1941_v11 = vunpack.c.l.s8.bf16 %v1017_v36 }
 0x249   : > { %2863 = vmatprep.subr.bf16.mxu1 %v1969_v62  ;;  %v1948_v62 = vunpack.c.l.s8.bf16 %v1020_v31  ;;  %v2009_v0 = vunpack.c.h.s8.bf16 %v1049_v60  ;;  %v2005_v41 = vunpack.c.l.s8.bf16 %v1049_v60 }
 0x24b   : > { %2821 = vmatpush1.bf16.msra.mxu0 %v1904_v1  ;;  %v1016_v1 = vld [vmem:[%s6592_s30 + $0xce0] sm:$0xff] }
 0x24c   : > { %2864 = vmatpush1.bf16.msra.mxu1 %v1968_v2  ;;  %2822 = vmatprep.subr.bf16.mxu0 %v1901_v9  ;;  %v1048_v2 = vld [vmem:[%s6592_s30 + $0xde0] sm:$0xff]  ;;  %v1944_v9 = vunpack.c.h.s8.bf16 %v1016_v1 }
 0x24d   : > { %2865 = vmatprep.subr.bf16.mxu1 %v1965_v10  ;;  %v2008_v10 = vunpack.c.h.s8.bf16 %v1048_v2 }
 0x24f   : > { %2823 = vmatpush1.bf16.msra.mxu0 %v1900_v50  ;;  %v1013_v50 = vld [vmem:[%s6592_s30 + $0xcc8] sm:$0xff] }
 0x250   : > { %2866 = vmatpush1.bf16.msra.mxu1 %v1964_v12  ;;  %2824 = vmatprep.subr.bf16.mxu0 %v1897_v13  ;;  %v1045_v12 = vld [vmem:[%s6592_s30 + $0xdc8] sm:$0xff]  ;;  %v1940_v13 = vunpack.c.l.s8.bf16 %v1016_v1  ;;  %v1937_v15 = vunpack.c.h.s8.bf16 %v1013_v50  ;;  %v1933_v21 = vunpack.c.l.s8.bf16 %v1013_v50 }
 0x251   : > { %2867 = vmatprep.subr.bf16.mxu1 %v1961_v14  ;;  %v2004_v14 = vunpack.c.l.s8.bf16 %v1048_v2  ;;  %v2001_v16 = vunpack.c.h.s8.bf16 %v1045_v12  ;;  %v1997_v22 = vunpack.c.l.s8.bf16 %v1045_v12 }
 0x253   : > { %2825 = vmatpush1.bf16.msra.mxu0 %v1896_v17  ;;  %v1012_v17 = vld [vmem:[%s6592_s30 + $0xcc0] sm:$0xff] }
 0x254   : > { %2868 = vmatpush1.bf16.msra.mxu1 %v1960_v18  ;;  %2826 = vmatprep.subr.bf16.mxu0 %v1893_v19  ;;  %v1044_v18 = vld [vmem:[%s6592_s30 + $0xdc0] sm:$0xff]  ;;  %v1936_v19 = vunpack.c.h.s8.bf16 %v1012_v17 }
 0x255   : > { %2869 = vmatprep.subr.bf16.mxu1 %v1957_v20  ;;  %v2000_v20 = vunpack.c.h.s8.bf16 %v1044_v18 }
 0x257   : > { %2827 = vmatpush1.bf16.msra.mxu0 %v1892_v23  ;;  %v1009_v23 = vld [vmem:[%s6592_s30 + $0xca8] sm:$0xff] }
 0x258   : > { %2870 = vmatpush1.bf16.msra.mxu1 %v1956_v24  ;;  %2828 = vmatprep.subr.bf16.mxu0 %v1889_v25  ;;  %v1041_v24 = vld [vmem:[%s6592_s30 + $0xda8] sm:$0xff]  ;;  %v1932_v25 = vunpack.c.l.s8.bf16 %v1012_v17  ;;  %v1929_v59 = vunpack.c.h.s8.bf16 %v1009_v23  ;;  %v1925_v36 = vunpack.c.l.s8.bf16 %v1009_v23  ;;  %v7070_v23 = vcombine.low %v7012_v54, %v7015_v37 }
 0x259   : > { %2871 = vmatprep.subr.bf16.mxu1 %v1953_v26  ;;  %v1996_v26 = vunpack.c.l.s8.bf16 %v1044_v18  ;;  %v1993_v31 = vunpack.c.h.s8.bf16 %v1041_v24  ;;  %v1989_v60 = vunpack.c.l.s8.bf16 %v1041_v24  ;;  %v7073_v24 = vld [vmem:[%s6629_s15 + $0xf0] sm:$0xff] }
 0x25a   : > { %7734 = vst [vmem:[#allocation39_spill] sm:$0xff] %v7070_v23 }
 0x25b   : > { %2829 = vmatpush1.bf16.msra.mxu0 %v1888_v32  ;;  %v1008_v32 = vld [vmem:[%s6592_s30 + $0xca0] sm:$0xff] }
 0x25c   : > { %2872 = vmatpush1.bf16.msra.mxu1 %v1952_v3  ;;  %2830 = vmatprep.subr.bf16.mxu0 %v1885_v6  ;;  %v1040_v3 = vld [vmem:[%s6592_s30 + $0xda0] sm:$0xff]  ;;  %v1928_v6 = vunpack.c.h.s8.bf16 %v1008_v32 }
 0x25d   : > { %2873 = vmatprep.subr.bf16.mxu1 %v1949_v29  ;;  %v1992_v29 = vunpack.c.h.s8.bf16 %v1040_v3 }
 0x25f   : > { %2831 = vmatpush1.bf16.msra.mxu0 %v1884_v61  ;;  %v1005_v61 = vld [vmem:[%s6592_s30 + $0xc88] sm:$0xff] }
 0x260   : > { %2874 = vmatpush1.bf16.msra.mxu1 %v1948_v62  ;;  %2832 = vmatprep.subr.bf16.mxu0 %v1945_v63  ;;  %v1037_v62 = vld [vmem:[%s6592_s30 + $0xd88] sm:$0xff]  ;;  %v1924_v63 = vunpack.c.l.s8.bf16 %v1008_v32  ;;  %v1921_v1 = vunpack.c.h.s8.bf16 %v1005_v61  ;;  %v1917_v50 = vunpack.c.l.s8.bf16 %v1005_v61  ;;  %v1060_v61 = vld [vmem:[%s6592_s30 + $0xe40] sm:$0xff] }
 0x261   : > { %2875 = vmatprep.subr.bf16.mxu1 %v2009_v0  ;;  %v1988_v0 = vunpack.c.l.s8.bf16 %v1040_v3  ;;  %v1985_v2 = vunpack.c.h.s8.bf16 %v1037_v62  ;;  %v1981_v12 = vunpack.c.l.s8.bf16 %v1037_v62  ;;  %v1093_v3 = vld [vmem:[%s6592_s30 + $0xf48] sm:$0xff]  ;;  %v1092_v62 = vld [vmem:[%s6592_s30 + $0xf40] sm:$0xff] }
 0x263   : > { %2833 = vmatpush2.bf16.msra.mxu0 %v1944_v9  ;;  %v1004_v9 = vld [vmem:[%s6592_s30 + $0xc80] sm:$0xff] }
 0x264   : > { %2876 = vmatpush2.bf16.msra.mxu1 %v2008_v10  ;;  %2834 = vmatprep.subr.bf16.mxu0 %v1941_v11  ;;  %v1036_v10 = vld [vmem:[%s6592_s30 + $0xd80] sm:$0xff]  ;;  %v1920_v11 = vunpack.c.h.s8.bf16 %v1004_v9 }
 0x265   : > { %2877 = vmatprep.subr.bf16.mxu1 %v2005_v41  ;;  %v1984_v41 = vunpack.c.h.s8.bf16 %v1036_v10 }
 0x267   : > { %2835 = vmatpush2.bf16.msra.mxu0 %v1940_v13  ;;  %v1065_v13 = vld [vmem:[%s6592_s30 + $0xe68] sm:$0xff] }
 0x268   : > { %2878 = vmatpush2.bf16.msra.mxu1 %v2004_v14  ;;  %2836 = vmatprep.subr.bf16.mxu0 %v1937_v15  ;;  %v1097_v14 = vld [vmem:[%s6592_s30 + $0xf68] sm:$0xff]  ;;  %v1916_v15 = vunpack.c.l.s8.bf16 %v1004_v9  ;;  %v2041_v17 = vunpack.c.h.s8.bf16 %v1065_v13  ;;  %v2037_v32 = vunpack.c.l.s8.bf16 %v1065_v13  ;;  %v1056_v13 = vld [vmem:[%s6592_s30 + $0xe20] sm:$0xff] }
 0x269   : > { %2879 = vmatprep.subr.bf16.mxu1 %v2001_v16  ;;  %v1980_v16 = vunpack.c.l.s8.bf16 %v1036_v10  ;;  %v2105_v18 = vunpack.c.h.s8.bf16 %v1097_v14  ;;  %v1057_v9 = vld [vmem:[%s6592_s30 + $0xe28] sm:$0xff] }
 0x26a   : > { %v1089_v10 = vld [vmem:[%s6592_s30 + $0xf28] sm:$0xff] }
 0x26b   : > { %2837 = vmatpush2.bf16.msra.mxu0 %v1936_v19  ;;  %v1064_v19 = vld [vmem:[%s6592_s30 + $0xe60] sm:$0xff] }
 0x26c   : > { %2880 = vmatpush2.bf16.msra.mxu1 %v2000_v20  ;;  %2838 = vmatprep.subr.bf16.mxu0 %v1933_v21  ;;  %v1096_v20 = vld [vmem:[%s6592_s30 + $0xf60] sm:$0xff]  ;;  %v7062_v21 = vld [vmem:[%s6629_s15 + $0x70] sm:$0xff] }
 0x26d   : > { %2881 = vmatprep.subr.bf16.mxu1 %v1997_v22  ;;  %v7066_v22 = vcombine.low %v6998_v27, %v7009_v51  ;;  %v2101_v27 = vunpack.c.l.s8.bf16 %v1097_v14  ;;  %v1061_v51 = vld [vmem:[%s6592_s30 + $0xe48] sm:$0xff]  ;;  %v7085_v54 = vcombine.high %v7062_v21, %v7073_v24  ;;  %v1088_v14 = vld [vmem:[%s6592_s30 + $0xf20] sm:$0xff] }
 0x26f   : > { %2839 = vmatpush2.bf16.msra.mxu0 %v1932_v25  ;;  %7733 = vst [vmem:[#allocation38_spill] sm:$0xff] %v7066_v22  ;;  %v7076_v25 = vld [vmem:[%s6629_s15 + $0x78] sm:$0xff]  ;;  %7735 = vst [vmem:[#allocation40_spill] sm:$0xff] %v7085_v54 }
 0x270   : > { %2882 = vmatpush2.bf16.msra.mxu1 %v1996_v26  ;;  %2840 = vmatprep.subr.bf16.mxu0 %v1929_v59  ;;  %v7079_v26 = vld [vmem:[%s6629_s15 + $0xf8] sm:$0xff]  ;;  %v2040_v59 = vunpack.c.h.s8.bf16 %v1064_v19 }
 0x271   : > { %2883 = vmatprep.subr.bf16.mxu1 %v1993_v31  ;;  %v2104_v31 = vunpack.c.h.s8.bf16 %v1096_v20  ;;  %v7089_v37 = vcombine.high %v7076_v25, %v7079_v26 }
 0x273   : > { %2841 = vmatpush2.bf16.msra.mxu0 %v1928_v6  ;;  %7736 = vst [vmem:[#allocation41_spill] sm:$0xff] %v7089_v37  ;;  %v2036_v6 = vunpack.c.l.s8.bf16 %v1064_v19  ;;  %v1053_v19 = vld [vmem:[%s6592_s30 + $0xe08] sm:$0xff] }
 0x274   : > { %2884 = vmatpush2.bf16.msra.mxu1 %v1992_v29  ;;  %2842 = vmatprep.subr.bf16.mxu0 %v1925_v36  ;;  %v2100_v29 = vunpack.c.l.s8.bf16 %v1096_v20  ;;  %v2033_v36 = vunpack.c.h.s8.bf16 %v1061_v51  ;;  %v1085_v20 = vld [vmem:[%s6592_s30 + $0xf08] sm:$0xff] }
 0x275   : > { %2885 = vmatprep.subr.bf16.mxu1 %v1989_v60  ;;  %v2097_v60 = vunpack.c.h.s8.bf16 %v1093_v3 }
 0x277   : > { %2843 = vmatpush2.bf16.msra.mxu0 %v1924_v63  ;;  %v2032_v63 = vunpack.c.h.s8.bf16 %v1060_v61 }
 0x278   : > { %2886 = vmatpush2.bf16.msra.mxu1 %v1988_v0  ;;  %2844 = vmatprep.subr.bf16.mxu0 %v1921_v1  ;;  %v2096_v0 = vunpack.c.h.s8.bf16 %v1092_v62  ;;  %v2029_v1 = vunpack.c.l.s8.bf16 %v1061_v51  ;;  %v1052_v51 = vld [vmem:[%s6592_s30 + $0xe00] sm:$0xff] }
 0x279   : > { %2887 = vmatprep.subr.bf16.mxu1 %v1985_v2  ;;  %v2093_v2 = vunpack.c.l.s8.bf16 %v1093_v3  ;;  %v1084_v3 = vld [vmem:[%s6592_s30 + $0xf00] sm:$0xff] }
 0x27b   : > { %2845 = vmatpush2.bf16.msra.mxu0 %v1920_v11  ;;  %v2028_v11 = vunpack.c.l.s8.bf16 %v1060_v61  ;;  %v1081_v61 = vld [vmem:[%s6592_s30 + $0xee8] sm:$0xff] }
 0x27c   : > { %2888 = vmatpush2.bf16.msra.mxu1 %v1984_v41  ;;  %2846 = vmatprep.subr.bf16.mxu0 %v1917_v50  ;;  %v2092_v41 = vunpack.c.l.s8.bf16 %v1092_v62  ;;  %v2025_v50 = vunpack.c.h.s8.bf16 %v1057_v9  ;;  %v1113_v62 = vld [vmem:[%s6592_s30 + $0xfe8] sm:$0xff] }
 0x27d   : > { %2889 = vmatprep.subr.bf16.mxu1 %v1981_v12  ;;  %v2089_v12 = vunpack.c.h.s8.bf16 %v1089_v10 }
 0x27f   : > { %2847 = vmatpush2.bf16.msra.mxu0 %v1916_v15  ;;  %v2024_v15 = vunpack.c.h.s8.bf16 %v1056_v13 }
 0x280   : > { %2890 = vmatpush2.bf16.msra.mxu1 %v1980_v16  ;;  %2902 = vmatprep.subr.bf16.mxu0 %v2041_v17  ;;  %v2088_v16 = vunpack.c.h.s8.bf16 %v1088_v14  ;;  %v2021_v17 = vunpack.c.l.s8.bf16 %v1057_v9  ;;  %v1080_v9 = vld [vmem:[%s6592_s30 + $0xee0] sm:$0xff] }
 0x281   : > { %2945 = vmatprep.subr.bf16.mxu1 %v2105_v18  ;;  %v2085_v18 = vunpack.c.l.s8.bf16 %v1089_v10  ;;  %v1112_v10 = vld [vmem:[%s6592_s30 + $0xfe0] sm:$0xff] }
 0x282   : > { %2849 = vmatmul.mubr.bf16.vlgmr.msra.gmra.mxu0 %v7066_v22  ;;  %v795_v22 = vld [vmem:[%s6592_s30 + $0x5f8] sm:$0xff] }
 0x283   : > { %2892 = vmatmul.mubr.bf16.vlgmr.msra.gmra.mxu1 %v7070_v23  ;;  %2903 = vmatpush1.bf16.msra.mxu0 %v2040_v59  ;;  %v2020_v59 = vunpack.c.l.s8.bf16 %v1056_v13  ;;  %v1077_v13 = vld [vmem:[%s6592_s30 + $0xec8] sm:$0xff]  ;;  %v1499_v28 = vunpack.c.h.s8.bf16 %v795_v22 }
 0x284   : > { %2946 = vmatpush1.bf16.msra.mxu1 %v2104_v31  ;;  %2904 = vmatprep.subr.bf16.mxu0 %v2037_v32  ;;  %v2084_v31 = vunpack.c.l.s8.bf16 %v1088_v14  ;;  %v2017_v32 = vunpack.c.h.s8.bf16 %v1053_v19  ;;  %v1109_v14 = vld [vmem:[%s6592_s30 + $0xfc8] sm:$0xff] }
 0x285   : > { %2947 = vmatprep.subr.bf16.mxu1 %v2101_v27  ;;  %2934 = vmatprep.mubr.bf16.mxu0 %v7085_v54  ;;  %v2081_v27 = vunpack.c.h.s8.bf16 %v1085_v20 }
 0x286   : > { %2977 = vmatprep.mubr.bf16.mxu1 %v7089_v37 }
 0x287   : > { %2905 = vmatpush1.bf16.msra.mxu0 %v2036_v6  ;;  %v2016_v6 = vunpack.c.h.s8.bf16 %v1052_v51 }
 0x288   : > { %2948 = vmatpush1.bf16.msra.mxu1 %v2100_v29  ;;  %2906 = vmatprep.subr.bf16.mxu0 %v2033_v36  ;;  %v2080_v29 = vunpack.c.h.s8.bf16 %v1084_v3  ;;  %v2013_v36 = vunpack.c.l.s8.bf16 %v1053_v19  ;;  %v1076_v19 = vld [vmem:[%s6592_s30 + $0xec0] sm:$0xff] }
 0x289   : > { %2949 = vmatprep.subr.bf16.mxu1 %v2097_v60  ;;  %v2077_v60 = vunpack.c.l.s8.bf16 %v1085_v20  ;;  %v1108_v20 = vld [vmem:[%s6592_s30 + $0xfc0] sm:$0xff] }
 0x28b   : > { %2907 = vmatpush1.bf16.msra.mxu0 %v2032_v63  ;;  %v2012_v63 = vunpack.c.l.s8.bf16 %v1052_v51  ;;  %v1073_v51 = vld [vmem:[%s6592_s30 + $0xea8] sm:$0xff] }
 0x28c   : > { %2950 = vmatpush1.bf16.msra.mxu1 %v2096_v0  ;;  %2908 = vmatprep.subr.bf16.mxu0 %v2029_v1  ;;  %v2076_v0 = vunpack.c.l.s8.bf16 %v1084_v3  ;;  %v2073_v1 = vunpack.c.h.s8.bf16 %v1081_v61  ;;  %v1105_v3 = vld [vmem:[%s6592_s30 + $0xfa8] sm:$0xff] }
 0x28d   : > { %2951 = vmatprep.subr.bf16.mxu1 %v2093_v2  ;;  %v2137_v2 = vunpack.c.h.s8.bf16 %v1113_v62 }
 0x28f   : > { %2909 = vmatpush1.bf16.msra.mxu0 %v2028_v11  ;;  %v2072_v11 = vunpack.c.h.s8.bf16 %v1080_v9 }
 0x290   : > { %2952 = vmatpush1.bf16.msra.mxu1 %v2092_v41  ;;  %2910 = vmatprep.subr.bf16.mxu0 %v2025_v50  ;;  %v2136_v41 = vunpack.c.h.s8.bf16 %v1112_v10  ;;  %v2069_v50 = vunpack.c.l.s8.bf16 %v1081_v61  ;;  %v1072_v61 = vld [vmem:[%s6592_s30 + $0xea0] sm:$0xff] }
 0x291   : > { %2953 = vmatprep.subr.bf16.mxu1 %v2089_v12  ;;  %v2133_v12 = vunpack.c.l.s8.bf16 %v1113_v62  ;;  %v1104_v62 = vld [vmem:[%s6592_s30 + $0xfa0] sm:$0xff] }
 0x293   : > { %2911 = vmatpush1.bf16.msra.mxu0 %v2024_v15  ;;  %v2068_v15 = vunpack.c.l.s8.bf16 %v1080_v9  ;;  %v1069_v9 = vld [vmem:[%s6592_s30 + $0xe88] sm:$0xff] }
 0x294   : > { %2954 = vmatpush1.bf16.msra.mxu1 %v2088_v16  ;;  %2912 = vmatprep.subr.bf16.mxu0 %v2021_v17  ;;  %v2132_v16 = vunpack.c.l.s8.bf16 %v1112_v10  ;;  %v2065_v17 = vunpack.c.h.s8.bf16 %v1077_v13  ;;  %v1101_v10 = vld [vmem:[%s6592_s30 + $0xf88] sm:$0xff] }
 0x295   : > { %2955 = vmatprep.subr.bf16.mxu1 %v2085_v18  ;;  %v2129_v18 = vunpack.c.h.s8.bf16 %v1109_v14 }
 0x297   : > { %2913 = vmatpush1.bf16.msra.mxu0 %v2020_v59  ;;  %v2064_v59 = vunpack.c.h.s8.bf16 %v1076_v19 }
 0x298   : > { %2956 = vmatpush1.bf16.msra.mxu1 %v2084_v31  ;;  %2914 = vmatprep.subr.bf16.mxu0 %v2017_v32  ;;  %v2128_v31 = vunpack.c.h.s8.bf16 %v1108_v20  ;;  %v2061_v32 = vunpack.c.l.s8.bf16 %v1077_v13  ;;  %v1068_v13 = vld [vmem:[%s6592_s30 + $0xe80] sm:$0xff] }
 0x299   : > { %2957 = vmatprep.subr.bf16.mxu1 %v2081_v27  ;;  %v2125_v27 = vunpack.c.l.s8.bf16 %v1109_v14  ;;  %v1100_v14 = vld [vmem:[%s6592_s30 + $0xf80] sm:$0xff] }
 0x29b   : > { %2915 = vmatpush1.bf16.msra.mxu0 %v2016_v6  ;;  %v2060_v6 = vunpack.c.l.s8.bf16 %v1076_v19  ;;  %v619_v19 = vld [vmem:[%s6592_s30 + $0x78] sm:$0xff] }
 0x29c   : > { %2958 = vmatpush1.bf16.msra.mxu1 %v2080_v29  ;;  %2916 = vmatprep.subr.bf16.mxu0 %v2013_v36  ;;  %v2124_v29 = vunpack.c.l.s8.bf16 %v1108_v20  ;;  %v2057_v36 = vunpack.c.h.s8.bf16 %v1073_v51  ;;  %v651_v20 = vld [vmem:[%s6592_s30 + $0x178] sm:$0xff] }
 0x29d   : > { %2959 = vmatprep.subr.bf16.mxu1 %v2077_v60  ;;  %v2121_v60 = vunpack.c.h.s8.bf16 %v1105_v3 }
 0x29f   : > { %2917 = vmatpush1.bf16.msra.mxu0 %v2012_v63  ;;  %v2056_v63 = vunpack.c.h.s8.bf16 %v1072_v61 }
 0x2a0   : > { %2960 = vmatpush1.bf16.msra.mxu1 %v2076_v0  ;;  %2918 = vmatprep.subr.bf16.mxu0 %v2073_v1  ;;  %v2120_v0 = vunpack.c.h.s8.bf16 %v1104_v62  ;;  %v2053_v1 = vunpack.c.l.s8.bf16 %v1073_v51  ;;  %v618_v51 = vld [vmem:[%s6592_s30 + $0x70] sm:$0xff] }
 0x2a1   : > { %2961 = vmatprep.subr.bf16.mxu1 %v2137_v2  ;;  %v2117_v2 = vunpack.c.l.s8.bf16 %v1105_v3  ;;  %v650_v3 = vld [vmem:[%s6592_s30 + $0x170] sm:$0xff] }
 0x2a3   : > { %2919 = vmatpush2.bf16.msra.mxu0 %v2072_v11  ;;  %v2052_v11 = vunpack.c.l.s8.bf16 %v1072_v61  ;;  %v1143_v61 = vunpack.c.l.s8.bf16 %v619_v19 }
 0x2a4   : > { %2962 = vmatpush2.bf16.msra.mxu1 %v2136_v41  ;;  %2920 = vmatprep.subr.bf16.mxu0 %v2069_v50  ;;  %v2116_v41 = vunpack.c.l.s8.bf16 %v1104_v62  ;;  %v2049_v50 = vunpack.c.h.s8.bf16 %v1069_v9  ;;  %v1207_v62 = vunpack.c.l.s8.bf16 %v651_v20 }
 0x2a5   : > { %2963 = vmatprep.subr.bf16.mxu1 %v2133_v12  ;;  %v2113_v12 = vunpack.c.h.s8.bf16 %v1101_v10 }
 0x2a7   : > { %2921 = vmatpush2.bf16.msra.mxu0 %v2068_v15  ;;  %v2048_v15 = vunpack.c.h.s8.bf16 %v1068_v13 }
 0x2a8   : > { %2964 = vmatpush2.bf16.msra.mxu1 %v2132_v16  ;;  %2922 = vmatprep.subr.bf16.mxu0 %v2065_v17  ;;  %v2112_v16 = vunpack.c.h.s8.bf16 %v1100_v14  ;;  %v2045_v17 = vunpack.c.l.s8.bf16 %v1069_v9 }
 0x2a9   : > { %2965 = vmatprep.subr.bf16.mxu1 %v2129_v18  ;;  %v2109_v18 = vunpack.c.l.s8.bf16 %v1101_v10 }
 0x2ab   : > { %2923 = vmatpush2.bf16.msra.mxu0 %v2064_v59  ;;  %v2044_v59 = vunpack.c.l.s8.bf16 %v1068_v13 }
 0x2ac   : > { %2966 = vmatpush2.bf16.msra.mxu1 %v2128_v31  ;;  %2924 = vmatprep.subr.bf16.mxu0 %v2061_v32  ;;  %v2108_v31 = vunpack.c.l.s8.bf16 %v1100_v14  ;;  %v1147_v32 = vunpack.c.h.s8.bf16 %v619_v19 }
 0x2ad   : > { %2967 = vmatprep.subr.bf16.mxu1 %v2125_v27  ;;  %v1211_v27 = vunpack.c.h.s8.bf16 %v651_v20 }
 0x2af   : > { %2925 = vmatpush2.bf16.msra.mxu0 %v2060_v6  ;;  %v7127_v6 = vcombine.low %v7062_v21, %v7073_v24  ;;  %v1142_v21 = vunpack.c.l.s8.bf16 %v618_v51  ;;  %v1206_v24 = vunpack.c.l.s8.bf16 %v650_v3 }
 0x2b0   : > { %2968 = vmatpush2.bf16.msra.mxu1 %v2124_v29  ;;  %2926 = vmatprep.subr.bf16.mxu0 %v2057_v36  ;;  %v7131_v29 = vcombine.low %v7076_v25, %v7079_v26  ;;  %v1146_v36 = vunpack.c.h.s8.bf16 %v618_v51 }
 0x2b1   : > { %2969 = vmatprep.subr.bf16.mxu1 %v2121_v60  ;;  %7737 = vst [vmem:[#allocation42_spill] sm:$0xff] %v7127_v6  ;;  %v1210_v60 = vunpack.c.h.s8.bf16 %v650_v3 }
 0x2b2   : > { %7738 = vst [vmem:[#allocation43_spill] sm:$0xff] %v7131_v29 }
 0x2b3   : > { %2927 = vmatpush2.bf16.msra.mxu0 %v2056_v63  ;;  %v615_v63 = vld [vmem:[%s6592_s30 + $0x58] sm:$0xff] }
 0x2b4   : > { %2970 = vmatpush2.bf16.msra.mxu1 %v2120_v0  ;;  %2928 = vmatprep.subr.bf16.mxu0 %v2053_v1  ;;  %v647_v0 = vld [vmem:[%s6592_s30 + $0x158] sm:$0xff]  ;;  %v1139_v25 = vunpack.c.h.s8.bf16 %v615_v63  ;;  %v614_v1 = vld [vmem:[%s6592_s30 + $0x50] sm:$0xff] }
 0x2b5   : > { %2971 = vmatprep.subr.bf16.mxu1 %v2117_v2  ;;  %v1203_v26 = vunpack.c.h.s8.bf16 %v647_v0  ;;  %v646_v2 = vld [vmem:[%s6592_s30 + $0x150] sm:$0xff]  ;;  %v1138_v9 = vunpack.c.h.s8.bf16 %v614_v1  ;;  %v1134_v13 = vunpack.c.l.s8.bf16 %v614_v1 }
 0x2b6   : > { %v1202_v10 = vunpack.c.h.s8.bf16 %v646_v2  ;;  %v1198_v14 = vunpack.c.l.s8.bf16 %v646_v2 }
 0x2b7   : > { %2929 = vmatpush2.bf16.msra.mxu0 %v2052_v11  ;;  %v1135_v11 = vunpack.c.l.s8.bf16 %v615_v63 }
 0x2b8   : > { %2972 = vmatpush2.bf16.msra.mxu1 %v2116_v41  ;;  %2930 = vmatprep.subr.bf16.mxu0 %v2049_v50  ;;  %v1199_v41 = vunpack.c.l.s8.bf16 %v647_v0  ;;  %v611_v50 = vld [vmem:[%s6592_s30 + $0x38] sm:$0xff] }
 0x2b9   : > { %2973 = vmatprep.subr.bf16.mxu1 %v2113_v12  ;;  %v643_v12 = vld [vmem:[%s6592_s30 + $0x138] sm:$0xff]  ;;  %v1127_v19 = vunpack.c.l.s8.bf16 %v611_v50 }
 0x2ba   : > { %v1191_v20 = vunpack.c.l.s8.bf16 %v643_v12 }
 0x2bb   : > { %2931 = vmatpush2.bf16.msra.mxu0 %v2048_v15  ;;  %v610_v15 = vld [vmem:[%s6592_s30 + $0x30] sm:$0xff] }
 0x2bc   : > { %2974 = vmatpush2.bf16.msra.mxu1 %v2112_v16  ;;  %2932 = vmatprep.subr.bf16.mxu0 %v2045_v17  ;;  %v642_v16 = vld [vmem:[%s6592_s30 + $0x130] sm:$0xff]  ;;  %v1130_v17 = vunpack.c.h.s8.bf16 %v610_v15 }
 0x2bd   : > { %2975 = vmatprep.subr.bf16.mxu1 %v2109_v18  ;;  %v1194_v18 = vunpack.c.h.s8.bf16 %v642_v16 }
 0x2bf   : > { %2933 = vmatpush2.bf16.msra.mxu0 %v2044_v59  ;;  %v607_v59 = vld [vmem:[%s6592_s30 + $0x18] sm:$0xff] }
 0x2c0   : > { %2976 = vmatpush2.bf16.msra.mxu1 %v2108_v31  ;;  %2988 = vmatprep.subr.bf16.mxu0 %v1147_v32  ;;  %v639_v31 = vld [vmem:[%s6592_s30 + $0x118] sm:$0xff]  ;;  %v1126_v32 = vunpack.c.l.s8.bf16 %v610_v15  ;;  %v1123_v51 = vunpack.c.h.s8.bf16 %v607_v59  ;;  %v1119_v63 = vunpack.c.l.s8.bf16 %v607_v59 }
 0x2c1   : > { %3031 = vmatprep.subr.bf16.mxu1 %v1211_v27  ;;  %v1190_v27 = vunpack.c.l.s8.bf16 %v642_v16  ;;  %v1187_v3 = vunpack.c.h.s8.bf16 %v639_v31  ;;  %v1183_v0 = vunpack.c.l.s8.bf16 %v639_v31 }
 0x2c2   : > { %2935 = vmatmul.mubr.bf16.vlgmr.msra.gmra.mxu0 %v7127_v6 }
 0x2c3   : > { %2978 = vmatmul.mubr.bf16.vlgmr.msra.gmra.mxu1 %v7131_v29  ;;  %2989 = vmatpush1.bf16.msra.mxu0 %v1146_v36  ;;  %v606_v36 = vld [vmem:[%s6592_s30 + $0x10] sm:$0xff] }
 0x2c4   : > { %3032 = vmatpush1.bf16.msra.mxu1 %v1210_v60  ;;  %2990 = vmatprep.subr.bf16.mxu0 %v1143_v61  ;;  %v638_v60 = vld [vmem:[%s6592_s30 + $0x110] sm:$0xff]  ;;  %v1122_v61 = vunpack.c.h.s8.bf16 %v606_v36 }
 0x2c5   : > { %3033 = vmatprep.subr.bf16.mxu1 %v1207_v62  ;;  %3020 = vmatprep.mubr.bf16.mxu0 %v6645_v39  ;;  %v1131_v39 = vunpack.c.h.s8.bf16 %v611_v50  ;;  %v1186_v62 = vunpack.c.h.s8.bf16 %v638_v60 }
 0x2c6   : > { %3063 = vmatprep.mubr.bf16.mxu1 %v6651_v42  ;;  %v1195_v42 = vunpack.c.h.s8.bf16 %v643_v12 }
 0x2c7   : > { %2991 = vmatpush1.bf16.msra.mxu0 %v1142_v21  ;;  %v635_v21 = vld [vmem:[%s6592_s30 + $0xf8] sm:$0xff] }
 0x2c8   : > { %3034 = vmatpush1.bf16.msra.mxu1 %v1206_v24  ;;  %2992 = vmatprep.subr.bf16.mxu0 %v1139_v25  ;;  %v667_v24 = vld [vmem:[%s6592_s30 + $0x1f8] sm:$0xff]  ;;  %v1118_v25 = vunpack.c.l.s8.bf16 %v606_v36  ;;  %v1179_v1 = vunpack.c.h.s8.bf16 %v635_v21  ;;  %v1175_v50 = vunpack.c.l.s8.bf16 %v635_v21 }
 0x2c9   : > { %3035 = vmatprep.subr.bf16.mxu1 %v1203_v26  ;;  %v1182_v26 = vunpack.c.l.s8.bf16 %v638_v60  ;;  %v1243_v2 = vunpack.c.h.s8.bf16 %v667_v24  ;;  %v1239_v12 = vunpack.c.l.s8.bf16 %v667_v24 }
 0x2cb   : > { %2993 = vmatpush1.bf16.msra.mxu0 %v1138_v9  ;;  %v634_v9 = vld [vmem:[%s6592_s30 + $0xf0] sm:$0xff] }
 0x2cc   : > { %3036 = vmatpush1.bf16.msra.mxu1 %v1202_v10  ;;  %2994 = vmatprep.subr.bf16.mxu0 %v1135_v11  ;;  %v666_v10 = vld [vmem:[%s6592_s30 + $0x1f0] sm:$0xff]  ;;  %v1178_v11 = vunpack.c.h.s8.bf16 %v634_v9 }
 0x2cd   : > { %3037 = vmatprep.subr.bf16.mxu1 %v1199_v41  ;;  %v1242_v41 = vunpack.c.h.s8.bf16 %v666_v10 }
 0x2cf   : > { %2995 = vmatpush1.bf16.msra.mxu0 %v1134_v13  ;;  %v631_v13 = vld [vmem:[%s6592_s30 + $0xd8] sm:$0xff] }
 0x2d0   : > { %3038 = vmatpush1.bf16.msra.mxu1 %v1198_v14  ;;  %2996 = vmatprep.subr.bf16.mxu0 %v1131_v39  ;;  %v663_v14 = vld [vmem:[%s6592_s30 + $0x1d8] sm:$0xff]  ;;  %v1174_v39 = vunpack.c.l.s8.bf16 %v634_v9  ;;  %v1171_v15 = vunpack.c.h.s8.bf16 %v631_v13  ;;  %v1167_v59 = vunpack.c.l.s8.bf16 %v631_v13 }
 0x2d1   : > { %3039 = vmatprep.subr.bf16.mxu1 %v1195_v42  ;;  %v1238_v42 = vunpack.c.l.s8.bf16 %v666_v10  ;;  %v1235_v16 = vunpack.c.h.s8.bf16 %v663_v14  ;;  %v1231_v31 = vunpack.c.l.s8.bf16 %v663_v14 }
 0x2d3   : > { %2997 = vmatpush1.bf16.msra.mxu0 %v1130_v17  ;;  %v630_v17 = vld [vmem:[%s6592_s30 + $0xd0] sm:$0xff] }
 0x2d4   : > { %3040 = vmatpush1.bf16.msra.mxu1 %v1194_v18  ;;  %2998 = vmatprep.subr.bf16.mxu0 %v1127_v19  ;;  %v662_v18 = vld [vmem:[%s6592_s30 + $0x1d0] sm:$0xff]  ;;  %v1170_v19 = vunpack.c.h.s8.bf16 %v630_v17 }
 0x2d5   : > { %3041 = vmatprep.subr.bf16.mxu1 %v1191_v20  ;;  %v1234_v20 = vunpack.c.h.s8.bf16 %v662_v18 }
 0x2d7   : > { %2999 = vmatpush1.bf16.msra.mxu0 %v1126_v32  ;;  %v627_v32 = vld [vmem:[%s6592_s30 + $0xb8] sm:$0xff] }
 0x2d8   : > { %3042 = vmatpush1.bf16.msra.mxu1 %v1190_v27  ;;  %3000 = vmatprep.subr.bf16.mxu0 %v1123_v51  ;;  %v659_v27 = vld [vmem:[%s6592_s30 + $0x1b8] sm:$0xff]  ;;  %v1166_v51 = vunpack.c.l.s8.bf16 %v630_v17  ;;  %v1163_v36 = vunpack.c.h.s8.bf16 %v627_v32  ;;  %v1159_v21 = vunpack.c.l.s8.bf16 %v627_v32 }
 0x2d9   : > { %3043 = vmatprep.subr.bf16.mxu1 %v1187_v3  ;;  %v1230_v3 = vunpack.c.l.s8.bf16 %v662_v18  ;;  %v1227_v60 = vunpack.c.h.s8.bf16 %v659_v27  ;;  %v1223_v24 = vunpack.c.l.s8.bf16 %v659_v27 }
 0x2db   : > { %3001 = vmatpush1.bf16.msra.mxu0 %v1122_v61  ;;  %v626_v61 = vld [vmem:[%s6592_s30 + $0xb0] sm:$0xff] }
 0x2dc   : > { %3044 = vmatpush1.bf16.msra.mxu1 %v1186_v62  ;;  %3002 = vmatprep.subr.bf16.mxu0 %v1119_v63  ;;  %v658_v62 = vld [vmem:[%s6592_s30 + $0x1b0] sm:$0xff]  ;;  %v1162_v63 = vunpack.c.h.s8.bf16 %v626_v61 }
 0x2dd   : > { %3045 = vmatprep.subr.bf16.mxu1 %v1183_v0  ;;  %v1226_v0 = vunpack.c.h.s8.bf16 %v658_v62 }
 0x2df   : > { %3003 = vmatpush1.bf16.msra.mxu0 %v1118_v25  ;;  %v623_v25 = vld [vmem:[%s6592_s30 + $0x98] sm:$0xff] }
 0x2e0   : > { %3046 = vmatpush1.bf16.msra.mxu1 %v1182_v26  ;;  %3004 = vmatprep.subr.bf16.mxu0 %v1179_v1  ;;  %v655_v26 = vld [vmem:[%s6592_s30 + $0x198] sm:$0xff]  ;;  %v1158_v1 = vunpack.c.l.s8.bf16 %v626_v61  ;;  %v1155_v9 = vunpack.c.h.s8.bf16 %v623_v25  ;;  %v1151_v13 = vunpack.c.l.s8.bf16 %v623_v25 }
 0x2e1   : > { %3047 = vmatprep.subr.bf16.mxu1 %v1243_v2  ;;  %v1222_v2 = vunpack.c.l.s8.bf16 %v658_v62  ;;  %v1219_v10 = vunpack.c.h.s8.bf16 %v655_v26  ;;  %v1215_v14 = vunpack.c.l.s8.bf16 %v655_v26  ;;  %v675_v25 = vld [vmem:[%s6592_s30 + $0x238] sm:$0xff] }
 0x2e2   : > { %v707_v26 = vld [vmem:[%s6592_s30 + $0x338] sm:$0xff] }
 0x2e3   : > { %3005 = vmatpush2.bf16.msra.mxu0 %v1178_v11  ;;  %v622_v11 = vld [vmem:[%s6592_s30 + $0x90] sm:$0xff] }
 0x2e4   : > { %3048 = vmatpush2.bf16.msra.mxu1 %v1242_v41  ;;  %3006 = vmatprep.subr.bf16.mxu0 %v1175_v50  ;;  %v654_v41 = vld [vmem:[%s6592_s30 + $0x190] sm:$0xff]  ;;  %v1154_v50 = vunpack.c.h.s8.bf16 %v622_v11 }
 0x2e5   : > { %3049 = vmatprep.subr.bf16.mxu1 %v1239_v12  ;;  %v1218_v12 = vunpack.c.h.s8.bf16 %v654_v41 }
 0x2e7   : > { %3007 = vmatpush2.bf16.msra.mxu0 %v1174_v39  ;;  %v683_v39 = vld [vmem:[%s6592_s30 + $0x278] sm:$0xff] }
 0x2e8   : > { %3050 = vmatpush2.bf16.msra.mxu1 %v1238_v42  ;;  %3008 = vmatprep.subr.bf16.mxu0 %v1171_v15  ;;  %v715_v42 = vld [vmem:[%s6592_s30 + $0x378] sm:$0xff]  ;;  %v1150_v15 = vunpack.c.l.s8.bf16 %v622_v11  ;;  %v1275_v17 = vunpack.c.h.s8.bf16 %v683_v39  ;;  %v1271_v32 = vunpack.c.l.s8.bf16 %v683_v39 }
 0x2e9   : > { %3051 = vmatprep.subr.bf16.mxu1 %v1235_v16  ;;  %v1214_v16 = vunpack.c.l.s8.bf16 %v654_v41  ;;  %v1339_v18 = vunpack.c.h.s8.bf16 %v715_v42  ;;  %v1335_v27 = vunpack.c.l.s8.bf16 %v715_v42 }
 0x2eb   : > { %3009 = vmatpush2.bf16.msra.mxu0 %v1170_v19  ;;  %v682_v19 = vld [vmem:[%s6592_s30 + $0x270] sm:$0xff] }
 0x2ec   : > { %3052 = vmatpush2.bf16.msra.mxu1 %v1234_v20  ;;  %3010 = vmatprep.subr.bf16.mxu0 %v1167_v59  ;;  %v714_v20 = vld [vmem:[%s6592_s30 + $0x370] sm:$0xff]  ;;  %v1274_v59 = vunpack.c.h.s8.bf16 %v682_v19 }
 0x2ed   : > { %3053 = vmatprep.subr.bf16.mxu1 %v1231_v31  ;;  %v1338_v31 = vunpack.c.h.s8.bf16 %v714_v20 }
 0x2ef   : > { %3011 = vmatpush2.bf16.msra.mxu0 %v1166_v51  ;;  %v679_v51 = vld [vmem:[%s6592_s30 + $0x258] sm:$0xff] }
 0x2f0   : > { %3054 = vmatpush2.bf16.msra.mxu1 %v1230_v3  ;;  %3012 = vmatprep.subr.bf16.mxu0 %v1163_v36  ;;  %v711_v3 = vld [vmem:[%s6592_s30 + $0x358] sm:$0xff]  ;;  %v1270_v36 = vunpack.c.l.s8.bf16 %v682_v19  ;;  %v1267_v61 = vunpack.c.h.s8.bf16 %v679_v51 }
 0x2f1   : > { %3055 = vmatprep.subr.bf16.mxu1 %v1227_v60  ;;  %v1334_v60 = vunpack.c.l.s8.bf16 %v714_v20  ;;  %v1331_v62 = vunpack.c.h.s8.bf16 %v711_v3 }
 0x2f3   : > { %3013 = vmatpush2.bf16.msra.mxu0 %v1162_v63  ;;  %v678_v63 = vld [vmem:[%s6592_s30 + $0x250] sm:$0xff] }
 0x2f4   : > { %3056 = vmatpush2.bf16.msra.mxu1 %v1226_v0  ;;  %3014 = vmatprep.subr.bf16.mxu0 %v1159_v21  ;;  %v710_v0 = vld [vmem:[%s6592_s30 + $0x350] sm:$0xff]  ;;  %v1263_v21 = vunpack.c.l.s8.bf16 %v679_v51 }
 0x2f5   : > { %3057 = vmatprep.subr.bf16.mxu1 %v1223_v24  ;;  %v1327_v24 = vunpack.c.l.s8.bf16 %v711_v3 }
 0x2f7   : > { %3015 = vmatpush2.bf16.msra.mxu0 %v1158_v1  ;;  %v1262_v1 = vunpack.c.l.s8.bf16 %v678_v63 }
 0x2f8   : > { %3058 = vmatpush2.bf16.msra.mxu1 %v1222_v2  ;;  %3016 = vmatprep.subr.bf16.mxu0 %v1155_v9  ;;  %v1326_v2 = vunpack.c.l.s8.bf16 %v710_v0  ;;  %v674_v9 = vld [vmem:[%s6592_s30 + $0x230] sm:$0xff] }
 0x2f9   : > { %3059 = vmatprep.subr.bf16.mxu1 %v1219_v10  ;;  %v706_v10 = vld [vmem:[%s6592_s30 + $0x330] sm:$0xff]  ;;  %v1258_v11 = vunpack.c.h.s8.bf16 %v674_v9  ;;  %v1254_v39 = vunpack.c.l.s8.bf16 %v674_v9 }
 0x2fa   : > { %v1322_v41 = vunpack.c.h.s8.bf16 %v706_v10  ;;  %v1318_v42 = vunpack.c.l.s8.bf16 %v706_v10 }
 0x2fb   : > { %3017 = vmatpush2.bf16.msra.mxu0 %v1154_v50  ;;  %v1255_v50 = vunpack.c.l.s8.bf16 %v675_v25 }
 0x2fc   : > { %3060 = vmatpush2.bf16.msra.mxu1 %v1218_v12  ;;  %3018 = vmatprep.subr.bf16.mxu0 %v1151_v13  ;;  %v1319_v12 = vunpack.c.l.s8.bf16 %v707_v26  ;;  %v671_v13 = vld [vmem:[%s6592_s30 + $0x218] sm:$0xff] }
 0x2fd   : > { %3061 = vmatprep.subr.bf16.mxu1 %v1215_v14  ;;  %v703_v14 = vld [vmem:[%s6592_s30 + $0x318] sm:$0xff] }
 0x2ff   : > { %3019 = vmatpush2.bf16.msra.mxu0 %v1150_v15  ;;  %v1251_v15 = vunpack.c.h.s8.bf16 %v671_v13 }
 0x300   : > { %3062 = vmatpush2.bf16.msra.mxu1 %v1214_v16  ;;  %3074 = vmatprep.subr.bf16.mxu0 %v1275_v17  ;;  %v1315_v16 = vunpack.c.h.s8.bf16 %v703_v14  ;;  %v670_v17 = vld [vmem:[%s6592_s30 + $0x210] sm:$0xff] }
 0x301   : > { %3117 = vmatprep.subr.bf16.mxu1 %v1339_v18  ;;  %v702_v18 = vld [vmem:[%s6592_s30 + $0x310] sm:$0xff]  ;;  %v1250_v19 = vunpack.c.h.s8.bf16 %v670_v17  ;;  %v1246_v51 = vunpack.c.l.s8.bf16 %v670_v17 }
 0x302   : > { %3021 = vmatmul.mubr.bf16.vlgmr.msra.gmra.mxu0 %v6682_v52  ;;  %v1266_v52 = vunpack.c.h.s8.bf16 %v678_v63  ;;  %v1314_v20 = vunpack.c.h.s8.bf16 %v702_v18  ;;  %v1310_v3 = vunpack.c.l.s8.bf16 %v702_v18  ;;  %v7189_v63 = vpop.f32.mrf.mxu0 }
 0x303   : > { %3064 = vmatmul.mubr.bf16.vlgmr.msra.gmra.mxu1 %v6686_v53  ;;  %3075 = vmatpush1.bf16.msra.mxu0 %v1274_v59  ;;  %v1330_v53 = vunpack.c.h.s8.bf16 %v710_v0  ;;  %v1247_v59 = vunpack.c.l.s8.bf16 %v671_v13 }
 0x304   : > { %3118 = vmatpush1.bf16.msra.mxu1 %v1338_v31  ;;  %3076 = vmatprep.subr.bf16.mxu0 %v1271_v32  ;;  %v1311_v31 = vunpack.c.l.s8.bf16 %v703_v14  ;;  %v699_v32 = vld [vmem:[%s6592_s30 + $0x2f8] sm:$0xff] }
 0x305   : > { %3119 = vmatprep.subr.bf16.mxu1 %v1335_v27  ;;  %3106 = vmatprep.mubr.bf16.mxu0 %v6701_v33  ;;  %v1259_v33 = vunpack.c.h.s8.bf16 %v675_v25  ;;  %v731_v27 = vld [vmem:[%s6592_s30 + $0x3f8] sm:$0xff] }
 0x306   : > { %3149 = vmatprep.mubr.bf16.mxu1 %v6705_v34  ;;  %v1323_v34 = vunpack.c.h.s8.bf16 %v707_v26  ;;  %v695_v25 = vld [vmem:[%s6592_s30 + $0x2d8] sm:$0xff] }
 0x307   : > { %3077 = vmatpush1.bf16.msra.mxu0 %v1270_v36  ;;  %v1307_v36 = vunpack.c.h.s8.bf16 %v699_v32  ;;  %v727_v26 = vld [vmem:[%s6592_s30 + $0x3d8] sm:$0xff]  ;;  %v1299_v9 = vunpack.c.h.s8.bf16 %v695_v25 }
 0x308   : > { %3120 = vmatpush1.bf16.msra.mxu1 %v1334_v60  ;;  %3078 = vmatprep.subr.bf16.mxu0 %v1267_v61  ;;  %v1371_v60 = vunpack.c.h.s8.bf16 %v731_v27  ;;  %v698_v61 = vld [vmem:[%s6592_s30 + $0x2f0] sm:$0xff]  ;;  %v1363_v10 = vunpack.c.h.s8.bf16 %v727_v26 }
 0x309   : > { %3121 = vmatprep.subr.bf16.mxu1 %v1331_v62  ;;  %v730_v62 = vld [vmem:[%s6592_s30 + $0x3f0] sm:$0xff]  ;;  %v1306_v0 = vunpack.c.h.s8.bf16 %v698_v61 }
 0x30b   : > { %3079 = vmatpush1.bf16.msra.mxu0 %v1266_v52  ;;  %v1370_v52 = vunpack.c.h.s8.bf16 %v730_v62 }
 0x30c   : > { %3122 = vmatpush1.bf16.msra.mxu1 %v1330_v53  ;;  %3080 = vmatprep.subr.bf16.mxu0 %v1263_v21  ;;  %v7191_v53 = vpop.f32.mrf.mxu1  ;;  %v1303_v21 = vunpack.c.l.s8.bf16 %v699_v32  ;;  %v690_v32 = vld [vmem:[%s6592_s30 + $0x2b0] sm:$0xff] }
 0x30d   : > { %3123 = vmatprep.subr.bf16.mxu1 %v1327_v24  ;;  %v1367_v24 = vunpack.c.l.s8.bf16 %v731_v27  ;;  %v722_v27 = vld [vmem:[%s6592_s30 + $0x3b0] sm:$0xff] }
 0x30f   : > { %3081 = vmatpush1.bf16.msra.mxu0 %v1262_v1  ;;  %v7195_v1 = vpop.f32.mrf.mxu0 }
 0x310   : > { %3124 = vmatpush1.bf16.msra.mxu1 %v1326_v2  ;;  %3082 = vmatprep.subr.bf16.mxu0 %v1259_v33  ;;  %v1302_v2 = vunpack.c.l.s8.bf16 %v698_v61  ;;  %v1366_v33 = vunpack.c.l.s8.bf16 %v730_v62 }
 0x311   : > { %3125 = vmatprep.subr.bf16.mxu1 %v1323_v34  ;;  %v7197_v34 = vpop.f32.mrf.mxu1 }
 0x313   : > { %3083 = vmatpush1.bf16.msra.mxu0 %v1258_v11  ;;  %v694_v11 = vld [vmem:[%s6592_s30 + $0x2d0] sm:$0xff]  ;;  %v7203_v14 = vpop.f32.mrf.mxu1 }
 0x314   : > { %3126 = vmatpush1.bf16.msra.mxu1 %v1322_v41  ;;  %3084 = vmatprep.subr.bf16.mxu0 %v1255_v50  ;;  %v726_v41 = vld [vmem:[%s6592_s30 + $0x3d0] sm:$0xff]  ;;  %v7201_v50 = vpop.f32.mrf.mxu0  ;;  %v1294_v18 = vunpack.c.l.s8.bf16 %v694_v11 }
 0x315   : > { %3127 = vmatprep.subr.bf16.mxu1 %v1319_v12  ;;  %v1298_v12 = vunpack.c.h.s8.bf16 %v694_v11  ;;  %v1362_v13 = vunpack.c.h.s8.bf16 %v726_v41 }
 0x316   : > { %v7207_v17 = vpop.f32.mrf.mxu0 }
 0x317   : > { %3085 = vmatpush1.bf16.msra.mxu0 %v1254_v39  ;;  %v1295_v39 = vunpack.c.l.s8.bf16 %v695_v25  ;;  %v1286_v25 = vunpack.c.l.s8.bf16 %v690_v32 }
 0x318   : > { %3128 = vmatpush1.bf16.msra.mxu1 %v1318_v42  ;;  %3086 = vmatprep.subr.bf16.mxu0 %v1251_v15  ;;  %v1359_v42 = vunpack.c.l.s8.bf16 %v727_v26  ;;  %v691_v15 = vld [vmem:[%s6592_s30 + $0x2b8] sm:$0xff]  ;;  %v1350_v26 = vunpack.c.l.s8.bf16 %v722_v27 }
 0x319   : > { %3129 = vmatprep.subr.bf16.mxu1 %v1315_v16  ;;  %v723_v16 = vld [vmem:[%s6592_s30 + $0x3b8] sm:$0xff]  ;;  %v1287_v61 = vunpack.c.l.s8.bf16 %v691_v15 }
 0x31a   : > { %v1351_v62 = vunpack.c.l.s8.bf16 %v723_v16 }
 0x31b   : > { %3087 = vmatpush1.bf16.msra.mxu0 %v1250_v19  ;;  %v1358_v19 = vunpack.c.l.s8.bf16 %v726_v41 }
 0x31c   : > { %3130 = vmatpush1.bf16.msra.mxu1 %v1314_v20  ;;  %3088 = vmatprep.subr.bf16.mxu0 %v1247_v59  ;;  %v7209_v20 = vpop.f32.mrf.mxu1  ;;  %v1291_v59 = vunpack.c.h.s8.bf16 %v691_v15 }
 0x31d   : > { %3131 = vmatprep.subr.bf16.mxu1 %v1311_v31  ;;  %v1355_v31 = vunpack.c.h.s8.bf16 %v723_v16  ;;  %v747_v16 = vld [vmem:[%s6592_s30 + $0x478] sm:$0xff] }
 0x31f   : > { %3089 = vmatpush1.bf16.msra.mxu0 %v1246_v51  ;;  %v7213_v51 = vpop.f32.mrf.mxu0 }
 0x320   : > { %3132 = vmatpush1.bf16.msra.mxu1 %v1310_v3  ;;  %3090 = vmatprep.subr.bf16.mxu0 %v1307_v36  ;;  %v7215_v3 = vpop.f32.mrf.mxu1  ;;  %v1290_v36 = vunpack.c.h.s8.bf16 %v690_v32 }
 0x321   : > { %3133 = vmatprep.subr.bf16.mxu1 %v1371_v60  ;;  %v1354_v60 = vunpack.c.h.s8.bf16 %v722_v27 }
 0x323   : > { %3091 = vmatpush2.bf16.msra.mxu0 %v1306_v0  ;;  %v7217_v0 = vpop.f32.mrf.mxu0 }
 0x324   : > { %3134 = vmatpush2.bf16.msra.mxu1 %v1370_v52  ;;  %3092 = vmatprep.subr.bf16.mxu0 %v1303_v21  ;;  %v687_v52 = vld [vmem:[%s6592_s30 + $0x298] sm:$0xff] }
 0x325   : > { %3135 = vmatprep.subr.bf16.mxu1 %v1367_v24  ;;  %v719_v21 = vld [vmem:[%s6592_s30 + $0x398] sm:$0xff]  ;;  %v7221_v24 = vpop.f32.mrf.mxu1  ;;  %v7225_v11 = vpop.f32.mrf.mxu0 }
 0x327   : > { %3093 = vmatpush2.bf16.msra.mxu0 %v1302_v2  ;;  %v1283_v2 = vunpack.c.h.s8.bf16 %v687_v52  ;;  %v7227_v41 = vpop.f32.mrf.mxu1  ;;  %v7229_v15 = vpop.f32.mrf.mxu0 }
 0x328   : > { %3136 = vmatpush2.bf16.msra.mxu1 %v1366_v33  ;;  %3094 = vmatprep.subr.bf16.mxu0 %v1299_v9  ;;  %v1347_v33 = vunpack.c.h.s8.bf16 %v719_v21  ;;  %v686_v9 = vld [vmem:[%s6592_s30 + $0x290] sm:$0xff] }
 0x329   : > { %3137 = vmatprep.subr.bf16.mxu1 %v1363_v10  ;;  %v718_v10 = vld [vmem:[%s6592_s30 + $0x390] sm:$0xff] }
 0x32a   : > { %v1342_v32 = vunpack.c.l.s8.bf16 %v718_v10 }
 0x32b   : > { %3095 = vmatpush2.bf16.msra.mxu0 %v1298_v12  ;;  %v1282_v12 = vunpack.c.h.s8.bf16 %v686_v9 }
 0x32c   : > { %3138 = vmatpush2.bf16.msra.mxu1 %v1362_v13  ;;  %3096 = vmatprep.subr.bf16.mxu0 %v1295_v39  ;;  %v1346_v13 = vunpack.c.h.s8.bf16 %v718_v10  ;;  %v1279_v39 = vunpack.c.l.s8.bf16 %v687_v52  ;;  %v775_v10 = vld [vmem:[%s6592_s30 + $0x558] sm:$0xff] }
 0x32d   : > { %3139 = vmatprep.subr.bf16.mxu1 %v1359_v42  ;;  %v1343_v42 = vunpack.c.l.s8.bf16 %v719_v21 }
 0x32f   : > { %3097 = vmatpush2.bf16.msra.mxu0 %v1294_v18  ;;  %v779_v18 = vld [vmem:[%s6592_s30 + $0x578] sm:$0xff] }
 0x330   : > { %3140 = vmatpush2.bf16.msra.mxu1 %v1358_v19  ;;  %3098 = vmatprep.subr.bf16.mxu0 %v1291_v59  ;;  %v7233_v19 = vpop.f32.mrf.mxu1  ;;  %v7235_v59 = vpop.f32.mrf.mxu0 }
 0x331   : > { %3141 = vmatprep.subr.bf16.mxu1 %v1355_v31  ;;  %v1278_v31 = vunpack.c.l.s8.bf16 %v686_v9  ;;  %v743_v9 = vld [vmem:[%s6592_s30 + $0x458] sm:$0xff] }
 0x332   : > { %v7237_v27 = vpop.f32.mrf.mxu1  ;;  %v7241_v52 = vpop.f32.mrf.mxu0 }
 0x333   : > { %3099 = vmatpush2.bf16.msra.mxu0 %v1290_v36  ;;  %v1403_v36 = vunpack.c.h.s8.bf16 %v747_v16 }
 0x334   : > { %3142 = vmatpush2.bf16.msra.mxu1 %v1354_v60  ;;  %3100 = vmatprep.subr.bf16.mxu0 %v1287_v61  ;;  %v1467_v60 = vunpack.c.h.s8.bf16 %v779_v18  ;;  %v746_v61 = vld [vmem:[%s6592_s30 + $0x470] sm:$0xff] }
 0x335   : > { %3143 = vmatprep.subr.bf16.mxu1 %v1351_v62  ;;  %v778_v62 = vld [vmem:[%s6592_s30 + $0x570] sm:$0xff]  ;;  %v1402_v21 = vunpack.c.h.s8.bf16 %v746_v61 }
 0x337   : > { %3101 = vmatpush2.bf16.msra.mxu0 %v1286_v25  ;;  %v1466_v25 = vunpack.c.h.s8.bf16 %v778_v62 }
 0x338   : > { %3144 = vmatpush2.bf16.msra.mxu1 %v1350_v26  ;;  %3102 = vmatprep.subr.bf16.mxu0 %v1283_v2  ;;  %v7243_v26 = vpop.f32.mrf.mxu1  ;;  %v1399_v2 = vunpack.c.l.s8.bf16 %v747_v16  ;;  %v1395_v16 = vunpack.c.h.s8.bf16 %v743_v9 }
 0x339   : > { %3145 = vmatprep.subr.bf16.mxu1 %v1347_v33  ;;  %v1463_v33 = vunpack.c.l.s8.bf16 %v779_v18  ;;  %v742_v18 = vld [vmem:[%s6592_s30 + $0x450] sm:$0xff] }
 0x33b   : > { %3103 = vmatpush2.bf16.msra.mxu0 %v1282_v12  ;;  %v7249_v12 = vpop.f32.mrf.mxu0 }
 0x33c   : > { %3146 = vmatpush2.bf16.msra.mxu1 %v1346_v13  ;;  %3104 = vmatprep.subr.bf16.mxu0 %v1279_v39  ;;  %v1398_v13 = vunpack.c.l.s8.bf16 %v746_v61  ;;  %v1462_v39 = vunpack.c.l.s8.bf16 %v778_v62  ;;  %v1391_v61 = vunpack.c.l.s8.bf16 %v743_v9  ;;  %v1455_v62 = vunpack.c.l.s8.bf16 %v775_v10 }
 0x33d   : > { %3147 = vmatprep.subr.bf16.mxu1 %v1343_v42  ;;  %v7251_v42 = vpop.f32.mrf.mxu1 }
 0x33f   : > { %3105 = vmatpush2.bf16.msra.mxu0 %v1278_v31  ;;  %v1459_v31 = vunpack.c.h.s8.bf16 %v775_v10 }
 0x340   : > { %3148 = vmatpush2.bf16.msra.mxu1 %v1342_v32  ;;  %3160 = vmatprep.subr.bf16.mxu0 %v1403_v36  ;;  %v774_v32 = vld [vmem:[%s6592_s30 + $0x550] sm:$0xff] }
 0x341   : > { %3203 = vmatprep.subr.bf16.mxu1 %v1467_v60  ;;  %v1458_v36 = vunpack.c.h.s8.bf16 %v774_v32  ;;  %v7259_v60 = vpop.f32.mrf.mxu1 }
 0x342   : > { %3107 = vmatmul.mubr.bf16.vlgmr.msra.gmra.mxu0 %v6746_v38  ;;  %v7257_v38 = vpop.f32.mrf.mxu0 }
 0x343   : > { %3150 = vmatmul.mubr.bf16.vlgmr.msra.gmra.mxu1 %v6750_v40  ;;  %3161 = vmatpush1.bf16.msra.mxu0 %v1402_v21  ;;  %v1394_v40 = vunpack.c.h.s8.bf16 %v742_v18 }
 0x344   : > { %3204 = vmatpush1.bf16.msra.mxu1 %v1466_v25  ;;  %3162 = vmatprep.subr.bf16.mxu0 %v1399_v2  ;;  %v7261_v21 = vpop.f32.mrf.mxu0  ;;  %v739_v25 = vld [vmem:[%s6592_s30 + $0x438] sm:$0xff]  ;;  %v7265_v2 = vpop.f32.mrf.mxu1 }
 0x345   : > { %3205 = vmatprep.subr.bf16.mxu1 %v1463_v33  ;;  %3192 = vmatprep.mubr.bf16.mxu0 %v6765_v55  ;;  %v771_v55 = vld [vmem:[%s6592_s30 + $0x538] sm:$0xff]  ;;  %v1454_v33 = vunpack.c.l.s8.bf16 %v774_v32 }
 0x346   : > { %3235 = vmatprep.mubr.bf16.mxu1 %v6769_v56  ;;  %v1390_v56 = vunpack.c.l.s8.bf16 %v742_v18  ;;  %v7269_v9 = vpop.f32.mrf.mxu0  ;;  %v7271_v10 = vpop.f32.mrf.mxu1  ;;  %v1383_v18 = vunpack.c.l.s8.bf16 %v739_v25  ;;  %v1447_v32 = vunpack.c.l.s8.bf16 %v771_v55 }
 0x347   : > { %3163 = vmatpush1.bf16.msra.mxu0 %v1398_v13  ;;  %v1387_v13 = vunpack.c.h.s8.bf16 %v739_v25 }
 0x348   : > { %3206 = vmatpush1.bf16.msra.mxu1 %v1462_v39  ;;  %3164 = vmatprep.subr.bf16.mxu0 %v1395_v16  ;;  %v1451_v39 = vunpack.c.h.s8.bf16 %v771_v55  ;;  %v738_v16 = vld [vmem:[%s6592_s30 + $0x430] sm:$0xff] }
 0x349   : > { %3207 = vmatprep.subr.bf16.mxu1 %v1459_v31  ;;  %v770_v31 = vld [vmem:[%s6592_s30 + $0x530] sm:$0xff]  ;;  %v1386_v29 = vunpack.c.h.s8.bf16 %v738_v16  ;;  %v1382_v37 = vunpack.c.l.s8.bf16 %v738_v16 }
 0x34a   : > { %v1450_v6 = vunpack.c.h.s8.bf16 %v770_v31  ;;  %v1446_v54 = vunpack.c.l.s8.bf16 %v770_v31 }
 0x34b   : > { %3165 = vmatpush1.bf16.msra.mxu0 %v1394_v40  ;;  %v7273_v40 = vpop.f32.mrf.mxu0 }
 0x34c   : > { %3208 = vmatpush1.bf16.msra.mxu1 %v1458_v36  ;;  %3166 = vmatprep.subr.bf16.mxu0 %v1391_v61  ;;  %v735_v36 = vld [vmem:[%s6592_s30 + $0x418] sm:$0xff] }
 0x34d   : > { %3209 = vmatprep.subr.bf16.mxu1 %v1455_v62  ;;  %v767_v61 = vld [vmem:[%s6592_s30 + $0x518] sm:$0xff]  ;;  %v7277_v62 = vpop.f32.mrf.mxu1  ;;  %v7281_v25 = vpop.f32.mrf.mxu0  ;;  %v1375_v31 = vunpack.c.l.s8.bf16 %v735_v36 }
 0x34f   : > { %3167 = vmatpush1.bf16.msra.mxu0 %v1390_v56  ;;  %v1379_v56 = vunpack.c.h.s8.bf16 %v735_v36  ;;  %v7283_v55 = vpop.f32.mrf.mxu1  ;;  %v7285_v23 = vpop.f32.mrf.mxu0  ;;  %v2378_v36 = vadd.f32 %v7191_v53, %v7189_v63  ;;  %v2382_v63 = vadd.f32 %v7203_v14, %v7201_v50 }
 0x350   : > { %3210 = vmatpush1.bf16.msra.mxu1 %v1454_v33  ;;  %3168 = vmatprep.subr.bf16.mxu0 %v1387_v13  ;;  %v1443_v33 = vunpack.c.h.s8.bf16 %v767_v61  ;;  %v734_v13 = vld [vmem:[%s6592_s30 + $0x410] sm:$0xff] }
 0x351   : > { %3211 = vmatprep.subr.bf16.mxu1 %v1451_v39  ;;  %v766_v39 = vld [vmem:[%s6592_s30 + $0x510] sm:$0xff]  ;;  %v7287_v16 = vpop.f32.mrf.mxu1  ;;  %v7291_v8 = vpop.f32.mrf.mxu0  ;;  %v1374_v7 = vunpack.c.l.s8.bf16 %v734_v13 }
 0x352   : > { %v1438_v47 = vunpack.c.l.s8.bf16 %v766_v39 }
 0x353   : > { %3169 = vmatpush1.bf16.msra.mxu0 %v1386_v29  ;;  %v1378_v29 = vunpack.c.h.s8.bf16 %v734_v13  ;;  %v7302_v13 = vpop.f32.mrf.mxu0 }
 0x354   : > { %3212 = vmatpush1.bf16.msra.mxu1 %v1450_v6  ;;  %3170 = vmatprep.subr.bf16.mxu0 %v1383_v18  ;;  %v1442_v6 = vunpack.c.h.s8.bf16 %v766_v39  ;;  %v1439_v18 = vunpack.c.l.s8.bf16 %v767_v61  ;;  %v2380_v61 = vadd.f32 %v7197_v34, %v7195_v1  ;;  %v759_v1 = vld [vmem:[%s6592_s30 + $0x4d8] sm:$0xff] }
 0x355   : > { %3213 = vmatprep.subr.bf16.mxu1 %v1447_v32  ;;  %v763_v32 = vld [vmem:[%s6592_s30 + $0x4f8] sm:$0xff] }
 0x356   : > { %v2423_v53 = vadd.f32 %v7217_v0, %v2380_v61  ;;  %v791_v34 = vld [vmem:[%s6592_s30 + $0x5d8] sm:$0xff]  ;;  %v1427_v0 = vunpack.c.h.s8.bf16 %v759_v1 }
 0x357   : > { %3171 = vmatpush1.bf16.msra.mxu0 %v1382_v37  ;;  %v7293_v37 = vpop.f32.mrf.mxu1 }
 0x358   : > { %3214 = vmatpush1.bf16.msra.mxu1 %v1446_v54  ;;  %3172 = vmatprep.subr.bf16.mxu0 %v1379_v56  ;;  %v1435_v54 = vunpack.c.h.s8.bf16 %v763_v32  ;;  %v762_v56 = vld [vmem:[%s6592_s30 + $0x4f0] sm:$0xff] }
 0x359   : > { %3215 = vmatprep.subr.bf16.mxu1 %v1443_v33  ;;  %v2421_v33 = vadd.f32 %v7213_v51, %v2378_v36  ;;  %v1434_v39 = vunpack.c.h.s8.bf16 %v762_v56  ;;  %v2425_v51 = vadd.f32 %v7225_v11, %v2382_v63  ;;  %v758_v36 = vld [vmem:[%s6592_s30 + $0x4d0] sm:$0xff] }
 0x35b   : > { %3173 = vmatpush1.bf16.msra.mxu0 %v1378_v29  ;;  %v1498_v29 = vunpack.c.h.s8.bf16 %v794_v58 }
 0x35c   : > { %3216 = vmatpush1.bf16.msra.mxu1 %v1442_v6  ;;  %3174 = vmatprep.subr.bf16.mxu0 %v1375_v31  ;;  %v7304_v6 = vpop.f32.mrf.mxu1  ;;  %v1431_v31 = vunpack.c.l.s8.bf16 %v763_v32  ;;  %v1491_v32 = vunpack.c.h.s8.bf16 %v791_v34 }
 0x35d   : > { %3217 = vmatprep.subr.bf16.mxu1 %v1439_v18  ;;  %v1495_v18 = vunpack.c.l.s8.bf16 %v795_v22  ;;  %v1494_v22 = vunpack.c.l.s8.bf16 %v794_v58  ;;  %v2468_v58 = vadd.f32 %v7227_v41, %v2425_v51  ;;  %v755_v41 = vld [vmem:[%s6592_s30 + $0x4b8] sm:$0xff]  ;;  %v786_v51 = vld [vmem:[%s6592_s30 + $0x5b0] sm:$0xff] }
 0x35e   : > { %v7318_v14 = vpop.f32.mrf.mxu1 }
 0x35f   : > { %3175 = vmatpush1.bf16.msra.mxu0 %v1374_v7  ;;  %v2464_v7 = vadd.f32 %v7215_v3, %v2421_v33 }
 0x360   : > { %3218 = vmatpush1.bf16.msra.mxu1 %v1438_v47  ;;  %3176 = vmatprep.subr.bf16.mxu0 %v1435_v54  ;;  %v2384_v47 = vadd.f32 %v7209_v20, %v7207_v17  ;;  %v7315_v54 = vpop.f32.mrf.mxu0  ;;  %v790_v17 = vld [vmem:[%s6592_s30 + $0x5d0] sm:$0xff]  ;;  %v2466_v20 = vadd.f32 %v7221_v24, %v2423_v53  ;;  %v7326_v61 = vpop.f32.mrf.mxu1  ;;  %v1423_v24 = vunpack.c.l.s8.bf16 %v759_v1  ;;  %v1422_v1 = vunpack.c.l.s8.bf16 %v758_v36 }
 0x361   : > { %3219 = vmatprep.subr.bf16.mxu1 %v1499_v28  ;;  %v1430_v28 = vunpack.c.l.s8.bf16 %v762_v56  ;;  %v2507_v3 = vadd.f32 %v7235_v59, %v2464_v7  ;;  %v1426_v56 = vunpack.c.h.s8.bf16 %v758_v36  ;;  %v1490_v33 = vunpack.c.h.s8.bf16 %v790_v17  ;;  %v754_v7 = vld [vmem:[%s6592_s30 + $0x4b0] sm:$0xff] }
 0x362   : > { %v2427_v50 = vadd.f32 %v7229_v15, %v2384_v47  ;;  %v7324_v11 = vpop.f32.mrf.mxu0  ;;  %v2509_v15 = vadd.f32 %v7241_v52, %v2466_v20  ;;  %v1487_v59 = vunpack.c.l.s8.bf16 %v791_v34  ;;  %v787_v52 = vld [vmem:[%s6592_s30 + $0x5b8] sm:$0xff]  ;;  %v7338_v53 = vpop.f32.mrf.mxu1  ;;  %v1482_v36 = vunpack.c.h.s8.bf16 %v786_v51 }
 0x363   : > { %3177 = vmatpush2.bf16.msra.mxu0 %v1434_v39  ;;  %v1483_v34 = vunpack.c.h.s8.bf16 %v787_v52 }
 0x364   : > { %3220 = vmatpush2.bf16.msra.mxu1 %v1498_v29  ;;  %3178 = vmatprep.subr.bf16.mxu0 %v1431_v31  ;;  %v2470_v39 = vadd.f32 %v7233_v19, %v2427_v50  ;;  %v2550_v29 = vadd.f32 %v7237_v27, %v2507_v3  ;;  %v2511_v31 = vadd.f32 %v7249_v12, %v2468_v58  ;;  %v1486_v27 = vunpack.c.l.s8.bf16 %v790_v17  ;;  %v751_v58 = vld [vmem:[%s6592_s30 + $0x498] sm:$0xff] }
 0x365   : > { %3221 = vmatprep.subr.bf16.mxu1 %v1495_v18  ;;  %v7333_v18 = vpop.f32.mrf.mxu0  ;;  %v2552_v19 = vadd.f32 %v7243_v26, %v2509_v15  ;;  %v1419_v12 = vunpack.c.h.s8.bf16 %v755_v41  ;;  %v7347_v26 = vpop.f32.mrf.mxu1 }
 0x366   : > { %v2513_v63 = vadd.f32 %v7257_v38, %v2470_v39  ;;  %v2593_v47 = vadd.f32 %v7261_v21, %v2550_v29  ;;  %v1478_v39 = vunpack.c.l.s8.bf16 %v786_v51  ;;  %v750_v29 = vld [vmem:[%s6592_s30 + $0x490] sm:$0xff] }
 0x367   : > { %3179 = vmatpush2.bf16.msra.mxu0 %v1430_v28  ;;  %v2554_v28 = vadd.f32 %v7251_v42, %v2511_v31  ;;  %v2595_v38 = vadd.f32 %v7269_v9, %v2552_v19  ;;  %v1415_v42 = vunpack.c.l.s8.bf16 %v755_v41  ;;  %v1479_v9 = vunpack.c.l.s8.bf16 %v787_v52  ;;  %v782_v31 = vld [vmem:[%s6592_s30 + $0x590] sm:$0xff] }
 0x368   : > { %3222 = vmatpush2.bf16.msra.mxu1 %v1494_v22  ;;  %3180 = vmatprep.subr.bf16.mxu0 %v1427_v0  ;;  %v2768_v22 = vpop.f32.mrf.mxu0  ;;  %v2556_v50 = vadd.f32 %v7259_v60, %v2513_v63  ;;  %v2636_v21 = vadd.f32 %v7265_v2, %v2593_v47  ;;  %v783_v2 = vld [vmem:[%s6592_s30 + $0x598] sm:$0xff]  ;;  %v1410_v19 = vunpack.c.h.s8.bf16 %v750_v29  ;;  %v1474_v47 = vunpack.c.h.s8.bf16 %v782_v31 }
 0x369   : > { %3223 = vmatprep.subr.bf16.mxu1 %v1491_v32  ;;  %v2597_v0 = vadd.f32 %v7273_v40, %v2554_v28  ;;  %v1418_v32 = vunpack.c.h.s8.bf16 %v754_v7  ;;  %v2638_v60 = vadd.f32 %v7271_v10, %v2595_v38  ;;  %v2813_v40 = vpop.f32.mrf.mxu1  ;;  %v1406_v28 = vunpack.c.l.s8.bf16 %v750_v29  ;;  %v561_v29 = vld [vmem:[#allocation2 + $0x30] sm:$0xff] }
 0x36a   : > { %v2599_v17 = vadd.f32 %v7281_v25, %v2556_v50  ;;  %v2679_v20 = vadd.f32 %v7285_v23, %v2636_v21  ;;  %v2770_v3 = vpop.f32.mrf.mxu0  ;;  %v1414_v25 = vunpack.c.l.s8.bf16 %v754_v7  ;;  %v1411_v23 = vunpack.c.h.s8.bf16 %v751_v58 }
 0x36b   : > { %3181 = vmatpush2.bf16.msra.mxu0 %v1426_v56  ;;  %v2640_v15 = vadd.f32 %v7277_v62, %v2597_v0  ;;  %v2681_v56 = vadd.f32 %v7291_v8, %v2638_v60  ;;  %v2893_v10 = vpop.f32.mrf.mxu1  ;;  %v1470_v38 = vunpack.c.l.s8.bf16 %v782_v31  ;;  %v810_v0 = vld [vmem:[%s6592_s30 + $0x670] sm:$0xff] }
 0x36c   : > { %3224 = vmatpush2.bf16.msra.mxu1 %v1490_v33  ;;  %3182 = vmatprep.subr.bf16.mxu0 %v1423_v24  ;;  %v2850_v33 = vpop.f32.mrf.mxu0  ;;  %v2642_v24 = vadd.f32 %v7283_v55, %v2599_v17  ;;  %v2722_v41 = vadd.f32 %v7287_v16, %v2679_v20  ;;  %v1471_v16 = vunpack.c.l.s8.bf16 %v783_v2 }
 0x36d   : > { %3225 = vmatprep.subr.bf16.mxu1 %v1487_v59  ;;  %v1475_v59 = vunpack.c.h.s8.bf16 %v783_v2  ;;  %v2683_v62 = vadd.f32 %v7302_v13, %v2640_v15  ;;  %v2724_v52 = vadd.f32 %v7293_v37, %v2681_v56  ;;  %v807_v15 = vld [vmem:[%s6592_s30 + $0x658] sm:$0xff] }
 0x36e   : > { %v2685_v8 = vadd.f32 %v7315_v54, %v2642_v24  ;;  %v2765_v63 = vadd.f32 %v7324_v11, %v2722_v41  ;;  %v2852_v55 = vpop.f32.mrf.mxu0  ;;  %v811_v54 = vld [vmem:[%s6592_s30 + $0x678] sm:$0xff]  ;;  %v1526_v24 = vunpack.c.l.s8.bf16 %v810_v0  ;;  %v1523_v41 = vunpack.c.h.s8.bf16 %v807_v15 }
 0x36f   : > { %3183 = vmatpush2.bf16.msra.mxu0 %v1422_v1  ;;  %v2895_v1 = vpop.f32.mrf.mxu1  ;;  %v2726_v13 = vadd.f32 %v7304_v6, %v2683_v62  ;;  %v1531_v6 = vunpack.c.h.s8.bf16 %v811_v54  ;;  %v839_v56 = vld [vmem:[%s6592_s30 + $0x758] sm:$0xff] }
 0x370   : > { %3226 = vmatpush2.bf16.msra.mxu1 %v1486_v27  ;;  %3184 = vmatprep.subr.bf16.mxu0 %v1419_v12  ;;  %v1407_v27 = vunpack.c.l.s8.bf16 %v751_v58  ;;  %v2767_v12 = vadd.f32 %v7333_v18, %v2724_v52  ;;  %v2728_v37 = vadd.f32 %v7318_v14, %v2685_v8  ;;  %v2808_v11 = vadd.f32 %v7326_v61, %v2765_v63  ;;  %v2854_v51 = vpop.f32.mrf.mxu0  ;;  %v838_v8 = vld [vmem:[%s6592_s30 + $0x750] sm:$0xff] }
 0x371   : > { %3227 = vmatprep.subr.bf16.mxu1 %v1483_v34  ;;  %v843_v34 = vld [vmem:[%s6592_s30 + $0x778] sm:$0xff]  ;;  %v2769_v7 = vadd.f32 %v2768_v22, %v2726_v13  ;;  %v2897_v21 = vpop.f32.mrf.mxu1  ;;  %v1587_v62 = vunpack.c.h.s8.bf16 %v839_v56 }
 0x372   : > { %v2771_v50 = vadd.f32 %v2770_v3, %v2728_v37  ;;  %v1595_v18 = vunpack.c.h.s8.bf16 %v843_v34  ;;  %v2851_v17 = vadd.f32 %v2850_v33, %v2808_v11  ;;  %v2856_v22 = vpop.f32.mrf.mxu0  ;;  %v1527_v3 = vunpack.c.l.s8.bf16 %v811_v54  ;;  %v565_v54 = vld [vmem:[#allocation2 + $0x8] sm:$0xff] }
 0x373   : > { %3185 = vmatpush2.bf16.msra.mxu0 %v1418_v32  ;;  %v842_v32 = vld [vmem:[%s6592_s30 + $0x770] sm:$0xff]  ;;  %v2812_v14 = vadd.f32 %v7347_v26, %v2769_v7  ;;  %v2899_v20 = vpop.f32.mrf.mxu1  ;;  %v1591_v58 = vunpack.c.l.s8.bf16 %v843_v34  ;;  %v1583_v37 = vunpack.c.l.s8.bf16 %v839_v56 }
 0x374   : > { %3228 = vmatpush2.bf16.msra.mxu1 %v1482_v36  ;;  %3186 = vmatprep.subr.bf16.mxu0 %v1415_v42  ;;  %v2810_v36 = vadd.f32 %v7338_v53, %v2767_v12  ;;  %v1530_v42 = vunpack.c.h.s8.bf16 %v810_v0  ;;  %v2814_v60 = vadd.f32 %v2813_v40, %v2771_v50  ;;  %v2894_v2 = vadd.f32 %v2893_v10, %v2851_v17  ;;  %v802_v17 = vld [vmem:[%s6592_s30 + $0x630] sm:$0xff] }
 0x375   : > { %3229 = vmatprep.subr.bf16.mxu1 %v1479_v9  ;;  %v1594_v9 = vunpack.c.h.s8.bf16 %v842_v32  ;;  %v2855_v53 = vadd.f32 %v2854_v51, %v2812_v14  ;;  %v1586_v12 = vunpack.c.h.s8.bf16 %v838_v8  ;;  %v803_v51 = vld [vmem:[%s6592_s30 + $0x638] sm:$0xff]  ;;  %v1582_v0 = vunpack.c.l.s8.bf16 %v838_v8  ;;  %v834_v14 = vld [vmem:[%s6592_s30 + $0x730] sm:$0xff] }
 0x376   : > { %v2853_v61 = vadd.f32 %v2852_v55, %v2810_v36  ;;  %v2857_v33 = vadd.f32 %v2856_v22, %v2814_v60  ;;  %v562_v55 = vld [vmem:[#allocation2] sm:$0xff]  ;;  %v1514_v22 = vunpack.c.h.s8.bf16 %v802_v17  ;;  %v798_v56 = vld [vmem:[%s6592_s30 + $0x610] sm:$0xff] }
 0x377   : > { %3187 = vmatpush2.bf16.msra.mxu0 %v1414_v25  ;;  %v2898_v52 = vadd.f32 %v2897_v21, %v2855_v53 }
 0x378   : > { %3230 = vmatpush2.bf16.msra.mxu1 %v1478_v39  ;;  %3188 = vmatprep.subr.bf16.mxu0 %v1411_v23  ;;  %v2896_v39 = vadd.f32 %v2895_v1, %v2853_v61  ;;  %v1590_v23 = vunpack.c.l.s8.bf16 %v842_v32  ;;  %v1515_v32 = vunpack.c.h.s8.bf16 %v803_v51 }
 0x379   : > { %3231 = vmatprep.subr.bf16.mxu1 %v1475_v59  ;;  %v806_v59 = vld [vmem:[%s6592_s30 + $0x650] sm:$0xff] }
 0x37a   : > { %v1522_v1 = vunpack.c.h.s8.bf16 %v806_v59 }
 0x37b   : > { %3189 = vmatpush2.bf16.msra.mxu0 %v1410_v19 }
 0x37c   : > { %3232 = vmatpush2.bf16.msra.mxu1 %v1474_v47  ;;  %3190 = vmatprep.subr.bf16.mxu0 %v1407_v27 }
 0x37d   : > { %3233 = vmatprep.subr.bf16.mxu1 %v1471_v16 }
 0x37f   : > { %3191 = vmatpush2.bf16.msra.mxu0 %v1406_v28  ;;  %v835_v28 = vld [vmem:[%s6592_s30 + $0x738] sm:$0xff] }
 0x380   : > { %3234 = vmatpush2.bf16.msra.mxu1 %v1470_v38  ;;  %3246 = vmatprep.subr.bf16.mxu0 %v1531_v6  ;;  %v566_v38 = vld [vmem:[#allocation2 + $0x20] sm:$0xff]  ;;  %v1579_v36 = vunpack.c.h.s8.bf16 %v835_v28  ;;  %v1575_v60 = vunpack.c.l.s8.bf16 %v835_v28 }
 0x381   : > { %3289 = vmatprep.subr.bf16.mxu1 %v1595_v18  ;;  %v1518_v18 = vunpack.c.l.s8.bf16 %v806_v59  ;;  %v1502_v59 = vunpack.c.l.s8.bf16 %v798_v56 }
 0x382   : > { %v2936_v26 = vpop.f32.mrf.mxu0  ;;  %3193 = vmatmul.mubr.bf16.vlgmr.msra.gmra.mxu0 %v6810_v30 }
 0x383   : > { %v2979_v25 = vpop.f32.mrf.mxu1  ;;  %3236 = vmatmul.mubr.bf16.vlgmr.msra.gmra.mxu1 %v6814_v35  ;;  %v2937_v40 = vadd.f32 %v2936_v26, %v2894_v2  ;;  %3247 = vmatpush1.bf16.msra.mxu0 %v1530_v42  ;;  %v2900_v35 = vadd.f32 %v2899_v20, %v2857_v33  ;;  %v1578_v42 = vunpack.c.h.s8.bf16 %v834_v14  ;;  %v799_v20 = vld [vmem:[%s6592_s30 + $0x618] sm:$0xff]  ;;  %v1574_v2 = vunpack.c.l.s8.bf16 %v834_v14  ;;  %v830_v33 = vld [vmem:[%s6592_s30 + $0x710] sm:$0xff] }
 0x384   : > { %3290 = vmatpush1.bf16.msra.mxu1 %v1594_v9  ;;  %v2938_v10 = vpop.f32.mrf.mxu0  ;;  %3248 = vmatprep.subr.bf16.mxu0 %v1527_v3  ;;  %v1511_v9 = vunpack.c.l.s8.bf16 %v803_v51  ;;  %v831_v3 = vld [vmem:[%s6592_s30 + $0x718] sm:$0xff]  ;;  %v1507_v53 = vunpack.c.h.s8.bf16 %v799_v20  ;;  %v1506_v26 = vunpack.c.h.s8.bf16 %v798_v56 }
 0x385   : > { %v2981_v31 = vpop.f32.mrf.mxu1  ;;  %3291 = vmatprep.subr.bf16.mxu1 %v1591_v58  ;;  %v2980_v30 = vadd.f32 %v2979_v25, %v2937_v40  ;;  %v2939_v63 = vadd.f32 %v2938_v10, %v2896_v39  ;;  %3278 = vmatprep.mubr.bf16.mxu0 %v6829_v43  ;;  %v1519_v43 = vunpack.c.l.s8.bf16 %v807_v15  ;;  %v1510_v58 = vunpack.c.l.s8.bf16 %v802_v17 }
 0x386   : > { %3321 = vmatprep.mubr.bf16.mxu1 %v6833_v44  ;;  %v2940_v19 = vpop.f32.mrf.mxu0  ;;  %v1571_v15 = vunpack.c.h.s8.bf16 %v831_v3  ;;  %v1570_v25 = vunpack.c.h.s8.bf16 %v830_v33  ;;  %v1503_v39 = vunpack.c.l.s8.bf16 %v799_v20  ;;  %v1567_v40 = vunpack.c.l.s8.bf16 %v831_v3 }
 0x387   : > { %v2983_v47 = vpop.f32.mrf.mxu1  ;;  %v3676_v27 = vadd.f32 %v2980_v30, %v561_v29  ;;  %v2982_v16 = vadd.f32 %v2981_v31, %v2939_v63  ;;  %v2941_v13 = vadd.f32 %v2940_v19, %v2898_v52  ;;  %3249 = vmatpush1.bf16.msra.mxu0 %v1526_v24  ;;  %v827_v24 = vld [vmem:[%s6592_s30 + $0x6f8] sm:$0xff]  ;;  %v1566_v29 = vunpack.c.l.s8.bf16 %v830_v33 }
 0x388   : > { %3292 = vmatpush1.bf16.msra.mxu1 %v1590_v23  ;;  %v2942_v34 = vpop.f32.mrf.mxu0  ;;  %3250 = vmatprep.subr.bf16.mxu0 %v1523_v41  ;;  %v859_v23 = vld [vmem:[%s6592_s30 + $0x7f8] sm:$0xff]  ;;  %v1563_v10 = vunpack.c.h.s8.bf16 %v827_v24  ;;  %v826_v41 = vld [vmem:[%s6592_s30 + $0x6f0] sm:$0xff]  ;;  %v1559_v30 = vunpack.c.l.s8.bf16 %v827_v24 }
 0x389   : > { %3293 = vmatprep.subr.bf16.mxu1 %v1587_v62  ;;  %3684 = vst [vmem:[#allocation2 + $0x30] sm:$0xff] %v3676_v27  ;;  %v3677_v44 = vadd.f32 %v2982_v16, %v562_v55  ;;  %v2984_v11 = vadd.f32 %v2983_v47, %v2941_v13  ;;  %v2943_v7 = vadd.f32 %v2942_v34, %v2900_v35  ;;  %v2985_v50 = vpop.f32.mrf.mxu1  ;;  %v1627_v31 = vunpack.c.h.s8.bf16 %v859_v23  ;;  %v858_v62 = vld [vmem:[%s6592_s30 + $0x7f0] sm:$0xff]  ;;  %v823_v35 = vld [vmem:[%s6592_s30 + $0x6d8] sm:$0xff] }
 0x38a   : > { %v1562_v8 = vunpack.c.h.s8.bf16 %v826_v41  ;;  %v1626_v52 = vunpack.c.h.s8.bf16 %v858_v62  ;;  %v1623_v63 = vunpack.c.l.s8.bf16 %v859_v23  ;;  %v855_v55 = vld [vmem:[%s6592_s30 + $0x7d8] sm:$0xff]  ;;  %v1558_v19 = vunpack.c.l.s8.bf16 %v826_v41  ;;  %v822_v16 = vld [vmem:[%s6592_s30 + $0x6d0] sm:$0xff] }
 0x38b   : > { %3685 = vst [vmem:[#allocation2] sm:$0xff] %v3677_v44  ;;  %v3680_v21 = vadd.f32 %v2984_v11, %v565_v54  ;;  %v2986_v6 = vadd.f32 %v2985_v50, %v2943_v7  ;;  %3251 = vmatpush1.bf16.msra.mxu0 %v1522_v1  ;;  %v1622_v47 = vunpack.c.l.s8.bf16 %v858_v62  ;;  %v1555_v1 = vunpack.c.h.s8.bf16 %v823_v35  ;;  %v854_v13 = vld [vmem:[%s6592_s30 + $0x7d0] sm:$0xff]  ;;  %v851_v44 = vld [vmem:[%s6592_s30 + $0x7b8] sm:$0xff] }
 0x38c   : > { %3294 = vmatpush1.bf16.msra.mxu1 %v1586_v12  ;;  %3252 = vmatprep.subr.bf16.mxu0 %v1519_v43  ;;  %v1619_v27 = vunpack.c.h.s8.bf16 %v855_v55  ;;  %v1554_v12 = vunpack.c.h.s8.bf16 %v822_v16  ;;  %v1618_v54 = vunpack.c.h.s8.bf16 %v854_v13  ;;  %v1551_v34 = vunpack.c.l.s8.bf16 %v823_v35  ;;  %v850_v50 = vld [vmem:[%s6592_s30 + $0x7b0] sm:$0xff] }
 0x38d   : > { %3295 = vmatprep.subr.bf16.mxu1 %v1583_v37  ;;  %3688 = vst [vmem:[#allocation2 + $0x8] sm:$0xff] %v3680_v21  ;;  %v3681_v61 = vadd.f32 %v2986_v6, %v566_v38  ;;  %v1615_v43 = vunpack.c.l.s8.bf16 %v855_v55  ;;  %v819_v37 = vld [vmem:[%s6592_s30 + $0x6b8] sm:$0xff]  ;;  %v1550_v11 = vunpack.c.l.s8.bf16 %v822_v16  ;;  %v1614_v7 = vunpack.c.l.s8.bf16 %v854_v13  ;;  %v818_v38 = vld [vmem:[%s6592_s30 + $0x6b0] sm:$0xff] }
 0x38e   : > { %v1547_v51 = vunpack.c.h.s8.bf16 %v819_v37  ;;  %v1611_v28 = vunpack.c.h.s8.bf16 %v851_v44  ;;  %v1546_v21 = vunpack.c.h.s8.bf16 %v818_v38  ;;  %v1610_v6 = vunpack.c.h.s8.bf16 %v850_v50  ;;  %v867_v55 = vld [vmem:[%s6592_s30 + $0x838] sm:$0xff]  ;;  %v898_v16 = vld [vmem:[%s6592_s30 + $0x930] sm:$0xff] }
 0x38f   : > { %3689 = vst [vmem:[#allocation2 + $0x20] sm:$0xff] %v3681_v61  ;;  %3253 = vmatpush1.bf16.msra.mxu0 %v1518_v18  ;;  %v1543_v18 = vunpack.c.l.s8.bf16 %v819_v37  ;;  %v1542_v17 = vunpack.c.l.s8.bf16 %v818_v38  ;;  %v1606_v14 = vunpack.c.l.s8.bf16 %v850_v50  ;;  %v895_v37 = vld [vmem:[%s6592_s30 + $0x918] sm:$0xff]  ;;  %v894_v38 = vld [vmem:[%s6592_s30 + $0x910] sm:$0xff] }
 0x390   : > { %3296 = vmatpush1.bf16.msra.mxu1 %v1582_v0  ;;  %3254 = vmatprep.subr.bf16.mxu0 %v1515_v32  ;;  %v1607_v0 = vunpack.c.l.s8.bf16 %v851_v44  ;;  %v815_v32 = vld [vmem:[%s6592_s30 + $0x698] sm:$0xff] }
 0x391   : > { %3297 = vmatprep.subr.bf16.mxu1 %v1579_v36  ;;  %v847_v36 = vld [vmem:[%s6592_s30 + $0x798] sm:$0xff]  ;;  %v1539_v61 = vunpack.c.h.s8.bf16 %v815_v32  ;;  %v1535_v3 = vunpack.c.l.s8.bf16 %v815_v32 }
 0x392   : > { %v923_v32 = vld [vmem:[%s6592_s30 + $0x9f8] sm:$0xff] }
 0x393   : > { %3255 = vmatpush1.bf16.msra.mxu0 %v1514_v22  ;;  %v1603_v22 = vunpack.c.h.s8.bf16 %v847_v36 }
 0x394   : > { %3298 = vmatpush1.bf16.msra.mxu1 %v1578_v42  ;;  %3256 = vmatprep.subr.bf16.mxu0 %v1511_v9  ;;  %v814_v42 = vld [vmem:[%s6592_s30 + $0x690] sm:$0xff] }
 0x395   : > { %3299 = vmatprep.subr.bf16.mxu1 %v1575_v60  ;;  %v846_v9 = vld [vmem:[%s6592_s30 + $0x790] sm:$0xff]  ;;  %v1538_v60 = vunpack.c.h.s8.bf16 %v814_v42 }
 0x396   : > { %v1602_v20 = vunpack.c.h.s8.bf16 %v846_v9  ;;  %v1598_v56 = vunpack.c.l.s8.bf16 %v846_v9 }
 0x397   : > { %3257 = vmatpush1.bf16.msra.mxu0 %v1510_v58  ;;  %v1599_v58 = vunpack.c.l.s8.bf16 %v847_v36 }
 0x398   : > { %3300 = vmatpush1.bf16.msra.mxu1 %v1574_v2  ;;  %3258 = vmatprep.subr.bf16.mxu0 %v1507_v53  ;;  %v875_v2 = vld [vmem:[%s6592_s30 + $0x878] sm:$0xff] }
 0x399   : > { %3301 = vmatprep.subr.bf16.mxu1 %v1571_v15  ;;  %v907_v53 = vld [vmem:[%s6592_s30 + $0x978] sm:$0xff]  ;;  %v1534_v15 = vunpack.c.l.s8.bf16 %v814_v42  ;;  %v1659_v33 = vunpack.c.h.s8.bf16 %v875_v2  ;;  %v1655_v23 = vunpack.c.l.s8.bf16 %v875_v2  ;;  %v922_v42 = vld [vmem:[%s6592_s30 + $0x9f0] sm:$0xff] }
 0x39a   : > { %v919_v2 = vld [vmem:[%s6592_s30 + $0x9d8] sm:$0xff] }
 0x39b   : > { %3259 = vmatpush1.bf16.msra.mxu0 %v1506_v26  ;;  %v1723_v26 = vunpack.c.h.s8.bf16 %v907_v53 }
 0x39c   : > { %3302 = vmatpush1.bf16.msra.mxu1 %v1570_v25  ;;  %3260 = vmatprep.subr.bf16.mxu0 %v1503_v39  ;;  %v874_v25 = vld [vmem:[%s6592_s30 + $0x870] sm:$0xff] }
 0x39d   : > { %3303 = vmatprep.subr.bf16.mxu1 %v1567_v40  ;;  %v906_v39 = vld [vmem:[%s6592_s30 + $0x970] sm:$0xff]  ;;  %v1658_v40 = vunpack.c.h.s8.bf16 %v874_v25 }
 0x39e   : > { %v1722_v24 = vunpack.c.h.s8.bf16 %v906_v39  ;;  %v1718_v41 = vunpack.c.l.s8.bf16 %v906_v39 }
 0x39f   : > { %3261 = vmatpush1.bf16.msra.mxu0 %v1502_v59  ;;  %v1719_v59 = vunpack.c.l.s8.bf16 %v907_v53 }
 0x3a0   : > { %3304 = vmatpush1.bf16.msra.mxu1 %v1566_v29  ;;  %3262 = vmatprep.subr.bf16.mxu0 %v1563_v10  ;;  %v871_v29 = vld [vmem:[%s6592_s30 + $0x858] sm:$0xff] }
 0x3a1   : > { %3305 = vmatprep.subr.bf16.mxu1 %v1627_v31  ;;  %v903_v10 = vld [vmem:[%s6592_s30 + $0x958] sm:$0xff]  ;;  %v1654_v31 = vunpack.c.l.s8.bf16 %v874_v25  ;;  %v1651_v62 = vunpack.c.h.s8.bf16 %v871_v29  ;;  %v918_v25 = vld [vmem:[%s6592_s30 + $0x9d0] sm:$0xff] }
 0x3a2   : > { %v1711_v35 = vunpack.c.l.s8.bf16 %v903_v10 }
 0x3a3   : > { %3263 = vmatpush2.bf16.msra.mxu0 %v1562_v8  ;;  %v1715_v8 = vunpack.c.h.s8.bf16 %v903_v10 }
 0x3a4   : > { %3306 = vmatpush2.bf16.msra.mxu1 %v1626_v52  ;;  %3264 = vmatprep.subr.bf16.mxu0 %v1559_v30  ;;  %v870_v52 = vld [vmem:[%s6592_s30 + $0x850] sm:$0xff] }
 0x3a5   : > { %3307 = vmatprep.subr.bf16.mxu1 %v1623_v63  ;;  %v902_v30 = vld [vmem:[%s6592_s30 + $0x950] sm:$0xff]  ;;  %v1647_v63 = vunpack.c.l.s8.bf16 %v871_v29  ;;  %v915_v29 = vld [vmem:[%s6592_s30 + $0x9b8] sm:$0xff] }
 0x3a7   : > { %3265 = vmatpush2.bf16.msra.mxu0 %v1558_v19  ;;  %v899_v19 = vld [vmem:[%s6592_s30 + $0x938] sm:$0xff] }
 0x3a8   : > { %3308 = vmatpush2.bf16.msra.mxu1 %v1622_v47  ;;  %3266 = vmatprep.subr.bf16.mxu0 %v1555_v1  ;;  %v1646_v47 = vunpack.c.l.s8.bf16 %v870_v52  ;;  %v1710_v1 = vunpack.c.l.s8.bf16 %v902_v30 }
 0x3a9   : > { %3309 = vmatprep.subr.bf16.mxu1 %v1619_v27  ;;  %v866_v27 = vld [vmem:[%s6592_s30 + $0x830] sm:$0xff] }
 0x3aa   : > { %v1642_v13 = vunpack.c.h.s8.bf16 %v866_v27  ;;  %v1638_v44 = vunpack.c.l.s8.bf16 %v866_v27  ;;  %v910_v27 = vld [vmem:[%s6592_s30 + $0x990] sm:$0xff] }
 0x3ab   : > { %3267 = vmatpush2.bf16.msra.mxu0 %v1554_v12  ;;  %v1706_v12 = vunpack.c.h.s8.bf16 %v898_v16 }
 0x3ac   : > { %3310 = vmatpush2.bf16.msra.mxu1 %v1618_v54  ;;  %3268 = vmatprep.subr.bf16.mxu0 %v1551_v34  ;;  %v1639_v54 = vunpack.c.l.s8.bf16 %v867_v55  ;;  %v1703_v34 = vunpack.c.l.s8.bf16 %v899_v19 }
 0x3ad   : > { %3311 = vmatprep.subr.bf16.mxu1 %v1615_v43  ;;  %v863_v43 = vld [vmem:[%s6592_s30 + $0x818] sm:$0xff] }
 0x3af   : > { %3269 = vmatpush2.bf16.msra.mxu0 %v1550_v11  ;;  %v1702_v11 = vunpack.c.l.s8.bf16 %v898_v16 }
 0x3b0   : > { %3312 = vmatpush2.bf16.msra.mxu1 %v1614_v7  ;;  %3270 = vmatprep.subr.bf16.mxu0 %v1547_v51  ;;  %v1635_v7 = vunpack.c.h.s8.bf16 %v863_v43  ;;  %v1699_v51 = vunpack.c.h.s8.bf16 %v895_v37 }
 0x3b1   : > { %3313 = vmatprep.subr.bf16.mxu1 %v1611_v28  ;;  %v862_v28 = vld [vmem:[%s6592_s30 + $0x810] sm:$0xff] }
 0x3b2   : > { %v1634_v50 = vunpack.c.h.s8.bf16 %v862_v28  ;;  %v1630_v36 = vunpack.c.l.s8.bf16 %v862_v28  ;;  %v970_v28 = vld [vmem:[%s6592_s30 + $0xb70] sm:$0xff] }
 0x3b3   : > { %3271 = vmatpush2.bf16.msra.mxu0 %v1546_v21  ;;  %v1698_v21 = vunpack.c.h.s8.bf16 %v894_v38 }
 0x3b4   : > { %3314 = vmatpush2.bf16.msra.mxu1 %v1610_v6  ;;  %3272 = vmatprep.subr.bf16.mxu0 %v1543_v18  ;;  %v1631_v6 = vunpack.c.l.s8.bf16 %v863_v43  ;;  %v1695_v18 = vunpack.c.l.s8.bf16 %v895_v37  ;;  %v971_v43 = vld [vmem:[%s6592_s30 + $0xb78] sm:$0xff] }
 0x3b5   : > { %3315 = vmatprep.subr.bf16.mxu1 %v1607_v0  ;;  %v891_v0 = vld [vmem:[%s6592_s30 + $0x8f8] sm:$0xff] }
 0x3b7   : > { %3273 = vmatpush2.bf16.msra.mxu0 %v1542_v17  ;;  %v1694_v17 = vunpack.c.l.s8.bf16 %v894_v38 }
 0x3b8   : > { %3316 = vmatpush2.bf16.msra.mxu1 %v1606_v14  ;;  %3274 = vmatprep.subr.bf16.mxu0 %v1539_v61  ;;  %v1691_v14 = vunpack.c.h.s8.bf16 %v891_v0  ;;  %v1755_v61 = vunpack.c.h.s8.bf16 %v923_v32 }
 0x3b9   : > { %3317 = vmatprep.subr.bf16.mxu1 %v1603_v22  ;;  %v890_v22 = vld [vmem:[%s6592_s30 + $0x8f0] sm:$0xff] }
 0x3ba   : > { %v1690_v9 = vunpack.c.h.s8.bf16 %v890_v22  ;;  %v1686_v53 = vunpack.c.l.s8.bf16 %v890_v22  ;;  %v966_v22 = vld [vmem:[%s6592_s30 + $0xb50] sm:$0xff] }
 0x3bb   : > { %3275 = vmatpush2.bf16.msra.mxu0 %v1538_v60  ;;  %v1754_v60 = vunpack.c.h.s8.bf16 %v922_v42 }
 0x3bc   : > { %3318 = vmatpush2.bf16.msra.mxu1 %v1602_v20  ;;  %3276 = vmatprep.subr.bf16.mxu0 %v1535_v3  ;;  %v1687_v20 = vunpack.c.l.s8.bf16 %v891_v0  ;;  %v1751_v3 = vunpack.c.l.s8.bf16 %v923_v32  ;;  %v967_v0 = vld [vmem:[%s6592_s30 + $0xb58] sm:$0xff] }
 0x3bd   : > { %3319 = vmatprep.subr.bf16.mxu1 %v1599_v58  ;;  %v887_v58 = vld [vmem:[%s6592_s30 + $0x8d8] sm:$0xff] }
 0x3bf   : > { %3277 = vmatpush2.bf16.msra.mxu0 %v1534_v15  ;;  %v1750_v15 = vunpack.c.l.s8.bf16 %v922_v42  ;;  %v7739_v42 = vld [vmem:[#allocation33_spill] sm:$0xff] }
 0x3c0   : > { %3320 = vmatpush2.bf16.msra.mxu1 %v1598_v56  ;;  %3332 = vmatprep.subr.bf16.mxu0 %v1659_v33  ;;  %v1683_v56 = vunpack.c.h.s8.bf16 %v887_v58  ;;  %v1747_v33 = vunpack.c.h.s8.bf16 %v919_v2 }
 0x3c1   : > { %3375 = vmatprep.subr.bf16.mxu1 %v1723_v26  ;;  %v886_v26 = vld [vmem:[%s6592_s30 + $0x8d0] sm:$0xff] }
 0x3c2   : > { %3279 = vmatmul.mubr.bf16.vlgmr.msra.gmra.mxu0 %v6874_v48  ;;  %v1650_v48 = vunpack.c.h.s8.bf16 %v870_v52  ;;  %v1682_v39 = vunpack.c.h.s8.bf16 %v886_v26  ;;  %v1678_v10 = vunpack.c.l.s8.bf16 %v886_v26  ;;  %v914_v52 = vld [vmem:[%s6592_s30 + $0x9b0] sm:$0xff] }
 0x3c3   : > { %3322 = vmatmul.mubr.bf16.vlgmr.msra.gmra.mxu1 %v6878_v49  ;;  %3333 = vmatpush1.bf16.msra.mxu0 %v1658_v40  ;;  %v1714_v49 = vunpack.c.h.s8.bf16 %v902_v30  ;;  %v1746_v40 = vunpack.c.h.s8.bf16 %v918_v25 }
 0x3c4   : > { %3376 = vmatpush1.bf16.msra.mxu1 %v1722_v24  ;;  %3334 = vmatprep.subr.bf16.mxu0 %v1655_v23  ;;  %v1679_v24 = vunpack.c.l.s8.bf16 %v887_v58  ;;  %v1743_v23 = vunpack.c.l.s8.bf16 %v919_v2  ;;  %v1838_v2 = vunpack.c.l.s8.bf16 %v966_v22 }
 0x3c5   : > { %3377 = vmatprep.subr.bf16.mxu1 %v1719_v59  ;;  %3364 = vmatprep.mubr.bf16.mxu0 %v6893_v45  ;;  %v1643_v45 = vunpack.c.h.s8.bf16 %v867_v55  ;;  %v883_v59 = vld [vmem:[%s6592_s30 + $0x8b8] sm:$0xff] }
 0x3c6   : > { %3407 = vmatprep.mubr.bf16.mxu1 %v6897_v46  ;;  %v1707_v46 = vunpack.c.h.s8.bf16 %v899_v19  ;;  %v911_v55 = vld [vmem:[%s6592_s30 + $0x998] sm:$0xff] }
 0x3c7   : > { %3335 = vmatpush1.bf16.msra.mxu0 %v1654_v31  ;;  %v1742_v31 = vunpack.c.l.s8.bf16 %v918_v25 }
 0x3c8   : > { %3378 = vmatpush1.bf16.msra.mxu1 %v1718_v41  ;;  %3336 = vmatprep.subr.bf16.mxu0 %v1651_v62  ;;  %v1675_v41 = vunpack.c.h.s8.bf16 %v883_v59  ;;  %v1739_v62 = vunpack.c.h.s8.bf16 %v915_v29 }
 0x3c9   : > { %3379 = vmatprep.subr.bf16.mxu1 %v1715_v8  ;;  %v882_v8 = vld [vmem:[%s6592_s30 + $0x8b0] sm:$0xff] }
 0x3ca   : > { %v1674_v30 = vunpack.c.h.s8.bf16 %v882_v8  ;;  %v1670_v19 = vunpack.c.l.s8.bf16 %v882_v8 }
 0x3cb   : > { %3337 = vmatpush1.bf16.msra.mxu0 %v1650_v48  ;;  %v1738_v48 = vunpack.c.h.s8.bf16 %v914_v52 }
 0x3cc   : > { %3380 = vmatpush1.bf16.msra.mxu1 %v1714_v49  ;;  %3338 = vmatprep.subr.bf16.mxu0 %v1647_v63  ;;  %v1671_v49 = vunpack.c.l.s8.bf16 %v883_v59  ;;  %v1735_v63 = vunpack.c.l.s8.bf16 %v915_v29 }
 0x3cd   : > { %3381 = vmatprep.subr.bf16.mxu1 %v1711_v35  ;;  %v879_v35 = vld [vmem:[%s6592_s30 + $0x898] sm:$0xff] }
 0x3cf   : > { %3339 = vmatpush1.bf16.msra.mxu0 %v1646_v47  ;;  %v1734_v47 = vunpack.c.l.s8.bf16 %v914_v52 }
 0x3d0   : > { %3382 = vmatpush1.bf16.msra.mxu1 %v1710_v1  ;;  %3340 = vmatprep.subr.bf16.mxu0 %v1643_v45  ;;  %v1667_v1 = vunpack.c.h.s8.bf16 %v879_v35  ;;  %v1731_v45 = vunpack.c.h.s8.bf16 %v911_v55 }
 0x3d1   : > { %3383 = vmatprep.subr.bf16.mxu1 %v1707_v46  ;;  %v878_v46 = vld [vmem:[%s6592_s30 + $0x890] sm:$0xff] }
 0x3d2   : > { %v1666_v16 = vunpack.c.h.s8.bf16 %v878_v46  ;;  %v1662_v37 = vunpack.c.l.s8.bf16 %v878_v46 }
 0x3d3   : > { %3341 = vmatpush1.bf16.msra.mxu0 %v1642_v13  ;;  %v1730_v13 = vunpack.c.h.s8.bf16 %v910_v27 }
 0x3d4   : > { %3384 = vmatpush1.bf16.msra.mxu1 %v1706_v12  ;;  %3342 = vmatprep.subr.bf16.mxu0 %v1639_v54  ;;  %v1663_v12 = vunpack.c.l.s8.bf16 %v879_v35  ;;  %v1727_v54 = vunpack.c.l.s8.bf16 %v911_v55 }
 0x3d5   : > { %3385 = vmatprep.subr.bf16.mxu1 %v1703_v34  ;;  %v939_v34 = vld [vmem:[%s6592_s30 + $0xa78] sm:$0xff] }
 0x3d7   : > { %3343 = vmatpush1.bf16.msra.mxu0 %v1638_v44  ;;  %v1726_v44 = vunpack.c.l.s8.bf16 %v910_v27 }
 0x3d8   : > { %3386 = vmatpush1.bf16.msra.mxu1 %v1702_v11  ;;  %3344 = vmatprep.subr.bf16.mxu0 %v1635_v7  ;;  %v1787_v11 = vunpack.c.h.s8.bf16 %v939_v34  ;;  %v1851_v7 = vunpack.c.h.s8.bf16 %v971_v43 }
 0x3d9   : > { %3387 = vmatprep.subr.bf16.mxu1 %v1699_v51  ;;  %v938_v51 = vld [vmem:[%s6592_s30 + $0xa70] sm:$0xff] }
 0x3da   : > { %v1786_v38 = vunpack.c.h.s8.bf16 %v938_v51  ;;  %v1782_v32 = vunpack.c.l.s8.bf16 %v938_v51 }
 0x3db   : > { %3345 = vmatpush1.bf16.msra.mxu0 %v1634_v50  ;;  %v1850_v50 = vunpack.c.h.s8.bf16 %v970_v28 }
 0x3dc   : > { %3388 = vmatpush1.bf16.msra.mxu1 %v1698_v21  ;;  %3346 = vmatprep.subr.bf16.mxu0 %v1631_v6  ;;  %v1783_v21 = vunpack.c.l.s8.bf16 %v939_v34  ;;  %v1847_v6 = vunpack.c.l.s8.bf16 %v971_v43 }
 0x3dd   : > { %3389 = vmatprep.subr.bf16.mxu1 %v1695_v18  ;;  %v935_v18 = vld [vmem:[%s6592_s30 + $0xa58] sm:$0xff] }
 0x3df   : > { %3347 = vmatpush1.bf16.msra.mxu0 %v1630_v36  ;;  %v1846_v36 = vunpack.c.l.s8.bf16 %v970_v28 }
 0x3e0   : > { %3390 = vmatpush1.bf16.msra.mxu1 %v1694_v17  ;;  %3348 = vmatprep.subr.bf16.mxu0 %v1691_v14  ;;  %v1779_v17 = vunpack.c.h.s8.bf16 %v935_v18  ;;  %v1843_v14 = vunpack.c.h.s8.bf16 %v967_v0 }
 0x3e1   : > { %3391 = vmatprep.subr.bf16.mxu1 %v1755_v61  ;;  %v934_v61 = vld [vmem:[%s6592_s30 + $0xa50] sm:$0xff] }
 0x3e2   : > { %v1774_v58 = vunpack.c.l.s8.bf16 %v934_v61 }
 0x3e3   : > { %3349 = vmatpush2.bf16.msra.mxu0 %v1690_v9  ;;  %v1775_v9 = vunpack.c.l.s8.bf16 %v935_v18 }
 0x3e4   : > { %3392 = vmatpush2.bf16.msra.mxu1 %v1754_v60  ;;  %3350 = vmatprep.subr.bf16.mxu0 %v1687_v20  ;;  %v1839_v60 = vunpack.c.l.s8.bf16 %v967_v0  ;;  %v931_v20 = vld [vmem:[%s6592_s30 + $0xa38] sm:$0xff] }
 0x3e5   : > { %3393 = vmatprep.subr.bf16.mxu1 %v1751_v3  ;;  %v963_v3 = vld [vmem:[%s6592_s30 + $0xb38] sm:$0xff]  ;;  %v1767_v25 = vunpack.c.l.s8.bf16 %v931_v20 }
 0x3e7   : > { %3351 = vmatpush2.bf16.msra.mxu0 %v1686_v53  ;;  %v1835_v53 = vunpack.c.h.s8.bf16 %v963_v3 }
 0x3e8   : > { %3394 = vmatpush2.bf16.msra.mxu1 %v1750_v15  ;;  %3352 = vmatprep.subr.bf16.mxu0 %v1683_v56  ;;  %v930_v15 = vld [vmem:[%s6592_s30 + $0xa30] sm:$0xff] }
 0x3e9   : > { %3395 = vmatprep.subr.bf16.mxu1 %v1747_v33  ;;  %v962_v56 = vld [vmem:[%s6592_s30 + $0xb30] sm:$0xff]  ;;  %v1770_v33 = vunpack.c.h.s8.bf16 %v930_v15 }
 0x3ea   : > { %v1834_v26 = vunpack.c.h.s8.bf16 %v962_v56  ;;  %v1830_v59 = vunpack.c.l.s8.bf16 %v962_v56 }
 0x3eb   : > { %3353 = vmatpush2.bf16.msra.mxu0 %v1682_v39  ;;  %v1831_v39 = vunpack.c.l.s8.bf16 %v963_v3 }
 0x3ec   : > { %3396 = vmatpush2.bf16.msra.mxu1 %v1746_v40  ;;  %3354 = vmatprep.subr.bf16.mxu0 %v1679_v24  ;;  %v927_v40 = vld [vmem:[%s6592_s30 + $0xa18] sm:$0xff] }
 0x3ed   : > { %3397 = vmatprep.subr.bf16.mxu1 %v1743_v23  ;;  %v959_v24 = vld [vmem:[%s6592_s30 + $0xb18] sm:$0xff]  ;;  %v1766_v23 = vunpack.c.l.s8.bf16 %v930_v15  ;;  %v1763_v29 = vunpack.c.h.s8.bf16 %v927_v40  ;;  %v1759_v52 = vunpack.c.l.s8.bf16 %v927_v40 }
 0x3ef   : > { %3355 = vmatpush2.bf16.msra.mxu0 %v1678_v10  ;;  %v1827_v10 = vunpack.c.h.s8.bf16 %v959_v24 }
 0x3f0   : > { %3398 = vmatpush2.bf16.msra.mxu1 %v1742_v31  ;;  %3356 = vmatprep.subr.bf16.mxu0 %v1675_v41  ;;  %v926_v31 = vld [vmem:[%s6592_s30 + $0xa10] sm:$0xff] }
 0x3f1   : > { %3399 = vmatprep.subr.bf16.mxu1 %v1739_v62  ;;  %v958_v41 = vld [vmem:[%s6592_s30 + $0xb10] sm:$0xff]  ;;  %v1762_v62 = vunpack.c.h.s8.bf16 %v926_v31 }
 0x3f2   : > { %v1826_v8 = vunpack.c.h.s8.bf16 %v958_v41  ;;  %v1822_v35 = vunpack.c.l.s8.bf16 %v958_v41 }
 0x3f3   : > { %3357 = vmatpush2.bf16.msra.mxu0 %v1674_v30  ;;  %v1823_v30 = vunpack.c.l.s8.bf16 %v959_v24 }
 0x3f4   : > { %3400 = vmatpush2.bf16.msra.mxu1 %v1738_v48  ;;  %3358 = vmatprep.subr.bf16.mxu0 %v1671_v49  ;;  %v955_v48 = vld [vmem:[%s6592_s30 + $0xaf8] sm:$0xff] }
 0x3f5   : > { %3401 = vmatprep.subr.bf16.mxu1 %v1735_v63  ;;  %v987_v49 = vld [vmem:[%s6592_s30 + $0xbf8] sm:$0xff]  ;;  %v1758_v63 = vunpack.c.l.s8.bf16 %v926_v31  ;;  %v1819_v55 = vunpack.c.h.s8.bf16 %v955_v48  ;;  %v1815_v27 = vunpack.c.l.s8.bf16 %v955_v48 }
 0x3f7   : > { %3359 = vmatpush2.bf16.msra.mxu0 %v1670_v19  ;;  %v1883_v19 = vunpack.c.h.s8.bf16 %v987_v49 }
 0x3f8   : > { %3402 = vmatpush2.bf16.msra.mxu1 %v1734_v47  ;;  %3360 = vmatprep.subr.bf16.mxu0 %v1667_v1  ;;  %v954_v47 = vld [vmem:[%s6592_s30 + $0xaf0] sm:$0xff] }
 0x3f9   : > { %3403 = vmatprep.subr.bf16.mxu1 %v1731_v45  ;;  %v986_v1 = vld [vmem:[%s6592_s30 + $0xbf0] sm:$0xff]  ;;  %v1818_v45 = vunpack.c.h.s8.bf16 %v954_v47 }
 0x3fa   : > { %v1882_v46 = vunpack.c.h.s8.bf16 %v986_v1  ;;  %v1878_v34 = vunpack.c.l.s8.bf16 %v986_v1  ;;  %v7743_v1 = vld [vmem:[#allocation37_spill] sm:$0xff] }
 0x3fb   : > { %3361 = vmatpush2.bf16.msra.mxu0 %v1666_v16  ;;  %v1879_v16 = vunpack.c.l.s8.bf16 %v987_v49 }
 0x3fc   : > { %3404 = vmatpush2.bf16.msra.mxu1 %v1730_v13  ;;  %3362 = vmatprep.subr.bf16.mxu0 %v1663_v12  ;;  %v951_v13 = vld [vmem:[%s6592_s30 + $0xad8] sm:$0xff] }
 0x3fd   : > { %3405 = vmatprep.subr.bf16.mxu1 %v1727_v54  ;;  %v983_v12 = vld [vmem:[%s6592_s30 + $0xbd8] sm:$0xff]  ;;  %v1814_v54 = vunpack.c.l.s8.bf16 %v954_v47  ;;  %v1811_v43 = vunpack.c.h.s8.bf16 %v951_v13  ;;  %v1807_v28 = vunpack.c.l.s8.bf16 %v951_v13 }
 0x3fe   : > { %v7742_v47 = vld [vmem:[#allocation36_spill] sm:$0xff] }
 0x3ff   : > { %3363 = vmatpush2.bf16.msra.mxu0 %v1662_v37  ;;  %v1875_v37 = vunpack.c.h.s8.bf16 %v983_v12  ;;  %v995_v13 = vld [vmem:[%s6592_s30 + $0xc38] sm:$0xff] }
 0x400   : > { %3406 = vmatpush2.bf16.msra.mxu1 %v1726_v44  ;;  %3418 = vmatprep.subr.bf16.mxu0 %v1787_v11  ;;  %v950_v44 = vld [vmem:[%s6592_s30 + $0xad0] sm:$0xff] }
 0x401   : > { %3461 = vmatprep.subr.bf16.mxu1 %v1851_v7  ;;  %v982_v11 = vld [vmem:[%s6592_s30 + $0xbd0] sm:$0xff]  ;;  %v1810_v7 = vunpack.c.h.s8.bf16 %v950_v44 }
 0x402   : > { %3365 = vmatmul.mubr.bf16.vlgmr.msra.gmra.mxu0 %v6938_v4  ;;  %v1778_v4 = vunpack.c.h.s8.bf16 %v934_v61  ;;  %v1874_v51 = vunpack.c.h.s8.bf16 %v982_v11  ;;  %v1870_v18 = vunpack.c.l.s8.bf16 %v982_v11  ;;  %v1026_v11 = vld [vmem:[%s6592_s30 + $0xd30] sm:$0xff] }
 0x403   : > { %3408 = vmatmul.mubr.bf16.vlgmr.msra.gmra.mxu1 %v6942_v5  ;;  %3419 = vmatpush1.bf16.msra.mxu0 %v1786_v38  ;;  %v1842_v5 = vunpack.c.h.s8.bf16 %v966_v22  ;;  %v1871_v38 = vunpack.c.l.s8.bf16 %v983_v12  ;;  %v1027_v12 = vld [vmem:[%s6592_s30 + $0xd38] sm:$0xff] }
 0x404   : > { %3462 = vmatpush1.bf16.msra.mxu1 %v1850_v50  ;;  %3420 = vmatprep.subr.bf16.mxu0 %v1783_v21  ;;  %v947_v50 = vld [vmem:[%s6592_s30 + $0xab8] sm:$0xff] }
 0x405   : > { %3463 = vmatprep.subr.bf16.mxu1 %v1847_v6  ;;  %3450 = vmatprep.mubr.bf16.mxu0 %v6957_v57  ;;  %v1771_v57 = vunpack.c.h.s8.bf16 %v931_v20  ;;  %v979_v21 = vld [vmem:[%s6592_s30 + $0xbb8] sm:$0xff]  ;;  %v1806_v6 = vunpack.c.l.s8.bf16 %v950_v44  ;;  %v1803_v0 = vunpack.c.h.s8.bf16 %v947_v50  ;;  %v1799_v22 = vunpack.c.l.s8.bf16 %v947_v50  ;;  %v994_v44 = vld [vmem:[%s6592_s30 + $0xc30] sm:$0xff] }
 0x406   : > { %3493 = vmatprep.mubr.bf16.mxu1 %v7739_v42  ;;  %v1863_v42 = vunpack.c.l.s8.bf16 %v979_v21  ;;  %v991_v50 = vld [vmem:[%s6592_s30 + $0xc18] sm:$0xff] }
 0x407   : > { %3421 = vmatpush1.bf16.msra.mxu0 %v1782_v32  ;;  %v1867_v32 = vunpack.c.h.s8.bf16 %v979_v21  ;;  %v1023_v21 = vld [vmem:[%s6592_s30 + $0xd18] sm:$0xff] }
 0x408   : > { %3464 = vmatpush1.bf16.msra.mxu1 %v1846_v36  ;;  %3422 = vmatprep.subr.bf16.mxu0 %v1779_v17  ;;  %v946_v36 = vld [vmem:[%s6592_s30 + $0xab0] sm:$0xff] }
 0x409   : > { %3465 = vmatprep.subr.bf16.mxu1 %v1843_v14  ;;  %v978_v17 = vld [vmem:[%s6592_s30 + $0xbb0] sm:$0xff]  ;;  %v1802_v14 = vunpack.c.h.s8.bf16 %v946_v36 }
 0x40a   : > { %v1866_v61 = vunpack.c.h.s8.bf16 %v978_v17 }
 0x40b   : > { %3423 = vmatpush1.bf16.msra.mxu0 %v1778_v4  ;;  %v943_v4 = vld [vmem:[%s6592_s30 + $0xa98] sm:$0xff] }
 0x40c   : > { %3466 = vmatpush1.bf16.msra.mxu1 %v1842_v5  ;;  %3424 = vmatprep.subr.bf16.mxu0 %v1775_v9  ;;  %v975_v5 = vld [vmem:[%s6592_s30 + $0xb98] sm:$0xff]  ;;  %v1798_v9 = vunpack.c.l.s8.bf16 %v946_v36  ;;  %v1795_v20 = vunpack.c.h.s8.bf16 %v943_v4  ;;  %v1791_v15 = vunpack.c.l.s8.bf16 %v943_v4  ;;  %v990_v36 = vld [vmem:[%s6592_s30 + $0xc10] sm:$0xff] }
 0x40d   : > { %3467 = vmatprep.subr.bf16.mxu1 %v1839_v60  ;;  %v1862_v60 = vunpack.c.l.s8.bf16 %v978_v17  ;;  %v1859_v3 = vunpack.c.h.s8.bf16 %v975_v5  ;;  %v1855_v56 = vunpack.c.l.s8.bf16 %v975_v5  ;;  %v1022_v17 = vld [vmem:[%s6592_s30 + $0xd10] sm:$0xff]  ;;  %v1019_v4 = vld [vmem:[%s6592_s30 + $0xcf8] sm:$0xff] }
 0x40e   : > { %v1051_v5 = vld [vmem:[%s6592_s30 + $0xdf8] sm:$0xff] }
 0x40f   : > { %3425 = vmatpush1.bf16.msra.mxu0 %v1774_v58  ;;  %v942_v58 = vld [vmem:[%s6592_s30 + $0xa90] sm:$0xff] }
 0x410   : > { %3468 = vmatpush1.bf16.msra.mxu1 %v1838_v2  ;;  %3426 = vmatprep.subr.bf16.mxu0 %v1771_v57  ;;  %v974_v2 = vld [vmem:[%s6592_s30 + $0xb90] sm:$0xff]  ;;  %v1794_v57 = vunpack.c.h.s8.bf16 %v942_v58 }
 0x411   : > { %3469 = vmatprep.subr.bf16.mxu1 %v1835_v53  ;;  %v1858_v53 = vunpack.c.h.s8.bf16 %v974_v2 }
 0x413   : > { %3427 = vmatpush1.bf16.msra.mxu0 %v1770_v33  ;;  %v1003_v33 = vld [vmem:[%s6592_s30 + $0xc78] sm:$0xff] }
 0x414   : > { %3470 = vmatpush1.bf16.msra.mxu1 %v1834_v26  ;;  %3428 = vmatprep.subr.bf16.mxu0 %v1767_v25  ;;  %v1035_v26 = vld [vmem:[%s6592_s30 + $0xd78] sm:$0xff]  ;;  %v1790_v25 = vunpack.c.l.s8.bf16 %v942_v58  ;;  %v1915_v40 = vunpack.c.h.s8.bf16 %v1003_v33  ;;  %v1911_v31 = vunpack.c.l.s8.bf16 %v1003_v33  ;;  %v1018_v58 = vld [vmem:[%s6592_s30 + $0xcf0] sm:$0xff] }
 0x415   : > { %3471 = vmatprep.subr.bf16.mxu1 %v1831_v39  ;;  %v1854_v39 = vunpack.c.l.s8.bf16 %v974_v2  ;;  %v1979_v24 = vunpack.c.h.s8.bf16 %v1035_v26  ;;  %v1975_v41 = vunpack.c.l.s8.bf16 %v1035_v26  ;;  %v1050_v2 = vld [vmem:[%s6592_s30 + $0xdf0] sm:$0xff]  ;;  %v1015_v33 = vld [vmem:[%s6592_s30 + $0xcd8] sm:$0xff] }
 0x416   : > { %v1047_v26 = vld [vmem:[%s6592_s30 + $0xdd8] sm:$0xff] }
 0x417   : > { %3429 = vmatpush1.bf16.msra.mxu0 %v1766_v23  ;;  %v1002_v23 = vld [vmem:[%s6592_s30 + $0xc70] sm:$0xff] }
 0x418   : > { %3472 = vmatpush1.bf16.msra.mxu1 %v1830_v59  ;;  %3430 = vmatprep.subr.bf16.mxu0 %v1763_v29  ;;  %v1034_v59 = vld [vmem:[%s6592_s30 + $0xd70] sm:$0xff]  ;;  %v1914_v29 = vunpack.c.h.s8.bf16 %v1002_v23  ;;  %v1910_v48 = vunpack.c.l.s8.bf16 %v1002_v23 }
 0x419   : > { %3473 = vmatprep.subr.bf16.mxu1 %v1827_v10  ;;  %v1978_v10 = vunpack.c.h.s8.bf16 %v1034_v59  ;;  %v1974_v49 = vunpack.c.l.s8.bf16 %v1034_v59  ;;  %v1014_v23 = vld [vmem:[%s6592_s30 + $0xcd0] sm:$0xff] }
 0x41a   : > { %v1046_v59 = vld [vmem:[%s6592_s30 + $0xdd0] sm:$0xff] }
 0x41b   : > { %3431 = vmatpush1.bf16.msra.mxu0 %v1762_v62  ;;  %v999_v62 = vld [vmem:[%s6592_s30 + $0xc58] sm:$0xff] }
 0x41c   : > { %3474 = vmatpush1.bf16.msra.mxu1 %v1826_v8  ;;  %3432 = vmatprep.subr.bf16.mxu0 %v1759_v52  ;;  %v1031_v8 = vld [vmem:[%s6592_s30 + $0xd58] sm:$0xff]  ;;  %v7740_v52 = vld [vmem:[#allocation34_spill] sm:$0xff] }
 0x41d   : > { %3475 = vmatprep.subr.bf16.mxu1 %v1823_v30  ;;  %v7741_v30 = vld [vmem:[#allocation35_spill] sm:$0xff] }
 0x41f   : > { %3433 = vmatpush1.bf16.msra.mxu0 %v1758_v63  ;;  %v1907_v63 = vunpack.c.h.s8.bf16 %v999_v62 }
 0x420   : > { %3476 = vmatpush1.bf16.msra.mxu1 %v1822_v35  ;;  %3434 = vmatprep.subr.bf16.mxu0 %v1819_v55  ;;  %v1971_v35 = vunpack.c.h.s8.bf16 %v1031_v8  ;;  %v998_v55 = vld [vmem:[%s6592_s30 + $0xc50] sm:$0xff] }
 0x421   : > { %3477 = vmatprep.subr.bf16.mxu1 %v1883_v19  ;;  %v1030_v19 = vld [vmem:[%s6592_s30 + $0xd50] sm:$0xff] }
 0x423   : > { %3435 = vmatpush2.bf16.msra.mxu0 %v1818_v45  ;;  %v1906_v45 = vunpack.c.h.s8.bf16 %v998_v55 }
 0x424   : > { %3478 = vmatpush2.bf16.msra.mxu1 %v1882_v46  ;;  %3436 = vmatprep.subr.bf16.mxu0 %v1815_v27  ;;  %v1970_v46 = vunpack.c.h.s8.bf16 %v1030_v19  ;;  %v1903_v27 = vunpack.c.l.s8.bf16 %v999_v62  ;;  %v1011_v62 = vld [vmem:[%s6592_s30 + $0xcb8] sm:$0xff] }
 0x425   : > { %3479 = vmatprep.subr.bf16.mxu1 %v1879_v16  ;;  %v1967_v16 = vunpack.c.l.s8.bf16 %v1031_v8  ;;  %v1043_v8 = vld [vmem:[%s6592_s30 + $0xdb8] sm:$0xff] }
 0x427   : > { %3437 = vmatpush2.bf16.msra.mxu0 %v1814_v54  ;;  %v1902_v54 = vunpack.c.l.s8.bf16 %v998_v55 }
 0x428   : > { %3480 = vmatpush2.bf16.msra.mxu1 %v1878_v34  ;;  %3438 = vmatprep.subr.bf16.mxu0 %v1811_v43  ;;  %v1966_v34 = vunpack.c.l.s8.bf16 %v1030_v19  ;;  %v1899_v43 = vunpack.c.h.s8.bf16 %v995_v13 }
 0x429   : > { %3481 = vmatprep.subr.bf16.mxu1 %v1875_v37  ;;  %v1963_v37 = vunpack.c.h.s8.bf16 %v1027_v12 }
 0x42b   : > { %3439 = vmatpush2.bf16.msra.mxu0 %v1810_v7  ;;  %v1898_v7 = vunpack.c.h.s8.bf16 %v994_v44 }
 0x42c   : > { %3482 = vmatpush2.bf16.msra.mxu1 %v1874_v51  ;;  %3440 = vmatprep.subr.bf16.mxu0 %v1807_v28  ;;  %v1962_v51 = vunpack.c.h.s8.bf16 %v1026_v11  ;;  %v1895_v28 = vunpack.c.l.s8.bf16 %v995_v13 }
 0x42d   : > { %3483 = vmatprep.subr.bf16.mxu1 %v1871_v38  ;;  %v1959_v38 = vunpack.c.l.s8.bf16 %v1027_v12 }
 0x42f   : > { %3441 = vmatpush2.bf16.msra.mxu0 %v1806_v6  ;;  %v1894_v6 = vunpack.c.l.s8.bf16 %v994_v44 }
 0x430   : > { %3484 = vmatpush2.bf16.msra.mxu1 %v1870_v18  ;;  %3442 = vmatprep.subr.bf16.mxu0 %v1803_v0  ;;  %v1958_v18 = vunpack.c.l.s8.bf16 %v1026_v11  ;;  %v1891_v0 = vunpack.c.h.s8.bf16 %v991_v50 }
 0x431   : > { %3485 = vmatprep.subr.bf16.mxu1 %v1867_v32  ;;  %v1955_v32 = vunpack.c.h.s8.bf16 %v1023_v21 }
 0x433   : > { %3443 = vmatpush2.bf16.msra.mxu0 %v1802_v14  ;;  %v1890_v14 = vunpack.c.h.s8.bf16 %v990_v36 }
 0x434   : > { %3486 = vmatpush2.bf16.msra.mxu1 %v1866_v61  ;;  %3444 = vmatprep.subr.bf16.mxu0 %v1799_v22  ;;  %v1954_v61 = vunpack.c.h.s8.bf16 %v1022_v17  ;;  %v1887_v22 = vunpack.c.l.s8.bf16 %v991_v50 }
 0x435   : > { %3487 = vmatprep.subr.bf16.mxu1 %v1863_v42  ;;  %v1951_v42 = vunpack.c.l.s8.bf16 %v1023_v21 }
 0x437   : > { %3445 = vmatpush2.bf16.msra.mxu0 %v1798_v9  ;;  %v1886_v9 = vunpack.c.l.s8.bf16 %v990_v36 }
 0x438   : > { %3488 = vmatpush2.bf16.msra.mxu1 %v1862_v60  ;;  %3446 = vmatprep.subr.bf16.mxu0 %v1795_v20  ;;  %v1950_v60 = vunpack.c.l.s8.bf16 %v1022_v17  ;;  %v1947_v20 = vunpack.c.h.s8.bf16 %v1019_v4 }
 0x439   : > { %3489 = vmatprep.subr.bf16.mxu1 %v1859_v3  ;;  %v2011_v3 = vunpack.c.h.s8.bf16 %v1051_v5 }
 0x43b   : > { %3447 = vmatpush2.bf16.msra.mxu0 %v1794_v57  ;;  %v1946_v57 = vunpack.c.h.s8.bf16 %v1018_v58 }
 0x43c   : > { %3490 = vmatpush2.bf16.msra.mxu1 %v1858_v53  ;;  %3448 = vmatprep.subr.bf16.mxu0 %v1791_v15  ;;  %v2010_v53 = vunpack.c.h.s8.bf16 %v1050_v2  ;;  %v1943_v15 = vunpack.c.l.s8.bf16 %v1019_v4 }
 0x43d   : > { %3491 = vmatprep.subr.bf16.mxu1 %v1855_v56  ;;  %v2007_v56 = vunpack.c.l.s8.bf16 %v1051_v5 }
 0x43f   : > { %3449 = vmatpush2.bf16.msra.mxu0 %v1790_v25  ;;  %v1942_v25 = vunpack.c.l.s8.bf16 %v1018_v58  ;;  %v7746_v58 = vld [vmem:[#allocation40_spill] sm:$0xff] }
 0x440   : > { %3492 = vmatpush2.bf16.msra.mxu1 %v1854_v39  ;;  %3504 = vmatprep.subr.bf16.mxu0 %v1915_v40  ;;  %v2006_v39 = vunpack.c.l.s8.bf16 %v1050_v2  ;;  %v1939_v40 = vunpack.c.h.s8.bf16 %v1015_v33  ;;  %v7747_v2 = vld [vmem:[#allocation41_spill] sm:$0xff] }
 0x441   : > { %3547 = vmatprep.subr.bf16.mxu1 %v1979_v24  ;;  %v2003_v24 = vunpack.c.h.s8.bf16 %v1047_v26 }
 0x442   : > { %3451 = vmatmul.mubr.bf16.vlgmr.msra.gmra.mxu0 %v7740_v52  ;;  %v1934_v52 = vunpack.c.l.s8.bf16 %v1014_v23 }
 0x443   : > { %3494 = vmatmul.mubr.bf16.vlgmr.msra.gmra.mxu1 %v7741_v30  ;;  %3505 = vmatpush1.bf16.msra.mxu0 %v1914_v29  ;;  %v1938_v29 = vunpack.c.h.s8.bf16 %v1014_v23  ;;  %v1998_v30 = vunpack.c.l.s8.bf16 %v1046_v59  ;;  %v1058_v23 = vld [vmem:[%s6592_s30 + $0xe30] sm:$0xff] }
 0x444   : > { %3548 = vmatpush1.bf16.msra.mxu1 %v1978_v10  ;;  %3506 = vmatprep.subr.bf16.mxu0 %v1911_v31  ;;  %v2002_v10 = vunpack.c.h.s8.bf16 %v1046_v59  ;;  %v1935_v31 = vunpack.c.l.s8.bf16 %v1015_v33  ;;  %v1059_v33 = vld [vmem:[%s6592_s30 + $0xe38] sm:$0xff]  ;;  %v1090_v59 = vld [vmem:[%s6592_s30 + $0xf30] sm:$0xff] }
 0x445   : > { %3549 = vmatprep.subr.bf16.mxu1 %v1975_v41  ;;  %3536 = vmatprep.mubr.bf16.mxu0 %v7742_v47  ;;  %v1999_v41 = vunpack.c.l.s8.bf16 %v1047_v26  ;;  %v1927_v47 = vunpack.c.l.s8.bf16 %v1011_v62  ;;  %v1091_v26 = vld [vmem:[%s6592_s30 + $0xf38] sm:$0xff] }
 0x446   : > { %3579 = vmatprep.mubr.bf16.mxu1 %v7743_v1  ;;  %v1991_v1 = vunpack.c.l.s8.bf16 %v1043_v8 }
 0x447   : > { %3507 = vmatpush1.bf16.msra.mxu0 %v1910_v48  ;;  %v1931_v48 = vunpack.c.h.s8.bf16 %v1011_v62  ;;  %v1055_v62 = vld [vmem:[%s6592_s30 + $0xe18] sm:$0xff] }
 0x448   : > { %3550 = vmatpush1.bf16.msra.mxu1 %v1974_v49  ;;  %3508 = vmatprep.subr.bf16.mxu0 %v1907_v63  ;;  %v1995_v49 = vunpack.c.h.s8.bf16 %v1043_v8  ;;  %v1010_v63 = vld [vmem:[%s6592_s30 + $0xcb0] sm:$0xff]  ;;  %v1087_v8 = vld [vmem:[%s6592_s30 + $0xf18] sm:$0xff] }
 0x449   : > { %3551 = vmatprep.subr.bf16.mxu1 %v1971_v35  ;;  %v1042_v35 = vld [vmem:[%s6592_s30 + $0xdb0] sm:$0xff]  ;;  %v1930_v55 = vunpack.c.h.s8.bf16 %v1010_v63 }
 0x44a   : > { %v1994_v19 = vunpack.c.h.s8.bf16 %v1042_v35 }
 0x44b   : > { %3509 = vmatpush1.bf16.msra.mxu0 %v1906_v45  ;;  %v1007_v45 = vld [vmem:[%s6592_s30 + $0xc98] sm:$0xff] }
 0x44c   : > { %3552 = vmatpush1.bf16.msra.mxu1 %v1970_v46  ;;  %3510 = vmatprep.subr.bf16.mxu0 %v1903_v27  ;;  %v1039_v46 = vld [vmem:[%s6592_s30 + $0xd98] sm:$0xff]  ;;  %v1926_v27 = vunpack.c.l.s8.bf16 %v1010_v63  ;;  %v1923_v13 = vunpack.c.h.s8.bf16 %v1007_v45  ;;  %v1919_v44 = vunpack.c.l.s8.bf16 %v1007_v45  ;;  %v1054_v63 = vld [vmem:[%s6592_s30 + $0xe10] sm:$0xff] }
 0x44d   : > { %3553 = vmatprep.subr.bf16.mxu1 %v1967_v16  ;;  %v1990_v16 = vunpack.c.l.s8.bf16 %v1042_v35  ;;  %v1987_v12 = vunpack.c.h.s8.bf16 %v1039_v46  ;;  %v1983_v11 = vunpack.c.l.s8.bf16 %v1039_v46  ;;  %v1086_v35 = vld [vmem:[%s6592_s30 + $0xf10] sm:$0xff]  ;;  %v1083_v45 = vld [vmem:[%s6592_s30 + $0xef8] sm:$0xff] }
 0x44e   : > { %v1115_v46 = vld [vmem:[%s6592_s30 + $0xff8] sm:$0xff] }
 0x44f   : > { %3511 = vmatpush1.bf16.msra.mxu0 %v1902_v54  ;;  %v1006_v54 = vld [vmem:[%s6592_s30 + $0xc90] sm:$0xff] }
 0x450   : > { %3554 = vmatpush1.bf16.msra.mxu1 %v1966_v34  ;;  %3512 = vmatprep.subr.bf16.mxu0 %v1899_v43  ;;  %v1038_v34 = vld [vmem:[%s6592_s30 + $0xd90] sm:$0xff]  ;;  %v1922_v43 = vunpack.c.h.s8.bf16 %v1006_v54 }
 0x451   : > { %3555 = vmatprep.subr.bf16.mxu1 %v1963_v37  ;;  %v1986_v37 = vunpack.c.h.s8.bf16 %v1038_v34 }
 0x453   : > { %3513 = vmatpush1.bf16.msra.mxu0 %v1898_v7  ;;  %v1067_v7 = vld [vmem:[%s6592_s30 + $0xe78] sm:$0xff] }
 0x454   : > { %3556 = vmatpush1.bf16.msra.mxu1 %v1962_v51  ;;  %3514 = vmatprep.subr.bf16.mxu0 %v1895_v28  ;;  %v1099_v51 = vld [vmem:[%s6592_s30 + $0xf78] sm:$0xff]  ;;  %v1918_v28 = vunpack.c.l.s8.bf16 %v1006_v54  ;;  %v2043_v50 = vunpack.c.h.s8.bf16 %v1067_v7  ;;  %v2039_v36 = vunpack.c.l.s8.bf16 %v1067_v7  ;;  %v1082_v54 = vld [vmem:[%s6592_s30 + $0xef0] sm:$0xff] }
 0x455   : > { %3557 = vmatprep.subr.bf16.mxu1 %v1959_v38  ;;  %v1982_v38 = vunpack.c.l.s8.bf16 %v1038_v34  ;;  %v2107_v21 = vunpack.c.h.s8.bf16 %v1099_v51  ;;  %v2103_v17 = vunpack.c.l.s8.bf16 %v1099_v51  ;;  %v1114_v34 = vld [vmem:[%s6592_s30 + $0xff0] sm:$0xff]  ;;  %v1079_v7 = vld [vmem:[%s6592_s30 + $0xed8] sm:$0xff] }
 0x456   : > { %v1111_v51 = vld [vmem:[%s6592_s30 + $0xfd8] sm:$0xff] }
 0x457   : > { %3515 = vmatpush1.bf16.msra.mxu0 %v1894_v6  ;;  %v1066_v6 = vld [vmem:[%s6592_s30 + $0xe70] sm:$0xff] }
 0x458   : > { %3558 = vmatpush1.bf16.msra.mxu1 %v1958_v18  ;;  %3516 = vmatprep.subr.bf16.mxu0 %v1891_v0  ;;  %v1098_v18 = vld [vmem:[%s6592_s30 + $0xf70] sm:$0xff]  ;;  %v2042_v0 = vunpack.c.h.s8.bf16 %v1066_v6  ;;  %v2038_v4 = vunpack.c.l.s8.bf16 %v1066_v6 }
 0x459   : > { %3559 = vmatprep.subr.bf16.mxu1 %v1955_v32  ;;  %v2106_v32 = vunpack.c.h.s8.bf16 %v1098_v18  ;;  %v2102_v5 = vunpack.c.l.s8.bf16 %v1098_v18  ;;  %v1078_v6 = vld [vmem:[%s6592_s30 + $0xed0] sm:$0xff] }
 0x45a   : > { %v1110_v18 = vld [vmem:[%s6592_s30 + $0xfd0] sm:$0xff] }
 0x45b   : > { %3517 = vmatpush1.bf16.msra.mxu0 %v1890_v14  ;;  %v1063_v14 = vld [vmem:[%s6592_s30 + $0xe58] sm:$0xff] }
 0x45c   : > { %3560 = vmatpush1.bf16.msra.mxu1 %v1954_v61  ;;  %3518 = vmatprep.subr.bf16.mxu0 %v1887_v22  ;;  %v1095_v61 = vld [vmem:[%s6592_s30 + $0xf58] sm:$0xff]  ;;  %v7744_v22 = vld [vmem:[#allocation38_spill] sm:$0xff] }
 0x45d   : > { %3561 = vmatprep.subr.bf16.mxu1 %v1951_v42  ;;  %v7745_v42 = vld [vmem:[#allocation39_spill] sm:$0xff] }
 0x45f   : > { %3519 = vmatpush1.bf16.msra.mxu0 %v1886_v9  ;;  %v2035_v9 = vunpack.c.h.s8.bf16 %v1063_v14 }
 0x460   : > { %3562 = vmatpush1.bf16.msra.mxu1 %v1950_v60  ;;  %3520 = vmatprep.subr.bf16.mxu0 %v1947_v20  ;;  %v2099_v60 = vunpack.c.h.s8.bf16 %v1095_v61  ;;  %v1062_v20 = vld [vmem:[%s6592_s30 + $0xe50] sm:$0xff] }
 0x461   : > { %3563 = vmatprep.subr.bf16.mxu1 %v2011_v3  ;;  %v1094_v3 = vld [vmem:[%s6592_s30 + $0xf50] sm:$0xff] }
 0x463   : > { %3521 = vmatpush2.bf16.msra.mxu0 %v1946_v57  ;;  %v2034_v57 = vunpack.c.h.s8.bf16 %v1062_v20 }
 0x464   : > { %3564 = vmatpush2.bf16.msra.mxu1 %v2010_v53  ;;  %3522 = vmatprep.subr.bf16.mxu0 %v1943_v15  ;;  %v2098_v53 = vunpack.c.h.s8.bf16 %v1094_v3  ;;  %v2031_v15 = vunpack.c.l.s8.bf16 %v1063_v14  ;;  %v1075_v14 = vld [vmem:[%s6592_s30 + $0xeb8] sm:$0xff] }
 0x465   : > { %3565 = vmatprep.subr.bf16.mxu1 %v2007_v56  ;;  %v2095_v56 = vunpack.c.l.s8.bf16 %v1095_v61  ;;  %v1107_v61 = vld [vmem:[%s6592_s30 + $0xfb8] sm:$0xff] }
 0x467   : > { %3523 = vmatpush2.bf16.msra.mxu0 %v1942_v25  ;;  %v2030_v25 = vunpack.c.l.s8.bf16 %v1062_v20 }
 0x468   : > { %3566 = vmatpush2.bf16.msra.mxu1 %v2006_v39  ;;  %3524 = vmatprep.subr.bf16.mxu0 %v1939_v40  ;;  %v2094_v39 = vunpack.c.l.s8.bf16 %v1094_v3  ;;  %v2027_v40 = vunpack.c.h.s8.bf16 %v1059_v33 }
 0x469   : > { %3567 = vmatprep.subr.bf16.mxu1 %v2003_v24  ;;  %v2091_v24 = vunpack.c.h.s8.bf16 %v1091_v26 }
 0x46b   : > { %3525 = vmatpush2.bf16.msra.mxu0 %v1938_v29  ;;  %v2026_v29 = vunpack.c.h.s8.bf16 %v1058_v23 }
 0x46c   : > { %3568 = vmatpush2.bf16.msra.mxu1 %v2002_v10  ;;  %3526 = vmatprep.subr.bf16.mxu0 %v1935_v31  ;;  %v2090_v10 = vunpack.c.h.s8.bf16 %v1090_v59  ;;  %v2023_v31 = vunpack.c.l.s8.bf16 %v1059_v33 }
 0x46d   : > { %3569 = vmatprep.subr.bf16.mxu1 %v1999_v41  ;;  %v2087_v41 = vunpack.c.l.s8.bf16 %v1091_v26 }
 0x46f   : > { %3527 = vmatpush2.bf16.msra.mxu0 %v1934_v52  ;;  %v2022_v52 = vunpack.c.l.s8.bf16 %v1058_v23 }
 0x470   : > { %3570 = vmatpush2.bf16.msra.mxu1 %v1998_v30  ;;  %3528 = vmatprep.subr.bf16.mxu0 %v1931_v48  ;;  %v2086_v30 = vunpack.c.l.s8.bf16 %v1090_v59  ;;  %v2019_v48 = vunpack.c.h.s8.bf16 %v1055_v62 }
 0x471   : > { %3571 = vmatprep.subr.bf16.mxu1 %v1995_v49  ;;  %v2083_v49 = vunpack.c.h.s8.bf16 %v1087_v8 }
 0x473   : > { %3529 = vmatpush2.bf16.msra.mxu0 %v1930_v55  ;;  %v2018_v55 = vunpack.c.h.s8.bf16 %v1054_v63 }
 0x474   : > { %3572 = vmatpush2.bf16.msra.mxu1 %v1994_v19  ;;  %3530 = vmatprep.subr.bf16.mxu0 %v1927_v47  ;;  %v2082_v19 = vunpack.c.h.s8.bf16 %v1086_v35  ;;  %v2015_v47 = vunpack.c.l.s8.bf16 %v1055_v62  ;;  %v3022_v62 = vpop.f32.mrf.mxu0 }
 0x475   : > { %3573 = vmatprep.subr.bf16.mxu1 %v1991_v1  ;;  %v2079_v1 = vunpack.c.l.s8.bf16 %v1087_v8  ;;  %v3065_v8 = vpop.f32.mrf.mxu1 }
 0x477   : > { %3531 = vmatpush2.bf16.msra.mxu0 %v1926_v27  ;;  %v2014_v27 = vunpack.c.l.s8.bf16 %v1054_v63 }
 0x478   : > { %3574 = vmatpush2.bf16.msra.mxu1 %v1990_v16  ;;  %3532 = vmatprep.subr.bf16.mxu0 %v1923_v13  ;;  %v2078_v16 = vunpack.c.l.s8.bf16 %v1086_v35  ;;  %v2075_v13 = vunpack.c.h.s8.bf16 %v1083_v45 }
 0x479   : > { %3575 = vmatprep.subr.bf16.mxu1 %v1987_v12  ;;  %v2139_v12 = vunpack.c.h.s8.bf16 %v1115_v46 }
 0x47b   : > { %3533 = vmatpush2.bf16.msra.mxu0 %v1922_v43  ;;  %v2074_v43 = vunpack.c.h.s8.bf16 %v1082_v54 }
 0x47c   : > { %3576 = vmatpush2.bf16.msra.mxu1 %v1986_v37  ;;  %3534 = vmatprep.subr.bf16.mxu0 %v1919_v44  ;;  %v2138_v37 = vunpack.c.h.s8.bf16 %v1114_v34  ;;  %v2071_v44 = vunpack.c.l.s8.bf16 %v1083_v45 }
 0x47d   : > { %3577 = vmatprep.subr.bf16.mxu1 %v1983_v11  ;;  %v2135_v11 = vunpack.c.l.s8.bf16 %v1115_v46 }
 0x47f   : > { %3535 = vmatpush2.bf16.msra.mxu0 %v1918_v28  ;;  %v2070_v28 = vunpack.c.l.s8.bf16 %v1082_v54 }
 0x480   : > { %3578 = vmatpush2.bf16.msra.mxu1 %v1982_v38  ;;  %3590 = vmatprep.subr.bf16.mxu0 %v2043_v50  ;;  %v2134_v38 = vunpack.c.l.s8.bf16 %v1114_v34  ;;  %v2067_v50 = vunpack.c.h.s8.bf16 %v1079_v7 }
 0x481   : > { %3633 = vmatprep.subr.bf16.mxu1 %v2107_v21  ;;  %v2131_v21 = vunpack.c.h.s8.bf16 %v1111_v51 }
 0x482   : > { %3537 = vmatmul.mubr.bf16.vlgmr.msra.gmra.mxu0 %v7744_v22  ;;  %v2062_v22 = vunpack.c.l.s8.bf16 %v1078_v6 }
 0x483   : > { %3580 = vmatmul.mubr.bf16.vlgmr.msra.gmra.mxu1 %v7745_v42  ;;  %3591 = vmatpush1.bf16.msra.mxu0 %v2042_v0  ;;  %v2066_v0 = vunpack.c.h.s8.bf16 %v1078_v6  ;;  %v2126_v42 = vunpack.c.l.s8.bf16 %v1110_v18 }
 0x484   : > { %3634 = vmatpush1.bf16.msra.mxu1 %v2106_v32  ;;  %3592 = vmatprep.subr.bf16.mxu0 %v2039_v36  ;;  %v2130_v32 = vunpack.c.h.s8.bf16 %v1110_v18  ;;  %v2063_v36 = vunpack.c.l.s8.bf16 %v1079_v7 }
 0x485   : > { %3635 = vmatprep.subr.bf16.mxu1 %v2103_v17  ;;  %3622 = vmatprep.mubr.bf16.mxu0 %v7746_v58  ;;  %v2127_v17 = vunpack.c.l.s8.bf16 %v1111_v51  ;;  %v2055_v58 = vunpack.c.l.s8.bf16 %v1075_v14 }
 0x486   : > { %3665 = vmatprep.mubr.bf16.mxu1 %v7747_v2  ;;  %v2119_v2 = vunpack.c.l.s8.bf16 %v1107_v61 }
 0x487   : > { %3593 = vmatpush1.bf16.msra.mxu0 %v2038_v4  ;;  %v2059_v4 = vunpack.c.h.s8.bf16 %v1075_v14  ;;  %v3066_v14 = vadd.f32 %v3065_v8, %v3022_v62 }
 0x488   : > { %3636 = vmatpush1.bf16.msra.mxu1 %v2102_v5  ;;  %3594 = vmatprep.subr.bf16.mxu0 %v2035_v9  ;;  %v2123_v5 = vunpack.c.h.s8.bf16 %v1107_v61  ;;  %v1074_v9 = vld [vmem:[%s6592_s30 + $0xeb0] sm:$0xff] }
 0x489   : > { %3637 = vmatprep.subr.bf16.mxu1 %v2099_v60  ;;  %v1106_v60 = vld [vmem:[%s6592_s30 + $0xfb0] sm:$0xff]  ;;  %v2058_v20 = vunpack.c.h.s8.bf16 %v1074_v9 }
 0x48a   : > { %v2122_v3 = vunpack.c.h.s8.bf16 %v1106_v60 }
 0x48b   : > { %3595 = vmatpush1.bf16.msra.mxu0 %v2034_v57  ;;  %v1071_v57 = vld [vmem:[%s6592_s30 + $0xe98] sm:$0xff] }
 0x48c   : > { %3638 = vmatpush1.bf16.msra.mxu1 %v2098_v53  ;;  %3596 = vmatprep.subr.bf16.mxu0 %v2031_v15  ;;  %v1103_v53 = vld [vmem:[%s6592_s30 + $0xf98] sm:$0xff]  ;;  %v2054_v15 = vunpack.c.l.s8.bf16 %v1074_v9  ;;  %v2051_v33 = vunpack.c.h.s8.bf16 %v1071_v57  ;;  %v2047_v23 = vunpack.c.l.s8.bf16 %v1071_v57 }
 0x48d   : > { %3639 = vmatprep.subr.bf16.mxu1 %v2095_v56  ;;  %v2118_v56 = vunpack.c.l.s8.bf16 %v1106_v60  ;;  %v2115_v26 = vunpack.c.h.s8.bf16 %v1103_v53  ;;  %v2111_v59 = vunpack.c.l.s8.bf16 %v1103_v53 }
 0x48f   : > { %3597 = vmatpush1.bf16.msra.mxu0 %v2030_v25  ;;  %v1070_v25 = vld [vmem:[%s6592_s30 + $0xe90] sm:$0xff] }
 0x490   : > { %3640 = vmatpush1.bf16.msra.mxu1 %v2094_v39  ;;  %3598 = vmatprep.subr.bf16.mxu0 %v2027_v40  ;;  %v1102_v39 = vld [vmem:[%s6592_s30 + $0xf90] sm:$0xff]  ;;  %v2050_v40 = vunpack.c.h.s8.bf16 %v1070_v25 }
 0x491   : > { %3641 = vmatprep.subr.bf16.mxu1 %v2091_v24  ;;  %v2114_v24 = vunpack.c.h.s8.bf16 %v1102_v39 }
 0x493   : > { %3599 = vmatpush1.bf16.msra.mxu0 %v2026_v29  ;;  %v2046_v29 = vunpack.c.l.s8.bf16 %v1070_v25 }
 0x494   : > { %3642 = vmatpush1.bf16.msra.mxu1 %v2090_v10  ;;  %3600 = vmatprep.subr.bf16.mxu0 %v2023_v31  ;;  %v2110_v10 = vunpack.c.l.s8.bf16 %v1102_v39  ;;  %v7748_v31 = vld [vmem:[#allocation42_spill] sm:$0xff] }
 0x495   : > { %3643 = vmatprep.subr.bf16.mxu1 %v2087_v41  ;;  %v7749_v41 = vld [vmem:[#allocation43_spill] sm:$0xff] }
 0x497   : > { %3601 = vmatpush1.bf16.msra.mxu0 %v2022_v52  ;;  %v3024_v52 = vpop.f32.mrf.mxu0 }
 0x498   : > { %3644 = vmatpush1.bf16.msra.mxu1 %v2086_v30  ;;  %3602 = vmatprep.subr.bf16.mxu0 %v2019_v48  ;;  %v3067_v30 = vpop.f32.mrf.mxu1 }
 0x499   : > { %3645 = vmatprep.subr.bf16.mxu1 %v2083_v49  ;;  %v3026_v48 = vpop.f32.mrf.mxu0  ;;  %v3068_v61 = vadd.f32 %v3067_v30, %v3024_v52 }
 0x49a   : > { %v3069_v49 = vpop.f32.mrf.mxu1 }
 0x49b   : > { %3603 = vmatpush1.bf16.msra.mxu0 %v2018_v55  ;;  %v3028_v63 = vpop.f32.mrf.mxu0 }
 0x49c   : > { %3646 = vmatpush1.bf16.msra.mxu1 %v2082_v19  ;;  %3604 = vmatprep.subr.bf16.mxu0 %v2015_v47  ;;  %v3071_v35 = vpop.f32.mrf.mxu1 }
 0x49d   : > { %3647 = vmatprep.subr.bf16.mxu1 %v2079_v1  ;;  %v3108_v55 = vpop.f32.mrf.mxu0  ;;  %v3072_v60 = vadd.f32 %v3071_v35, %v3028_v63 }
 0x49e   : > { %v3151_v19 = vpop.f32.mrf.mxu1 }
 0x49f   : > { %3605 = vmatpush1.bf16.msra.mxu0 %v2014_v27  ;;  %v3110_v47 = vpop.f32.mrf.mxu0 }
 0x4a0   : > { %3648 = vmatpush1.bf16.msra.mxu1 %v2078_v16  ;;  %3606 = vmatprep.subr.bf16.mxu0 %v2075_v13  ;;  %v3153_v1 = vpop.f32.mrf.mxu1  ;;  %v3111_v9 = vadd.f32 %v3110_v47, %v3068_v61 }
 0x4a1   : > { %3649 = vmatprep.subr.bf16.mxu1 %v2139_v12  ;;  %v3112_v45 = vpop.f32.mrf.mxu0 }
 0x4a2   : > { %v3155_v46 = vpop.f32.mrf.mxu1  ;;  %v3154_v57 = vadd.f32 %v3153_v1, %v3111_v9 }
 0x4a3   : > { %3607 = vmatpush2.bf16.msra.mxu0 %v2074_v43  ;;  %v3114_v27 = vpop.f32.mrf.mxu0 }
 0x4a4   : > { %3650 = vmatpush2.bf16.msra.mxu1 %v2138_v37  ;;  %3608 = vmatprep.subr.bf16.mxu0 %v2071_v44  ;;  %v3157_v16 = vpop.f32.mrf.mxu1  ;;  %v3115_v53 = vadd.f32 %v3114_v27, %v3072_v60 }
 0x4a5   : > { %3651 = vmatprep.subr.bf16.mxu1 %v2135_v11  ;;  %v3194_v13 = vpop.f32.mrf.mxu0 }
 0x4a6   : > { %v3237_v12 = vpop.f32.mrf.mxu1  ;;  %v3158_v39 = vadd.f32 %v3157_v16, %v3115_v53 }
 0x4a7   : > { %3609 = vmatpush2.bf16.msra.mxu0 %v2070_v28  ;;  %v3196_v54 = vpop.f32.mrf.mxu0 }
 0x4a8   : > { %3652 = vmatpush2.bf16.msra.mxu1 %v2134_v38  ;;  %3610 = vmatprep.subr.bf16.mxu0 %v2067_v50  ;;  %v3239_v34 = vpop.f32.mrf.mxu1  ;;  %v3197_v25 = vadd.f32 %v3196_v54, %v3154_v57 }
 0x4a9   : > { %3653 = vmatprep.subr.bf16.mxu1 %v2131_v21  ;;  %v3198_v43 = vpop.f32.mrf.mxu0 }
 0x4aa   : > { %v3241_v37 = vpop.f32.mrf.mxu1 }
 0x4ab   : > { %3611 = vmatpush2.bf16.msra.mxu0 %v2066_v0  ;;  %v3200_v44 = vpop.f32.mrf.mxu0 }
 0x4ac   : > { %3654 = vmatpush2.bf16.msra.mxu1 %v2130_v32  ;;  %3612 = vmatprep.subr.bf16.mxu0 %v2063_v36  ;;  %v3243_v11 = vpop.f32.mrf.mxu1 }
 0x4ad   : > { %3655 = vmatprep.subr.bf16.mxu1 %v2127_v17  ;;  %v3280_v7 = vpop.f32.mrf.mxu0 }
 0x4ae   : > { %v3323_v51 = vpop.f32.mrf.mxu1 }
 0x4af   : > { %3613 = vmatpush2.bf16.msra.mxu0 %v2062_v22  ;;  %v3282_v28 = vpop.f32.mrf.mxu0  ;;  %v3109_v22 = vadd.f32 %v3108_v55, %v3066_v14 }
 0x4b0   : > { %3656 = vmatpush2.bf16.msra.mxu1 %v2126_v42  ;;  %3614 = vmatprep.subr.bf16.mxu0 %v2059_v4  ;;  %v3325_v38 = vpop.f32.mrf.mxu1 }
 0x4b1   : > { %3657 = vmatprep.subr.bf16.mxu1 %v2123_v5  ;;  %v3284_v50 = vpop.f32.mrf.mxu0  ;;  %v3070_v5 = vadd.f32 %v3069_v49, %v3026_v48 }
 0x4b2   : > { %v3327_v21 = vpop.f32.mrf.mxu1 }
 0x4b3   : > { %3615 = vmatpush2.bf16.msra.mxu0 %v2058_v20  ;;  %v3286_v6 = vpop.f32.mrf.mxu0  ;;  %v3152_v20 = vadd.f32 %v3151_v19, %v3109_v22 }
 0x4b4   : > { %3658 = vmatpush2.bf16.msra.mxu1 %v2122_v3  ;;  %3616 = vmatprep.subr.bf16.mxu0 %v2055_v58  ;;  %v3329_v18 = vpop.f32.mrf.mxu1  ;;  %v3113_v3 = vadd.f32 %v3112_v45, %v3070_v5 }
 0x4b5   : > { %3659 = vmatprep.subr.bf16.mxu1 %v2119_v2 }
 0x4b7   : > { %3617 = vmatpush2.bf16.msra.mxu0 %v2054_v15  ;;  %v3195_v15 = vadd.f32 %v3194_v13, %v3152_v20 }
 0x4b8   : > { %3660 = vmatpush2.bf16.msra.mxu1 %v2118_v56  ;;  %3618 = vmatprep.subr.bf16.mxu0 %v2051_v33 }
 0x4b9   : > { %3661 = vmatprep.subr.bf16.mxu1 %v2115_v26  ;;  %v3156_v26 = vadd.f32 %v3155_v46, %v3113_v3  ;;  %v563_v3 = vld [vmem:[#allocation2 + $0x18] sm:$0xff] }
 0x4bb   : > { %3619 = vmatpush2.bf16.msra.mxu0 %v2050_v40  ;;  %v3238_v40 = vadd.f32 %v3237_v12, %v3195_v15 }
 0x4bc   : > { %3662 = vmatpush2.bf16.msra.mxu1 %v2114_v24  ;;  %3620 = vmatprep.subr.bf16.mxu0 %v2047_v23  ;;  %v3199_v24 = vadd.f32 %v3198_v43, %v3156_v26 }
 0x4bd   : > { %3663 = vmatprep.subr.bf16.mxu1 %v2111_v59 }
 0x4bf   : > { %3621 = vmatpush2.bf16.msra.mxu0 %v2046_v29  ;;  %v3240_v29 = vadd.f32 %v3239_v34, %v3197_v25 }
 0x4c0   : > { %3664 = vmatpush2.bf16.msra.mxu1 %v2110_v10  ;;  %v3201_v10 = vadd.f32 %v3200_v44, %v3158_v39 }
 0x4c1   : > { %v3283_v62 = vadd.f32 %v3282_v28, %v3240_v29 }
 0x4c2   : > { %3623 = vmatmul.mubr.bf16.vlgmr.msra.gmra.mxu0 %v7748_v31  ;;  %v3366_v0 = vpop.f32.mrf.mxu0  ;;  %v3281_v31 = vadd.f32 %v3280_v7, %v3238_v40  ;;  %v3244_v30 = vadd.f32 %v3243_v11, %v3201_v10 }
 0x4c3   : > { %3666 = vmatmul.mubr.bf16.vlgmr.msra.gmra.mxu1 %v7749_v41  ;;  %v3409_v32 = vpop.f32.mrf.mxu1  ;;  %v3242_v41 = vadd.f32 %v3241_v37, %v3199_v24  ;;  %v3326_v63 = vadd.f32 %v3325_v38, %v3283_v62 }
 0x4c4   : > { %v3368_v36 = vpop.f32.mrf.mxu0  ;;  %v3324_v48 = vadd.f32 %v3323_v51, %v3281_v31  ;;  %v3287_v35 = vadd.f32 %v3286_v6, %v3244_v30 }
 0x4c5   : > { %v3411_v17 = vpop.f32.mrf.mxu1  ;;  %v3285_v49 = vadd.f32 %v3284_v50, %v3242_v41  ;;  %v3369_v45 = vadd.f32 %v3368_v36, %v3326_v63  ;;  %v568_v41 = vld [vmem:[#allocation2 + $0x38] sm:$0xff] }
 0x4c6   : > { %v3370_v42 = vpop.f32.mrf.mxu0  ;;  %v3367_v55 = vadd.f32 %v3366_v0, %v3324_v48  ;;  %v3330_v16 = vadd.f32 %v3329_v18, %v3287_v35 }
 0x4c7   : > { %v3413_v4 = vpop.f32.mrf.mxu1  ;;  %v3328_v1 = vadd.f32 %v3327_v21, %v3285_v49  ;;  %v3412_v54 = vadd.f32 %v3411_v17, %v3369_v45 }
 0x4c8   : > { %v3372_v58 = vpop.f32.mrf.mxu0  ;;  %v3410_v13 = vadd.f32 %v3409_v32, %v3367_v55 }
 0x4c9   : > { %v3415_v2 = vpop.f32.mrf.mxu1  ;;  %v3371_v12 = vadd.f32 %v3370_v42, %v3328_v1  ;;  %v3373_v34 = vadd.f32 %v3372_v58, %v3330_v16 }
 0x4cb   : > { %v3414_v11 = vadd.f32 %v3413_v4, %v3371_v12  ;;  %v3416_v51 = vadd.f32 %v3415_v2, %v3373_v34 }
 0x502   : > { %v3452_v56 = vpop.f32.mrf.mxu0 }
 0x503   : > { %v3495_v33 = vpop.f32.mrf.mxu1  ;;  %v3453_v43 = vadd.f32 %v3452_v56, %v3410_v13  ;;  %v564_v56 = vld [vmem:[#allocation2 + $0x10] sm:$0xff] }
 0x504   : > { %v3454_v23 = vpop.f32.mrf.mxu0 }
 0x505   : > { %v3497_v59 = vpop.f32.mrf.mxu1  ;;  %v3455_v7 = vadd.f32 %v3454_v23, %v3412_v54  ;;  %v3496_v28 = vadd.f32 %v3495_v33, %v3453_v43  ;;  %v567_v23 = vld [vmem:[#allocation2 + $0x28] sm:$0xff] }
 0x506   : > { %v3456_v8 = vpop.f32.mrf.mxu0 }
 0x507   : > { %v3499_v52 = vpop.f32.mrf.mxu1  ;;  %v3457_v38 = vadd.f32 %v3456_v8, %v3414_v11  ;;  %v3498_v0 = vadd.f32 %v3497_v59, %v3455_v7 }
 0x508   : > { %v3458_v19 = vpop.f32.mrf.mxu0 }
 0x509   : > { %v3501_v47 = vpop.f32.mrf.mxu1  ;;  %v3459_v21 = vadd.f32 %v3458_v19, %v3416_v51  ;;  %v3500_v14 = vadd.f32 %v3499_v52, %v3457_v38 }
 0x50b   : > { %v3502_v22 = vadd.f32 %v3501_v47, %v3459_v21 }
 0x542   : > { %v3538_v46 = vpop.f32.mrf.mxu0 }
 0x543   : > { %v3581_v27 = vpop.f32.mrf.mxu1  ;;  %v3539_v36 = vadd.f32 %v3538_v46, %v3496_v28 }
 0x544   : > { %v3540_v37 = vpop.f32.mrf.mxu0 }
 0x545   : > { %v3583_v44 = vpop.f32.mrf.mxu1  ;;  %v3541_v61 = vadd.f32 %v3540_v37, %v3498_v0  ;;  %v3582_v17 = vadd.f32 %v3581_v27, %v3539_v36 }
 0x546   : > { %v3542_v50 = vpop.f32.mrf.mxu0 }
 0x547   : > { %v3585_v6 = vpop.f32.mrf.mxu1  ;;  %v3543_v42 = vadd.f32 %v3542_v50, %v3500_v14  ;;  %v3584_v60 = vadd.f32 %v3583_v44, %v3541_v61 }
 0x548   : > { %v3544_v18 = vpop.f32.mrf.mxu0 }
 0x549   : > { %v3587_v32 = vpop.f32.mrf.mxu1  ;;  %v3545_v4 = vadd.f32 %v3544_v18, %v3502_v22  ;;  %v3586_v57 = vadd.f32 %v3585_v6, %v3543_v42 }
 0x54b   : > { %v3588_v25 = vadd.f32 %v3587_v32, %v3545_v4 }
 0x582   : > { %v3624_v5 = vpop.f32.mrf.mxu0 }
 0x583   : > { %v3667_v9 = vpop.f32.mrf.mxu1  ;;  %v3625_v20 = vadd.f32 %v3624_v5, %v3582_v17 }
 0x584   : > { %v3626_v58 = vpop.f32.mrf.mxu0 }
 0x585   : > { %v3669_v2 = vpop.f32.mrf.mxu1  ;;  %v3668_v53 = vadd.f32 %v3667_v9, %v3625_v20  ;;  %v3627_v15 = vadd.f32 %v3626_v58, %v3584_v60 }
 0x586   : > { %v3628_v33 = vpop.f32.mrf.mxu0 }
 0x587   : > { %v3671_v26 = vpop.f32.mrf.mxu1  ;;  %v3678_v39 = vadd.f32 %v3668_v53, %v563_v3  ;;  %v3670_v40 = vadd.f32 %v3669_v2, %v3627_v15  ;;  %v3629_v24 = vadd.f32 %v3628_v33, %v3586_v57 }
 0x588   : > { %v3630_v59 = vpop.f32.mrf.mxu0 }
 0x589   : > { %3686 = vst [vmem:[#allocation2 + $0x18] sm:$0xff] %v3678_v39  ;;  %v3679_v29 = vadd.f32 %v3670_v40, %v564_v56  ;;  %v3672_v10 = vadd.f32 %v3671_v26, %v3629_v24  ;;  %v3631_v31 = vadd.f32 %v3630_v59, %v3588_v25  ;;  %v3673_v62 = vpop.f32.mrf.mxu1 }
 0x58b   : > { %3687 = vst [vmem:[#allocation2 + $0x10] sm:$0xff] %v3679_v29  ;;  %v3682_v8 = vadd.f32 %v3672_v10, %v567_v23  ;;  %v3674_v52 = vadd.f32 %v3673_v62, %v3631_v31  ;;  %3695 = sbr.rel (%p5333_p13) target bundleno = 2436 (0x984), region = 100 }
 0x58d   : > { %3690 = vst [vmem:[#allocation2 + $0x28] sm:$0xff] %v3682_v8  ;;  %v3683_v30 = vadd.f32 %v3674_v52, %v568_v41 }
 0x58f   : > { %3691 = vst [vmem:[#allocation2 + $0x38] sm:$0xff] %v3683_v30 }
 0x590   : > { %v5681_v48 = vld [vmem:[#allocation11 + $0xe4] ss:$16 sps:$4 sm:$0xff]   ;;  %v5685_v63 = vld [vmem:[#allocation11 + $0xe0] ss:$16 sps:$4 sm:$0xff]   ;;  %v3706_v9 = vlaneseq  ;;  %v3697_v24 = vld [vmem:[#allocation2] sm:$0xff]  ;;  %vm5054_vm8 = vcmask 7168  }
 0x591   : > { %v5683_v49 = vld [vmem:[#allocation11 + $0x2e4] ss:$16 sps:$4 sm:$0xff]   ;;  %4566 = vmatprep.subr.bf16.mxu0 %v5681_v48  ;;  %v5686_v35 = vld [vmem:[#allocation11 + $0x2e0] ss:$16 sps:$4 sm:$0xff]   ;;  %v3701_v23 = vld [vmem:[#allocation2 + $0x20] sm:$0xff] }
 0x592   : > { %4609 = vmatprep.subr.bf16.mxu1 %v5683_v49  ;;  %v5687_v55 = vld [vmem:[#allocation11 + $0xc4] ss:$16 sps:$4 sm:$0xff]   ;;  %4567 = vmatpush1.bf16.msra.mxu0 %v5685_v63  ;;  %v5691_v47 = vld [vmem:[#allocation11 + $0xc0] ss:$16 sps:$4 sm:$0xff]   ;;  %v3707_v58 = vshrl.u32 %v3706_v9, 7  ;;  %v3699_v62 = vld [vmem:[#allocation2 + $0x10] sm:$0xff] }
 0x593   : > { %4610 = vmatpush1.bf16.msra.mxu1 %v5686_v35  ;;  %v5689_v19 = vld [vmem:[#allocation11 + $0x2c4] ss:$16 sps:$4 sm:$0xff]   ;;  %4568 = vmatprep.subr.bf16.mxu0 %v5687_v55  ;;  %v5692_v1 = vld [vmem:[#allocation11 + $0x2c0] ss:$16 sps:$4 sm:$0xff]   ;;  %v3704_v59 = vld [vmem:[#allocation8] sm:$0xf] }
 0x594   : > { %4611 = vmatprep.subr.bf16.mxu1 %v5689_v19  ;;  %v5693_v45 = vld [vmem:[#allocation11 + $0xa4] ss:$16 sps:$4 sm:$0xff]   ;;  %v5697_v27 = vld [vmem:[#allocation11 + $0xa0] ss:$16 sps:$4 sm:$0xff]   ;;  %v7556_v56 = vsub.s32 1, %v3707_v58  ;;  %v7558_v33 = vsub.s32 3, %v3707_v58 }
 0x595   : > { %v5695_v46 = vld [vmem:[#allocation11 + $0x2a4] ss:$16 sps:$4 sm:$0xff]   ;;  %v5698_v16 = vld [vmem:[#allocation11 + $0x2a0] ss:$16 sps:$4 sm:$0xff]   ;;  %v7560_v25 = vsub.s32 0, %v3707_v58  ;;  %v7562_v10 = vsub.s32 2, %v3707_v58 }
 0x596   : > { %4569 = vmatpush1.bf16.msra.mxu0 %v5691_v47  ;;  %v5699_v13 = vld [vmem:[#allocation11 + $0x84] ss:$16 sps:$4 sm:$0xff]   ;;  %v5703_v54 = vld [vmem:[#allocation11 + $0x80] ss:$16 sps:$4 sm:$0xff]   ;;  %v3734_v29 = vld [vmem:[#allocation9] sm:$0xf]  ;;  %v3713_v31 = vrot.slane %v3704_v59, %v7556_v56  ;;  %v3721_v52 = vrot.slane %v3704_v59, %v7558_v33 }
 0x597   : > { %4612 = vmatpush1.bf16.msra.mxu1 %v5692_v1  ;;  %4570 = vmatprep.subr.bf16.mxu0 %v5693_v45  ;;  %v5701_v12 = vld [vmem:[#allocation11 + $0x284] ss:$16 sps:$4 sm:$0xff]   ;;  %v5704_v34 = vld [vmem:[#allocation11 + $0x280] ss:$16 sps:$4 sm:$0xff]   ;;  %v3743_v41 = vrot.slane %v3734_v29, %v7556_v56  ;;  %v3696_v30 = vld [vmem:[#allocation2 + $0x30] sm:$0xff]  ;;  %v3751_v63 = vrot.slane %v3734_v29, %v7558_v33  ;;  %v3709_v55 = vrot.slane %v3704_v59, %v7560_v25 }
 0x598   : > { %4613 = vmatprep.subr.bf16.mxu1 %v5695_v46  ;;  %v5705_v43 = vld [vmem:[#allocation11 + $0x64] ss:$16 sps:$4 sm:$0xff]   ;;  %v5709_v44 = vld [vmem:[#allocation11 + $0x60] ss:$16 sps:$4 sm:$0xff]   ;;  %v3739_v19 = vrot.slane %v3734_v29, %v7560_v25  ;;  %v3727_v47 = vmul.f32 %v3713_v31, %v3697_v24  ;;  %v3731_v1 = vmul.f32 %v3713_v31, %v3701_v23  ;;  %v3729_v45 = vmul.f32 %v3721_v52, %v3699_v62  ;;  %v5788_v24 = vld [vmem:[#allocation11 + $0x2cc] ss:$16 sps:$4 sm:$0xff]  }
 0x599   : > { %v5707_v37 = vld [vmem:[#allocation11 + $0x264] ss:$16 sps:$4 sm:$0xff]   ;;  %v5710_v11 = vld [vmem:[#allocation11 + $0x260] ss:$16 sps:$4 sm:$0xff]   ;;  %v5783_v23 = vld [vmem:[#allocation11 + $0xc8] ss:$16 sps:$4 sm:$0xff]  }
 0x59a   : > { %4571 = vmatpush1.bf16.msra.mxu0 %v5697_v27  ;;  %v5711_v7 = vld [vmem:[#allocation11 + $0x44] ss:$16 sps:$4 sm:$0xff]   ;;  %v5715_v28 = vld [vmem:[#allocation11 + $0x40] ss:$16 sps:$4 sm:$0xff]   ;;  %v5794_v31 = vld [vmem:[#allocation11 + $0x2ac] ss:$16 sps:$4 sm:$0xff]  }
 0x59b   : > { %4614 = vmatpush1.bf16.msra.mxu1 %v5698_v16  ;;  %4572 = vmatprep.subr.bf16.mxu0 %v5699_v13  ;;  %v5713_v51 = vld [vmem:[#allocation11 + $0x244] ss:$16 sps:$4 sm:$0xff]   ;;  %v5716_v38 = vld [vmem:[#allocation11 + $0x240] ss:$16 sps:$4 sm:$0xff]   ;;  %v3726_v16 = vmul.f32 %v3709_v55, %v3696_v30  ;;  %v5792_v62 = vld [vmem:[#allocation11 + $0x2a8] ss:$16 sps:$4 sm:$0xff]  }
 0x59c   : > { %4615 = vmatprep.subr.bf16.mxu1 %v5701_v12  ;;  %v5717_v50 = vld [vmem:[#allocation11 + $0x24] ss:$16 sps:$4 sm:$0xff]   ;;  %v5721_v0 = vld [vmem:[#allocation11 + $0x20] ss:$16 sps:$4 sm:$0xff]   ;;  %v5795_v30 = vld [vmem:[#allocation11 + $0x88] ss:$16 sps:$4 sm:$0xff]  }
 0x59d   : > { %v5719_v6 = vld [vmem:[#allocation11 + $0x224] ss:$16 sps:$4 sm:$0xff]   ;;  %v5722_v21 = vld [vmem:[#allocation11 + $0x220] ss:$16 sps:$4 sm:$0xff]  }
 0x59e   : > { %4573 = vmatpush1.bf16.msra.mxu0 %v5703_v54  ;;  %v5723_v36 = vld [vmem:[#allocation11 + $0x4] ss:$16 sps:$4 sm:$0xff]   ;;  %v5727_v61 = vld [vmem:[#allocation11] ss:$16 sps:$4 sm:$0xff]   ;;  %v3717_v54 = vrot.slane %v3704_v59, %v7562_v10  ;;  %v5786_v59 = vld [vmem:[#allocation11 + $0x2c8] ss:$16 sps:$4 sm:$0xff]  }
 0x59f   : > { %4616 = vmatpush1.bf16.msra.mxu1 %v5704_v34  ;;  %4574 = vmatprep.subr.bf16.mxu0 %v5705_v43  ;;  %v5725_v14 = vld [vmem:[#allocation11 + $0x204] ss:$16 sps:$4 sm:$0xff]   ;;  %v5728_v18 = vld [vmem:[#allocation11 + $0x200] ss:$16 sps:$4 sm:$0xff]   ;;  %v3747_v34 = vrot.slane %v3734_v29, %v7562_v10  ;;  %v5791_v29 = vld [vmem:[#allocation11 + $0xac] ss:$16 sps:$4 sm:$0xff]  }
 0x5a0   : > { %4617 = vmatprep.subr.bf16.mxu1 %v5707_v37  ;;  %v5729_v32 = vld [vmem:[#allocation11 + $0x1e4] ss:$16 sps:$4 sm:$0xff]   ;;  %v5733_v17 = vld [vmem:[#allocation11 + $0x1e0] ss:$16 sps:$4 sm:$0xff]  }
 0x5a1   : > { %v5731_v22 = vld [vmem:[#allocation11 + $0x3e4] ss:$16 sps:$4 sm:$0xff]   ;;  %v5734_v42 = vld [vmem:[#allocation11 + $0x3e0] ss:$16 sps:$4 sm:$0xff]  }
 0x5a2   : > { %4575 = vmatpush1.bf16.msra.mxu0 %v5709_v44  ;;  %v5735_v5 = vld [vmem:[#allocation11 + $0x1c4] ss:$16 sps:$4 sm:$0xff]   ;;  %v5739_v4 = vld [vmem:[#allocation11 + $0x1c0] ss:$16 sps:$4 sm:$0xff]   ;;  %v3757_v44 = vadd.f32 %v3743_v41, %v3727_v47  ;;  %v5812_v47 = vld [vmem:[#allocation11 + $0x24c] ss:$16 sps:$4 sm:$0xff]  }
 0x5a3   : > { %4618 = vmatpush1.bf16.msra.mxu1 %v5710_v11  ;;  %4576 = vmatprep.subr.bf16.mxu0 %v5711_v7  ;;  %v5737_v60 = vld [vmem:[#allocation11 + $0x3c4] ss:$16 sps:$4 sm:$0xff]   ;;  %v5740_v20 = vld [vmem:[#allocation11 + $0x3c0] ss:$16 sps:$4 sm:$0xff]   ;;  %v3761_v11 = vadd.f32 %v3743_v41, %v3731_v1  ;;  %v3759_v7 = vadd.f32 %v3751_v63, %v3729_v45  ;;  %v5789_v41 = vld [vmem:[#allocation11 + $0xa8] ss:$16 sps:$4 sm:$0xff]  }
 0x5a4   : > { %4619 = vmatprep.subr.bf16.mxu1 %v5713_v51  ;;  %v5741_v3 = vld [vmem:[#allocation11 + $0x1a4] ss:$16 sps:$4 sm:$0xff]   ;;  %v5745_v57 = vld [vmem:[#allocation11 + $0x1a0] ss:$16 sps:$4 sm:$0xff]   ;;  %3765 = vst [vmem:[#allocation18 + $0x8] sm:$0xff] %v3757_v44 }
 0x5a5   : > { %v5743_v2 = vld [vmem:[#allocation11 + $0x3a4] ss:$16 sps:$4 sm:$0xff]   ;;  %v5746_v53 = vld [vmem:[#allocation11 + $0x3a0] ss:$16 sps:$4 sm:$0xff]   ;;  %3769 = vst [vmem:[#allocation18 + $0x28] sm:$0xff] %v3761_v11  ;;  %3767 = vst [vmem:[#allocation18 + $0x18] sm:$0xff] %v3759_v7 }
 0x5a6   : > { %4577 = vmatpush1.bf16.msra.mxu0 %v5715_v28  ;;  %v5747_v15 = vld [vmem:[#allocation11 + $0x184] ss:$16 sps:$4 sm:$0xff]   ;;  %v5751_v39 = vld [vmem:[#allocation11 + $0x180] ss:$16 sps:$4 sm:$0xff]   ;;  %v5807_v1 = vld [vmem:[#allocation11 + $0x48] ss:$16 sps:$4 sm:$0xff]  }
 0x5a7   : > { %4620 = vmatpush1.bf16.msra.mxu1 %v5716_v38  ;;  %4578 = vmatprep.subr.bf16.mxu0 %v5717_v50  ;;  %v5749_v26 = vld [vmem:[#allocation11 + $0x384] ss:$16 sps:$4 sm:$0xff]   ;;  %v5752_v40 = vld [vmem:[#allocation11 + $0x380] ss:$16 sps:$4 sm:$0xff]   ;;  %v3756_v50 = vadd.f32 %v3739_v19, %v3726_v16  ;;  %v5810_v45 = vld [vmem:[#allocation11 + $0x248] ss:$16 sps:$4 sm:$0xff]  }
 0x5a8   : > { %4621 = vmatprep.subr.bf16.mxu1 %v5719_v6  ;;  %v3703_v8 = vld [vmem:[#allocation2 + $0x38] sm:$0xff]  ;;  %v3700_v35 = vld [vmem:[#allocation2 + $0x8] sm:$0xff]  ;;  %v5813_v16 = vld [vmem:[#allocation11 + $0x28] ss:$16 sps:$4 sm:$0xff]  }
 0x5a9   : > { %v5753_v48 = vld [vmem:[#allocation11 + $0x164] ss:$16 sps:$4 sm:$0xff]   ;;  %v3733_v46 = vmul.f32 %v3721_v52, %v3703_v8  ;;  %v3730_v13 = vmul.f32 %v3709_v55, %v3700_v35  ;;  %v5757_v43 = vld [vmem:[#allocation11 + $0x160] ss:$16 sps:$4 sm:$0xff]   ;;  %3764 = vst [vmem:[#allocation18] sm:$0xff] %v3756_v50 }
 0x5aa   : > { %4579 = vmatpush1.bf16.msra.mxu0 %v5721_v0  ;;  %v5755_v49 = vld [vmem:[#allocation11 + $0x364] ss:$16 sps:$4 sm:$0xff]   ;;  %v5758_v37 = vld [vmem:[#allocation11 + $0x360] ss:$16 sps:$4 sm:$0xff]   ;;  %v3773_v0 = vpack.c.bf16 %v3761_v11, %v3757_v44  ;;  %v5797_v8 = vld [vmem:[#allocation11 + $0x8c] ss:$16 sps:$4 sm:$0xff]  }
 0x5ab   : > { %4622 = vmatpush1.bf16.msra.mxu1 %v5722_v21  ;;  %4580 = vmatprep.subr.bf16.mxu0 %v5723_v36  ;;  %v3698_v27 = vld [vmem:[#allocation2 + $0x18] sm:$0xff]  ;;  %v3702_v12 = vld [vmem:[#allocation2 + $0x28] sm:$0xff]  ;;  %v3763_v38 = vadd.f32 %v3751_v63, %v3733_v46  ;;  %v3760_v6 = vadd.f32 %v3739_v19, %v3730_v13  ;;  %v5800_v52 = vld [vmem:[#allocation11 + $0x28c] ss:$16 sps:$4 sm:$0xff]  }
 0x5ac   : > { %4623 = vmatprep.subr.bf16.mxu1 %v5725_v14  ;;  %v5759_v51 = vld [vmem:[#allocation11 + $0x144] ss:$16 sps:$4 sm:$0xff]   ;;  %v3728_v21 = vmul.f32 %v3717_v54, %v3698_v27  ;;  %v3732_v36 = vmul.f32 %v3717_v54, %v3702_v12  ;;  %4598 = vmatprep.mubr.bf16.mxu0 %v3773_v0  ;;  %v5776_v58 = vld [vmem:[#allocation11 + $0x300] ss:$16 sps:$4 sm:$0xff]   ;;  %v5806_v63 = vld [vmem:[#allocation11 + $0x26c] ss:$16 sps:$4 sm:$0xff]  }
 0x5ad   : > { %v5761_v28 = vld [vmem:[#allocation11 + $0x344] ss:$16 sps:$4 sm:$0xff]   ;;  %3771 = vst [vmem:[#allocation18 + $0x38] sm:$0xff] %v3763_v38  ;;  %v3775_v14 = vpack.c.bf16 %v3763_v38, %v3759_v7  ;;  %3768 = vst [vmem:[#allocation18 + $0x20] sm:$0xff] %v3760_v6  ;;  %v5801_v35 = vld [vmem:[#allocation11 + $0x68] ss:$16 sps:$4 sm:$0xff]  }
 0x5ae   : > { %4581 = vmatpush1.bf16.msra.mxu0 %v5727_v61  ;;  %v5763_v61 = vld [vmem:[#allocation11 + $0x140] ss:$16 sps:$4 sm:$0xff]   ;;  %v5804_v55 = vld [vmem:[#allocation11 + $0x268] ss:$16 sps:$4 sm:$0xff]   ;;  %v5809_v19 = vld [vmem:[#allocation11 + $0x4c] ss:$16 sps:$4 sm:$0xff]  }
 0x5af   : > { %4624 = vmatpush1.bf16.msra.mxu1 %v5728_v18  ;;  %4582 = vmatprep.subr.bf16.mxu0 %v5729_v32  ;;  %v5764_v18 = vld [vmem:[#allocation11 + $0x340] ss:$16 sps:$4 sm:$0xff]   ;;  %v3758_v32 = vadd.f32 %v3747_v34, %v3728_v21  ;;  %v5815_v46 = vld [vmem:[#allocation11 + $0x2c] ss:$16 sps:$4 sm:$0xff]   ;;  %v5816_v13 = vld [vmem:[#allocation11 + $0x228] ss:$16 sps:$4 sm:$0xff]  }
 0x5b0   : > { %4625 = vmatprep.subr.bf16.mxu1 %v5731_v22  ;;  %v3762_v22 = vadd.f32 %v3747_v34, %v3732_v36  ;;  %4641 = vmatprep.mubr.bf16.mxu1 %v3775_v14  ;;  %v5818_v27 = vld [vmem:[#allocation11 + $0x22c] ss:$16 sps:$4 sm:$0xff]   ;;  %v5819_v34 = vld [vmem:[#allocation11 + $0x8] ss:$16 sps:$4 sm:$0xff]  }
 0x5b1   : > { %3766 = vst [vmem:[#allocation18 + $0x10] sm:$0xff] %v3758_v32  ;;  %v5821_v12 = vld [vmem:[#allocation11 + $0xc] ss:$16 sps:$4 sm:$0xff]   ;;  %v5825_v11 = vld [vmem:[#allocation11 + $0x1e8] ss:$16 sps:$4 sm:$0xff]  }
 0x5b2   : > { %4583 = vmatpush2.bf16.msra.mxu0 %v5733_v17  ;;  %v5765_v17 = vld [vmem:[#allocation11 + $0x124] ss:$16 sps:$4 sm:$0xff]   ;;  %3770 = vst [vmem:[#allocation18 + $0x30] sm:$0xff] %v3762_v22  ;;  %v5824_v54 = vld [vmem:[#allocation11 + $0x20c] ss:$16 sps:$4 sm:$0xff]  }
 0x5b3   : > { %4626 = vmatpush2.bf16.msra.mxu1 %v5734_v42  ;;  %4584 = vmatprep.subr.bf16.mxu0 %v5735_v5  ;;  %v5767_v42 = vld [vmem:[#allocation11 + $0x324] ss:$16 sps:$4 sm:$0xff]   ;;  %v5769_v5 = vld [vmem:[#allocation11 + $0x120] ss:$16 sps:$4 sm:$0xff]   ;;  %v5830_v44 = vld [vmem:[#allocation11 + $0x3ec] ss:$16 sps:$4 sm:$0xff]  }
 0x5b4   : > { %4627 = vmatprep.subr.bf16.mxu1 %v5737_v60  ;;  %v5770_v60 = vld [vmem:[#allocation11 + $0x320] ss:$16 sps:$4 sm:$0xff]   ;;  %v5828_v7 = vld [vmem:[#allocation11 + $0x3e8] ss:$16 sps:$4 sm:$0xff]  }
 0x5b5   : > { %v5831_v38 = vld [vmem:[#allocation11 + $0x1c8] ss:$16 sps:$4 sm:$0xff]  }
 0x5b6   : > { %4585 = vmatpush2.bf16.msra.mxu0 %v5739_v4  ;;  %v5771_v4 = vld [vmem:[#allocation11 + $0x104] ss:$16 sps:$4 sm:$0xff]   ;;  %v5837_v21 = vld [vmem:[#allocation11 + $0x1a8] ss:$16 sps:$4 sm:$0xff]  }
 0x5b7   : > { %4628 = vmatpush2.bf16.msra.mxu1 %v5740_v20  ;;  %4586 = vmatprep.subr.bf16.mxu0 %v5741_v3  ;;  %v5773_v20 = vld [vmem:[#allocation11 + $0x304] ss:$16 sps:$4 sm:$0xff]   ;;  %v5775_v3 = vld [vmem:[#allocation11 + $0x100] ss:$16 sps:$4 sm:$0xff]   ;;  %v5840_v36 = vld [vmem:[#allocation11 + $0x3a8] ss:$16 sps:$4 sm:$0xff]  }
 0x5b8   : > { %4629 = vmatprep.subr.bf16.mxu1 %v5743_v2  ;;  %v5779_v2 = vld [vmem:[#allocation11 + $0xec] ss:$16 sps:$4 sm:$0xff]  }
 0x5ba   : > { %4587 = vmatpush2.bf16.msra.mxu0 %v5745_v57  ;;  %v5782_v57 = vld [vmem:[#allocation11 + $0x2ec] ss:$16 sps:$4 sm:$0xff]  }
 0x5bb   : > { %4630 = vmatpush2.bf16.msra.mxu1 %v5746_v53  ;;  %4588 = vmatprep.subr.bf16.mxu0 %v5747_v15  ;;  %v7572_v53 = vpack.c.bf16 %v3760_v6, %v3756_v50  ;;  %v7574_v15 = vpack.c.bf16 %v3762_v22, %v3758_v32  ;;  %v5834_v50 = vld [vmem:[#allocation11 + $0x3c8] ss:$16 sps:$4 sm:$0xff]   ;;  %v5839_v6 = vld [vmem:[#allocation11 + $0x1ac] ss:$16 sps:$4 sm:$0xff]  }
 0x5bc   : > { %4631 = vmatprep.subr.bf16.mxu1 %v5749_v26  ;;  %v5777_v26 = vld [vmem:[#allocation11 + $0xe8] ss:$16 sps:$4 sm:$0xff]   ;;  %v5851_v22 = vld [vmem:[#allocation11 + $0x16c] ss:$16 sps:$4 sm:$0xff]  }
 0x5bd   : > { %v5846_v32 = vld [vmem:[#allocation11 + $0x388] ss:$16 sps:$4 sm:$0xff]  }
 0x5be   : > { %4589 = vmatpush2.bf16.msra.mxu0 %v5751_v39  ;;  %v5780_v39 = vld [vmem:[#allocation11 + $0x2e8] ss:$16 sps:$4 sm:$0xff]  }
 0x5bf   : > { %4632 = vmatpush2.bf16.msra.mxu1 %v5752_v40  ;;  %4590 = vmatprep.subr.bf16.mxu0 %v5753_v48  ;;  %v5785_v40 = vld [vmem:[#allocation11 + $0xcc] ss:$16 sps:$4 sm:$0xff]   ;;  %v5798_v48 = vld [vmem:[#allocation11 + $0x288] ss:$16 sps:$4 sm:$0xff]  }
 0x5c0   : > { %4633 = vmatprep.subr.bf16.mxu1 %v5755_v49  ;;  %v5803_v49 = vld [vmem:[#allocation11 + $0x6c] ss:$16 sps:$4 sm:$0xff]  }
 0x5c2   : > { %4591 = vmatpush2.bf16.msra.mxu0 %v5757_v43  ;;  %v5822_v43 = vld [vmem:[#allocation11 + $0x208] ss:$16 sps:$4 sm:$0xff]  }
 0x5c3   : > { %4634 = vmatpush2.bf16.msra.mxu1 %v5758_v37  ;;  %4592 = vmatprep.subr.bf16.mxu0 %v5759_v51  ;;  %v5827_v37 = vld [vmem:[#allocation11 + $0x1ec] ss:$16 sps:$4 sm:$0xff]  }
 0x5c4   : > { %4635 = vmatprep.subr.bf16.mxu1 %v5761_v28  ;;  %v5833_v51 = vld [vmem:[#allocation11 + $0x1cc] ss:$16 sps:$4 sm:$0xff]  }
 0x5c5   : > { %v5836_v28 = vld [vmem:[#allocation11 + $0x3cc] ss:$16 sps:$4 sm:$0xff]  }
 0x5c6   : > { %4593 = vmatpush2.bf16.msra.mxu0 %v5763_v61  ;;  %v5848_v61 = vld [vmem:[#allocation11 + $0x38c] ss:$16 sps:$4 sm:$0xff]  }
 0x5c7   : > { %4636 = vmatpush2.bf16.msra.mxu1 %v5764_v18  ;;  %4594 = vmatprep.subr.bf16.mxu0 %v5765_v17  ;;  %v5843_v18 = vld [vmem:[#allocation11 + $0x188] ss:$16 sps:$4 sm:$0xff]   ;;  %v5854_v17 = vld [vmem:[#allocation11 + $0x36c] ss:$16 sps:$4 sm:$0xff]  }
 0x5c8   : > { %4637 = vmatprep.subr.bf16.mxu1 %v5767_v42  ;;  %v5849_v42 = vld [vmem:[#allocation11 + $0x168] ss:$16 sps:$4 sm:$0xff]  }
 0x5ca   : > { %4595 = vmatpush2.bf16.msra.mxu0 %v5769_v5  ;;  %v5852_v5 = vld [vmem:[#allocation11 + $0x368] ss:$16 sps:$4 sm:$0xff]  }
 0x5cb   : > { %4638 = vmatpush2.bf16.msra.mxu1 %v5770_v60  ;;  %4596 = vmatprep.subr.bf16.mxu0 %v5771_v4  ;;  %v5857_v60 = vld [vmem:[#allocation11 + $0x14c] ss:$16 sps:$4 sm:$0xff]  }
 0x5cc   : > { %4639 = vmatprep.subr.bf16.mxu1 %v5773_v20  ;;  %v5860_v4 = vld [vmem:[#allocation11 + $0x34c] ss:$16 sps:$4 sm:$0xff]   ;;  %v5855_v20 = vld [vmem:[#allocation11 + $0x148] ss:$16 sps:$4 sm:$0xff]  }
 0x5ce   : > { %4597 = vmatpush2.bf16.msra.mxu0 %v5775_v3  ;;  %v5858_v3 = vld [vmem:[#allocation11 + $0x348] ss:$16 sps:$4 sm:$0xff]  }
 0x5cf   : > { %4640 = vmatpush2.bf16.msra.mxu1 %v5776_v58  ;;  %4652 = vmatprep.subr.bf16.mxu0 %v5779_v2  ;;  %v5863_v58 = vld [vmem:[#allocation11 + $0x12c] ss:$16 sps:$4 sm:$0xff]  }
 0x5d0   : > { %4695 = vmatprep.subr.bf16.mxu1 %v5782_v57  ;;  %v5866_v2 = vld [vmem:[#allocation11 + $0x32c] ss:$16 sps:$4 sm:$0xff]   ;;  %v5861_v57 = vld [vmem:[#allocation11 + $0x128] ss:$16 sps:$4 sm:$0xff]  }
 0x5d1   : > { %4599 = vmatmul.mubr.bf16.vlgmr.msra.gmra.mxu0 %v7572_v53 }
 0x5d2   : > { %4642 = vmatmul.mubr.bf16.vlgmr.msra.gmra.mxu1 %v7574_v15  ;;  %4653 = vmatpush1.bf16.msra.mxu0 %v5777_v26  ;;  %v5864_v26 = vld [vmem:[#allocation11 + $0x328] ss:$16 sps:$4 sm:$0xff]  }
 0x5d3   : > { %4696 = vmatpush1.bf16.msra.mxu1 %v5780_v39  ;;  %4654 = vmatprep.subr.bf16.mxu0 %v5785_v40  ;;  %v5869_v39 = vld [vmem:[#allocation11 + $0x10c] ss:$16 sps:$4 sm:$0xff]  }
 0x5d4   : > { %4697 = vmatprep.subr.bf16.mxu1 %v5788_v24  ;;  %4684 = vmatprep.mubr.bf16.mxu0 %v3773_v0  ;;  %v5842_v0 = vld [vmem:[#allocation11 + $0x3ac] ss:$16 sps:$4 sm:$0xff]   ;;  %v5867_v24 = vld [vmem:[#allocation11 + $0x108] ss:$16 sps:$4 sm:$0xff]  }
 0x5d5   : > { %4727 = vmatprep.mubr.bf16.mxu1 %v3775_v14  ;;  %v5845_v14 = vld [vmem:[#allocation11 + $0x18c] ss:$16 sps:$4 sm:$0xff]  }
 0x5d6   : > { %4655 = vmatpush1.bf16.msra.mxu0 %v5783_v23  ;;  %v5872_v40 = vld [vmem:[#allocation11 + $0x30c] ss:$16 sps:$4 sm:$0xff]   ;;  %v5870_v23 = vld [vmem:[#allocation11 + $0x308] ss:$16 sps:$4 sm:$0xff]  }
 0x5d7   : > { %4698 = vmatpush1.bf16.msra.mxu1 %v5786_v59  ;;  %4656 = vmatprep.subr.bf16.mxu0 %v5791_v29  ;;  %v5873_v59 = vld [vmem:[#allocation14 + $0x78] sm:$0xff]  }
 0x5d8   : > { %4699 = vmatprep.subr.bf16.mxu1 %v5794_v31  ;;  %v5874_v29 = vld [vmem:[#allocation14 + $0x38] sm:$0xff]   ;;  %v5875_v31 = vld [vmem:[#allocation14 + $0x70] sm:$0xff]  }
 0x5da   : > { %4657 = vmatpush1.bf16.msra.mxu0 %v5789_v41  ;;  %v5876_v41 = vld [vmem:[#allocation14 + $0x30] sm:$0xff]  }
 0x5db   : > { %4700 = vmatpush1.bf16.msra.mxu1 %v5792_v62  ;;  %4658 = vmatprep.subr.bf16.mxu0 %v5797_v8  ;;  %v5877_v62 = vld [vmem:[#allocation14 + $0x68] sm:$0xff]  }
 0x5dc   : > { %4701 = vmatprep.subr.bf16.mxu1 %v5800_v52  ;;  %v5878_v8 = vld [vmem:[#allocation14 + $0x28] sm:$0xff]   ;;  %v5879_v52 = vld [vmem:[#allocation14 + $0x60] sm:$0xff]  }
 0x5de   : > { %4659 = vmatpush1.bf16.msra.mxu0 %v5795_v30  ;;  %v5880_v30 = vld [vmem:[#allocation14 + $0x20] sm:$0xff]  }
 0x5df   : > { %4702 = vmatpush1.bf16.msra.mxu1 %v5798_v48  ;;  %4660 = vmatprep.subr.bf16.mxu0 %v5803_v49  ;;  %v5881_v48 = vld [vmem:[#allocation14 + $0x58] sm:$0xff]   ;;  %v5884_v49 = vld [vmem:[#allocation14 + $0x10] sm:$0xff]  }
 0x5e0   : > { %4703 = vmatprep.subr.bf16.mxu1 %v5806_v63  ;;  %v5885_v63 = vld [vmem:[#allocation14 + $0x48] sm:$0xff]  }
 0x5e2   : > { %4661 = vmatpush1.bf16.msra.mxu0 %v5801_v35  ;;  %v5886_v35 = vld [vmem:[#allocation14 + $0x8] sm:$0xff]  }
 0x5e3   : > { %4704 = vmatpush1.bf16.msra.mxu1 %v5804_v55  ;;  %4662 = vmatprep.subr.bf16.mxu0 %v5809_v19  ;;  %v5887_v55 = vld [vmem:[#allocation14 + $0x40] sm:$0xff]  }
 0x5e4   : > { %4705 = vmatprep.subr.bf16.mxu1 %v5812_v47  ;;  %v5888_v19 = vld [vmem:[#allocation14] sm:$0xff]   ;;  %v3904_v47 = vld [vmem:[#allocation12] sm:$0xf] }
 0x5e6   : > { %4663 = vmatpush1.bf16.msra.mxu0 %v5807_v1  ;;  %v3909_v1 = vrot.slane %v3904_v47, %v7560_v25 }
 0x5e7   : > { %4706 = vmatpush1.bf16.msra.mxu1 %v5810_v45  ;;  %4664 = vmatprep.subr.bf16.mxu0 %v5815_v46  ;;  %v3913_v45 = vrot.slane %v3904_v47, %v7556_v56 }
 0x5e8   : > { %4707 = vmatprep.subr.bf16.mxu1 %v5818_v27 }
 0x5ea   : > { %4665 = vmatpush1.bf16.msra.mxu0 %v5813_v16 }
 0x5eb   : > { %4708 = vmatpush1.bf16.msra.mxu1 %v5816_v13  ;;  %4666 = vmatprep.subr.bf16.mxu0 %v5821_v12 }
 0x5ec   : > { %4709 = vmatprep.subr.bf16.mxu1 %v5824_v54 }
 0x5ee   : > { %4667 = vmatpush1.bf16.msra.mxu0 %v5819_v34 }
 0x5ef   : > { %4710 = vmatpush1.bf16.msra.mxu1 %v5822_v43  ;;  %4668 = vmatprep.subr.bf16.mxu0 %v5827_v37 }
 0x5f0   : > { %4711 = vmatprep.subr.bf16.mxu1 %v5830_v44 }
 0x5f2   : > { %4669 = vmatpush2.bf16.msra.mxu0 %v5825_v11 }
 0x5f3   : > { %4712 = vmatpush2.bf16.msra.mxu1 %v5828_v7  ;;  %4670 = vmatprep.subr.bf16.mxu0 %v5833_v51 }
 0x5f4   : > { %4713 = vmatprep.subr.bf16.mxu1 %v5836_v28 }
 0x5f6   : > { %4671 = vmatpush2.bf16.msra.mxu0 %v5831_v38  ;;  %v3917_v38 = vrot.slane %v3904_v47, %v7562_v10 }
 0x5f7   : > { %4714 = vmatpush2.bf16.msra.mxu1 %v5834_v50  ;;  %4672 = vmatprep.subr.bf16.mxu0 %v5839_v6  ;;  %v3921_v50 = vrot.slane %v3904_v47, %v7558_v33 }
 0x5f8   : > { %4715 = vmatprep.subr.bf16.mxu1 %v5842_v0 }
 0x5fa   : > { %4673 = vmatpush2.bf16.msra.mxu0 %v5837_v21 }
 0x5fb   : > { %4716 = vmatpush2.bf16.msra.mxu1 %v5840_v36  ;;  %4674 = vmatprep.subr.bf16.mxu0 %v5845_v14 }
 0x5fc   : > { %4717 = vmatprep.subr.bf16.mxu1 %v5848_v61 }
 0x5fe   : > { %4675 = vmatpush2.bf16.msra.mxu0 %v5843_v18 }
 0x5ff   : > { %4718 = vmatpush2.bf16.msra.mxu1 %v5846_v32  ;;  %4676 = vmatprep.subr.bf16.mxu0 %v5851_v22 }
 0x600   : > { %4719 = vmatprep.subr.bf16.mxu1 %v5854_v17 }
 0x602   : > { %4677 = vmatpush2.bf16.msra.mxu0 %v5849_v42 }
 0x603   : > { %4720 = vmatpush2.bf16.msra.mxu1 %v5852_v5  ;;  %4678 = vmatprep.subr.bf16.mxu0 %v5857_v60 }
 0x604   : > { %4721 = vmatprep.subr.bf16.mxu1 %v5860_v4 }
 0x606   : > { %4679 = vmatpush2.bf16.msra.mxu0 %v5855_v20 }
 0x607   : > { %4722 = vmatpush2.bf16.msra.mxu1 %v5858_v3  ;;  %4680 = vmatprep.subr.bf16.mxu0 %v5863_v58 }
 0x608   : > { %4723 = vmatprep.subr.bf16.mxu1 %v5866_v2 }
 0x60a   : > { %4681 = vmatpush2.bf16.msra.mxu0 %v5861_v57 }
 0x60b   : > { %4724 = vmatpush2.bf16.msra.mxu1 %v5864_v26  ;;  %4682 = vmatprep.subr.bf16.mxu0 %v5869_v39 }
 0x60c   : > { %4725 = vmatprep.subr.bf16.mxu1 %v5872_v40 }
 0x60e   : > { %4683 = vmatpush2.bf16.msra.mxu0 %v5867_v24 }
 0x60f   : > { %4726 = vmatpush2.bf16.msra.mxu1 %v5870_v23  ;;  %5496 = vmatprep.subr.bf16.mxu0 %v5873_v59 }
 0x611   : > { %4685 = vmatmul.mubr.bf16.vlgmr.msra.gmra.mxu0 %v7572_v53  ;;  %v5882_v53 = vld [vmem:[#allocation14 + $0x18] sm:$0xff]  }
 0x612   : > { %4728 = vmatmul.mubr.bf16.vlgmr.msra.gmra.mxu1 %v7574_v15  ;;  %5497 = vmatpush3.bf16.msra.mxu0 %v5874_v29  ;;  %v5883_v15 = vld [vmem:[#allocation14 + $0x50] sm:$0xff]  }
 0x613   : > { %5498 = vmatprep.subr.bf16.mxu0 %v5875_v31 }
 0x616   : > { %5499 = vmatpush3.bf16.msra.mxu0 %v5876_v41 }
 0x617   : > { %5500 = vmatprep.subr.bf16.mxu0 %v5877_v62 }
 0x61a   : > { %5501 = vmatpush3.bf16.msra.mxu0 %v5878_v8 }
 0x61b   : > { %5502 = vmatprep.subr.bf16.mxu0 %v5879_v52 }
 0x61e   : > { %5503 = vmatpush3.bf16.msra.mxu0 %v5880_v30 }
 0x61f   : > { %5504 = vmatprep.subr.bf16.mxu0 %v5881_v48 }
 0x622   : > { %5505 = vmatpush3.bf16.msra.mxu0 %v5882_v53 }
 0x623   : > { %5506 = vmatprep.subr.bf16.mxu0 %v5883_v15 }
 0x626   : > { %5507 = vmatpush3.bf16.msra.mxu0 %v5884_v49 }
 0x627   : > { %5508 = vmatprep.subr.bf16.mxu0 %v5885_v63 }
 0x62a   : > { %5509 = vmatpush3.bf16.msra.mxu0 %v5886_v35 }
 0x62b   : > { %5510 = vmatprep.subr.bf16.mxu0 %v5887_v55 }
 0x62e   : > { %5511 = vmatpush3.bf16.msra.mxu0 %v5888_v19 }
 0x691   : > { %v4600_v46 = vpop.f32.mrf.mxu0 }
 0x692   : > { %v4643_v27 = vpop.f32.mrf.mxu1  ;;  %v4601_v16 = vadd.f32 %v4600_v46, %v3909_v1 }
 0x693   : > { %v4602_v13 = vpop.f32.mrf.mxu0 }
 0x694   : > { %v4645_v12 = vpop.f32.mrf.mxu1  ;;  %v7582_v54 = vadd.f32 %v4643_v27, %v4601_v16  ;;  %v4603_v34 = vadd.f32 %v4602_v13, %v3913_v45 }
 0x695   : > { %v4604_v43 = vpop.f32.mrf.mxu0 }
 0x696   : > { %v4647_v37 = vpop.f32.mrf.mxu1  ;;  %4802 = vst [vmem:[#allocation21] sm:$0xff] %v7582_v54  ;;  %v7585_v44 = vadd.f32 %v4645_v12, %v4603_v34  ;;  %v4605_v11 = vadd.f32 %v4604_v43, %v3909_v1 }
 0x697   : > { %v4606_v7 = vpop.f32.mrf.mxu0 }
 0x698   : > { %4803 = vst [vmem:[#allocation21 + $0x8] sm:$0xff] %v7585_v44  ;;  %v7588_v25 = vadd.f32 %v4647_v37, %v4605_v11  ;;  %v4607_v56 = vadd.f32 %v4606_v7, %v3913_v45  ;;  %v4649_v51 = vpop.f32.mrf.mxu1 }
 0x69a   : > { %4804 = vst [vmem:[#allocation21 + $0x10] sm:$0xff] %v7588_v25  ;;  %v7591_v28 = vadd.f32 %v4649_v51, %v4607_v56 }
 0x69c   : > { %4805 = vst [vmem:[#allocation21 + $0x18] sm:$0xff] %v7591_v28 }
 0x6d1   : > { %v4686_v6 = vpop.f32.mrf.mxu0 }
 0x6d2   : > { %v4729_v0 = vpop.f32.mrf.mxu1  ;;  %v4687_v21 = vadd.f32 %v4686_v6, %v3917_v38 }
 0x6d3   : > { %v4688_v36 = vpop.f32.mrf.mxu0 }
 0x6d4   : > { %v4731_v14 = vpop.f32.mrf.mxu1  ;;  %v4730_v61 = vadd.f32 %v4729_v0, %v4687_v21  ;;  %v4689_v18 = vadd.f32 %v4688_v36, %v3921_v50 }
 0x6d5   : > { %v4690_v32 = vpop.f32.mrf.mxu0 }
 0x6d6   : > { %v5462_v22 = vadd.f32 -5.0, %v4730_v61  ;;  %v4732_v17 = vadd.f32 %v4731_v14, %v4689_v18  ;;  %v4691_v42 = vadd.f32 %v4690_v32, %v3917_v38  ;;  %v4733_v5 = vpop.f32.mrf.mxu1 }
 0x6d7   : > { %v4692_v60 = vpop.f32.mrf.mxu0 }
 0x6d8   : > { %v4746_v4 = vand.u32 2147483647, %v5462_v22  ;;  %v7596_v20 = vadd.f32 -5.0, %v4732_v17  ;;  %v4734_v3 = vadd.f32 %v4733_v5, %v4691_v42  ;;  %v4693_v10 = vadd.f32 %v4692_v60, %v3921_v50  ;;  %v4735_v57 = vpop.f32.mrf.mxu1  ;;  %v4812_v5 = vld [vmem:[#allocation17 + $0x10] sm:$0xff]  ;;  %v4811_v60 = vld [vmem:[#allocation17 + $0x8] sm:$0xff] }
 0x6d9   : > { %v4742_v11 = vmax.f32 %v5462_v22, 0.0 }
 0x6da   : > { %v4750_v58 = vsub.f32 0.0, %v4746_v4  ;;  %v4747_v33 = vand.u32 2147483647, %v7596_v20  ;;  %v7599_v2 = vadd.f32 -5.0, %v4734_v3  ;;  %v4736_v26 = vadd.f32 %v4735_v57, %v4693_v10 }
 0x6db   : > { %v4743_v0 = vmax.f32 %v7596_v20, 0.0  ;;  %v4810_v20 = vld [vmem:[#allocation17] sm:$0xff] }
 0x6dc   : > { %v4754_v39 = vmul.f32 1.442695, %v4750_v58  ;;  %v4751_v40 = vsub.f32 0.0, %v4747_v33  ;;  %v4748_v24 = vand.u32 2147483647, %v7599_v2  ;;  %v7602_v23 = vadd.f32 -5.0, %v4736_v26 }
 0x6dd   : > { %v4744_v17 = vmax.f32 %v7599_v2, 0.0  ;;  %v4813_v26 = vld [vmem:[#allocation17 + $0x18] sm:$0xff] }
 0x6de   : > { %5889 = vpow2.f32 %v4754_v39  ;;  %v4756_v59 = vmul.f32 1.442695, %v4751_v40  ;;  %v4752_v29 = vsub.f32 0.0, %v4748_v24  ;;  %v4749_v31 = vand.u32 2147483647, %v7602_v23 }
 0x6df   : > { %v4745_v58 = vmax.f32 %v7602_v23, 0.0 }
 0x6e0   : > { %5891 = vpow2.f32 %v4756_v59  ;;  %v4758_v41 = vmul.f32 1.442695, %v4752_v29  ;;  %v4753_v62 = vsub.f32 0.0, %v4749_v31 }
 0x6e2   : > { %5893 = vpow2.f32 %v4758_v41  ;;  %v4760_v8 = vmul.f32 1.442695, %v4753_v62 }
 0x6e4   : > { %5895 = vpow2.f32 %v4760_v8 }
 0x6eb   : > { %v5890_v52 = vpop.eup %5889 }
 0x6ec   : > { %v4762_v30 = vadd.f32 1.0, %v5890_v52  ;;  %v4765_v55 = vmul.f32 -0.5, %v5890_v52  ;;  %v4768_v45 = vand.u32 2147483647, %v5890_v52 }
 0x6ed   : > { %v5892_v48 = vpop.eup %5891 }
 0x6ee   : > { %5897 = vlog2.f32 %v4762_v30  ;;  %v4771_v53 = vadd.f32 1.0, %v5892_v48  ;;  %v4774_v19 = vmul.f32 -0.5, %v5892_v48  ;;  %v4766_v47 = vadd.f32 1.0, %v4765_v55 }
 0x6ef   : > { %v5894_v15 = vpop.eup %5893  ;;  %v4777_v16 = vand.u32 2147483647, %v5892_v48  ;;  %vm4769_vm0 = vcmp.lt.f32.partialorder %v4768_v45, 0.0004427343 }
 0x6f0   : > { %5899 = vlog2.f32 %v4771_v53  ;;  %v4780_v49 = vadd.f32 1.0, %v5894_v15  ;;  %v4783_v1 = vmul.f32 -0.5, %v5894_v15  ;;  %v4775_v46 = vadd.f32 1.0, %v4774_v19 }
 0x6f1   : > { %v5896_v63 = vpop.eup %5895  ;;  %v4767_v34 = vmul.f32 %v5890_v52, %v4766_v47  ;;  %v4786_v7 = vand.u32 2147483647, %v5894_v15  ;;  %vm4778_vm1 = vcmp.lt.f32.partialorder %v4777_v16, 0.0004427343  ;;  %v5466_v52 = vld [vmem:[#allocation15] ss:$0 sm:$0xff] }
 0x6f2   : > { %5901 = vlog2.f32 %v4780_v49  ;;  %v4789_v35 = vadd.f32 1.0, %v5896_v63  ;;  %v4792_v13 = vmul.f32 -0.5, %v5896_v63  ;;  %v4784_v43 = vadd.f32 1.0, %v4783_v1 }
 0x6f3   : > { %v4776_v38 = vmul.f32 %v5892_v48, %v4775_v46  ;;  %v4795_v18 = vand.u32 2147483647, %v5896_v63  ;;  %vm4787_vm2 = vcmp.lt.f32.partialorder %v4786_v7, 0.0004427343 }
 0x6f4   : > { %5903 = vlog2.f32 %v4789_v35  ;;  %v4793_v21 = vadd.f32 1.0, %v4792_v13  ;;  %v4785_v61 = vmul.f32 %v5894_v15, %v4784_v43 }
 0x6f5   : > { %vm4796_vm3 = vcmp.lt.f32.partialorder %v4795_v18, 0.0004427343 }
 0x6f6   : > { %v4794_v10 = vmul.f32 %v5896_v63, %v4793_v21 }
 0x6fb   : > { %v5898_v27 = vpop.eup %5897 }
 0x6fc   : > { %v4764_v12 = vmul.f32 0.6931472, %v5898_v27 }
 0x6fd   : > { %v5900_v37 = vpop.eup %5899 }
 0x6fe   : > { %v4770_v56 = vsel %vm4769_vm0, %v4767_v34, %v4764_v12  ;;  %v4773_v51 = vmul.f32 0.6931472, %v5900_v37 }
 0x6ff   : > { %v5902_v50 = vpop.eup %5901  ;;  %v4798_v6 = vadd.f32 %v4770_v56, %v4742_v11 }
 0x700   : > { %v4779_v36 = vsel %vm4778_vm1, %v4776_v38, %v4773_v51  ;;  %v4782_v14 = vmul.f32 0.6931472, %v5902_v50 }
 0x701   : > { %4806 = vst [vmem:[#allocation22] sm:$0xff] %v4798_v6  ;;  %v4799_v32 = vadd.f32 %v4779_v36, %v4743_v0  ;;  %v5904_v22 = vpop.eup %5903  ;;  %v4814_v2 = vmul.f32 %v4810_v20, %v4798_v6 }
 0x702   : > { %v4788_v42 = vsel %vm4787_vm2, %v4785_v61, %v4782_v14  ;;  %v4791_v3 = vmul.f32 0.6931472, %v5904_v22 }
 0x703   : > { %4807 = vst [vmem:[#allocation22 + $0x8] sm:$0xff] %v4799_v32  ;;  %v4800_v4 = vadd.f32 %v4788_v42, %v4744_v17  ;;  %v4815_v39 = vmul.f32 %v4811_v60, %v4799_v32  ;;  %v4818_v41 = vadd.f32 %v4814_v2, %v7582_v54 }
 0x704   : > { %v4797_v57 = vsel %vm4796_vm3, %v4794_v10, %v4791_v3 }
 0x705   : > { %4808 = vst [vmem:[#allocation22 + $0x10] sm:$0xff] %v4800_v4  ;;  %v4816_v33 = vmul.f32 %v4812_v5, %v4800_v4  ;;  %v4801_v40 = vadd.f32 %v4797_v57, %v4745_v58  ;;  %v4819_v29 = vadd.f32 %v4815_v39, %v7585_v44  ;;  %v5021_v44 = vand.u32 127, %v3706_v9 }
 0x707   : > { %4809 = vst [vmem:[#allocation22 + $0x18] sm:$0xff] %v4801_v40  ;;  %v4817_v24 = vmul.f32 %v4813_v26, %v4801_v40  ;;  %v4820_v59 = vadd.f32 %v4816_v33, %v7588_v25 }
 0x709   : > { %v4821_v31 = vadd.f32 %v4817_v24, %v7591_v28  ;;  %v4822_v23 = vpack.c.bf16 %v4820_v59, %v4818_v41 }
 0x70b   : > { %v4823_v62 = vpack.c.bf16 %v4821_v31, %v4819_v29 }
 0x70d   : > { %4991 = vmatprep.mubr.bf16.mxu0 %v4823_v62 }
 0x70e   : > { %4992 = vmatmul.mubr.bf16.vlgmr.msra.gmra.mxu0 %v4822_v23 }
 0x7ce   : > { %v5512_v8 = vpop.f32.mrf.mxu0 }
 0x7d0   : > { %v5513_v30 = vpop.f32.mrf.mxu0 }
 0x7d1   : > { %v5514_v48 = vadd.f32 %v5513_v30, %v5512_v8 }
 0x7d2   : > { %v5515_v53 = vpop.f32.mrf.mxu0 }
 0x7d3   : > { %v4994_v15 = vadd.f32 %v5514_v48, %v5466_v52 }
 0x7d4   : > { %v5516_v49 = vpop.f32.mrf.mxu0 }
 0x7d5   : > { %v5517_v63 = vadd.f32 %v5516_v49, %v5515_v53  ;;  %5000 = vmax.xlane.f32.xlu0 %v4994_v15 }
 0x7d7   : > { %v4997_v25 = vadd.f32 %v5517_v63, %v5466_v52 }
 0x7d9   : > { %5002 = vmax.xlane.f32.xlu0 %v4997_v25 }
 0x85e   : > { %v5001_v28 = vpop.xlane.xlu0 %5000 }
 0x85f   : > { %v5004_v35 = vsub.f32 %v4994_v15, %v5001_v28  ;;  %vm5022_vm4 = vcmp.eq.f32.partialorder %v4994_v15, %v5001_v28 }
 0x860   : > { %v5024_v54 = vsel %vm5022_vm4, %v5021_v44, 128 }
 0x861   : > { %v5006_v55 = vmul.f32 1.442695, %v5004_v35  ;;  %v5027_v19 = vshra.s32 %v5024_v54, 16  ;;  %v5026_v34 = vand.u32 65535, %v5024_v54 }
 0x862   : > { %v5003_v47 = vpop.xlane.xlu0 %5002 }
 0x863   : > { %5905 = vpow2.f32 %v5006_v55  ;;  %v5005_v1 = vsub.f32 %v4997_v25, %v5003_v47  ;;  %vm5023_vm5 = vcmp.eq.f32.partialorder %v4997_v25, %v5003_v47  ;;  %v5029_v45 = vcvt.s32.f32 %v5027_v19 }
 0x864   : > { %v5025_v46 = vsel %vm5023_vm5, %v5021_v44, 128  ;;  %v5028_v37 = vcvt.s32.f32 %v5026_v34 }
 0x865   : > { %v5008_v27 = vmul.f32 1.442695, %v5005_v1  ;;  %5030 = vmin.xlane.f32.xlu1 %v5029_v45  ;;  %v5041_v16 = vshra.s32 %v5025_v46, 16  ;;  %v5040_v11 = vand.u32 65535, %v5025_v46 }
 0x867   : > { %5907 = vpow2.f32 %v5008_v27  ;;  %v5043_v13 = vcvt.s32.f32 %v5041_v16  ;;  %v5042_v51 = vcvt.s32.f32 %v5040_v11 }
 0x869   : > { %5044 = vmin.xlane.f32.xlu1 %v5043_v13 }
 0x870   : > { %v5906_v12 = vpop.eup %5905 }
 0x871   : > { %5010 = vadd.xlane.f32.xlu0 %v5906_v12 }
 0x874   : > { %v5908_v9 = vpop.eup %5907 }
 0x875   : > { %5012 = vadd.xlane.f32.xlu1 %v5908_v9 }
 0x8ee   : > { %v5031_v43 = vpop.xlane.xlu1 %5030 }
 0x8ef   : > { %vm5032_vm6 = vcmp.eq.f32.partialorder %v5029_v45, %v5031_v43  ;;  %v5037_v61 = vcvt.f32.s32 %v5031_v43 }
 0x8f0   : > { %v5033_v7 = vsel %vm5032_vm6, %v5028_v37, inf }
 0x8f1   : > { %5034 = vmin.xlane.f32.xlu0 %v5033_v7  ;;  %v5038_v32 = vshll.u32 %v5037_v61, 16 }
 0x8f2   : > { %v5045_v56 = vpop.xlane.xlu1 %5044 }
 0x8f3   : > { %vm5046_vm7 = vcmp.eq.f32.partialorder %v5043_v13, %v5045_v56  ;;  %v5051_v17 = vcvt.f32.s32 %v5045_v56 }
 0x8f4   : > { %v5047_v38 = vsel %vm5046_vm7, %v5042_v51, inf }
 0x8f5   : > { %5048 = vmin.xlane.f32.xlu1 %v5047_v38  ;;  %v5052_v60 = vshll.u32 %v5051_v17, 16 }
 0x8fa   : > { %v5011_v50 = vpop.xlane.xlu0 %5010 }
 0x8fb   : > { %5909 = vrcp.f32 %v5011_v50 }
 0x8fe   : > { %v5013_v6 = vpop.xlane.xlu1 %5012 }
 0x8ff   : > { %5911 = vrcp.f32 %v5013_v6 }
 0x908   : > { %v5910_v0 = vpop.eup %5909 }
 0x909   : > { %v5016_v21 = vmul.f32 %v5910_v0, %v5906_v12 }
 0x90b   : > { %5018 = vst [vmem:[#allocation19] sm:$0xff] %v5016_v21 }
 0x90c   : > { %v5912_v36 = vpop.eup %5911 }
 0x90d   : > { %v5017_v14 = vmul.f32 %v5912_v36, %v5908_v9 }
 0x90f   : > { %5019 = vst [vmem:[#allocation19 + $0x8] sm:$0xff] %v5017_v14 }
 0x97a   : > { %v5035_v18 = vpop.xlane.xlu0 %5034 }
 0x97b   : > { %v5036_v22 = vcvt.f32.s32 %v5035_v18 }
 0x97d   : > { %v5039_v42 = vadd.s32 %v5038_v32, %v5036_v22 }
 0x97e   : > { %v5049_v5 = vpop.xlane.xlu1 %5048 }
 0x97f   : > { %5055 = vst.msk [vmem:[%s7684_s11] sm:$0xff] %vm5054_vm8, %v5039_v42  ;;  %v5050_v4 = vcvt.f32.s32 %v5049_v5 }
 0x981   : > { %v5053_v3 = vadd.s32 %v5052_v60, %v5050_v4 }
 0x983   : > { %5056 = vst.msk [vmem:[%s7684_s11 + $0x8] sm:$0xff] %vm5054_vm8, %v5053_v3 }
 0x984 PF: > { %p5614_p12 = scmp.eq.s32.totalorder %s6432_s14, 1  ;;  %s6331_s25 = smov [#allocation19]  }
 0x985   : > { %s5076_s2 = sshll.u32 %s6331_s25, 4  ;;  %s5077_s2 = int_to_ptr.vmem [resolvable:$true] %s5076_s2 }
 0x986   : > { %s6149_s28 = scalar_lea.vmem %s5077_s2, 256  ;;  %p6156_p6 = scmp.lt.s32.totalorder %s5077_s2, %s5077_s2 }
 0x987   : > { %p6150_p1 = scmp.ne.s32.totalorder %s5077_s2, %s6149_s28  ;;  %p6157_p7 = scmp.lt.s32.totalorder %s6149_s28, %s6149_s28 }
 0x989   : > { %p6151_p3 = pnand %p6150_p1, %p5614_p12  ;;  %p6158_p4 = por %p6157_p7, %p6156_p6 }
 0x98b   : > { %p6152_p10 = pneg %p6151_p3 }
 0x98d   : > { %p6159_p0 = pnand %p6158_p4, %p6152_p10 }
 0x98f   : > { %6162 = shalt.err (!%p6159_p0)
}
 0x990   : > { %s6332_s17 = smov 128   ;;  %s6333_s3 = smov 8  }
 0x991   : > { %5555 = dma.vmem_to_hbm [thread:$0]  (%p5614_p12), %s5077_s2, 256, %s7683_s10, [#allocation20], %s6332_s17, %s6332_s17, %s6333_s3  }
 0x992   : > { %s6334_s18 = smov [#allocation18]  }
 0x993   : > { %s5063_s30 = sshll.u32 %s6334_s18, 4  ;;  %s5064_s30 = int_to_ptr.vmem [resolvable:$true] %s5063_s30 }
 0x994   : > { %s6173_s0 = scalar_lea.vmem %s5064_s30, 1024  ;;  %p6180_p9 = scmp.lt.s32.totalorder %s5064_s30, %s5064_s30 }
 0x995   : > { %p6174_p2 = scmp.ne.s32.totalorder %s5064_s30, %s6173_s0  ;;  %p6181_p11 = scmp.lt.s32.totalorder %s6173_s0, %s6173_s0 }
 0x997   : > { %p6175_p5 = pnand %p6174_p2, %p5614_p12  ;;  %p6182_p13 = por %p6181_p11, %p6180_p9 }
 0x999   : > { %p6176_p8 = pneg %p6175_p5 }
 0x99b   : > { %p6183_p1 = pnand %p6182_p13, %p6176_p8 }
 0x99d   : > { %6186 = shalt.err (!%p6183_p1)
}
 0x99e   : > { %s6335_s15 = smov 512   ;;  %s6336_s29 = smov 32  }
 0x99f   : > { %5553 = dma.vmem_to_hbm [thread:$0]  (%p5614_p12), %s5064_s30, 1024, %s7682_s9, [#allocation5], %s6335_s15, %s6335_s15, %s6336_s29  }
 0x9a0   : > { %s6337_s19 = smov [#allocation21]  }
 0x9a1   : > { %s5092_s25 = sshll.u32 %s6337_s19, 4  ;;  %s5093_s25 = int_to_ptr.vmem [resolvable:$true] %s5092_s25 }
 0x9a2   : > { %s6197_s2 = scalar_lea.vmem %s5093_s25, 512  ;;  %p6204_p7 = scmp.lt.s32.totalorder %s5093_s25, %s5093_s25 }
 0x9a3   : > { %p6198_p3 = scmp.ne.s32.totalorder %s5093_s25, %s6197_s2  ;;  %p6205_p4 = scmp.lt.s32.totalorder %s6197_s2, %s6197_s2 }
 0x9a5   : > { %p6199_p10 = pnand %p6198_p3, %p5614_p12  ;;  %p6206_p0 = por %p6205_p4, %p6204_p7 }
 0x9a7   : > { %p6200_p6 = pneg %p6199_p10 }
 0x9a9   : > { %p6207_p2 = pnand %p6206_p0, %p6200_p6 }
 0x9ab   : > { %6210 = shalt.err (!%p6207_p2)
}
 0x9ac   : > { %s6338_s28 = smov 256   ;;  %s6339_s17 = smov 16  }
 0x9ad   : > { %5557 = dma.vmem_to_hbm [thread:$0]  (%p5614_p12), %s5093_s25, 512, %s7685_s12, [#allocation20], %s6338_s28, %s6338_s28, %s6339_s17  }
 0x9ae   : > { %s6340_s24 = smov [#allocation22]  }
 0x9af   : > { %s5105_s18 = sshll.u32 %s6340_s24, 4  ;;  %s5106_s18 = int_to_ptr.vmem [resolvable:$true] %s5105_s18 }
 0x9b0   : > { %s6221_s30 = scalar_lea.vmem %s5106_s18, 512  ;;  %p6228_p11 = scmp.lt.s32.totalorder %s5106_s18, %s5106_s18 }
 0x9b1   : > { %p6222_p5 = scmp.ne.s32.totalorder %s5106_s18, %s6221_s30  ;;  %p6229_p13 = scmp.lt.s32.totalorder %s6221_s30, %s6221_s30 }
 0x9b3   : > { %p6223_p8 = pnand %p6222_p5, %p5614_p12  ;;  %p6230_p1 = por %p6229_p13, %p6228_p11 }
 0x9b5   : > { %p6224_p9 = pneg %p6223_p8 }
 0x9b7   : > { %p6231_p3 = pnand %p6230_p1, %p6224_p9 }
 0x9b9   : > { %6234 = shalt.err (!%p6231_p3)
}
 0x9ba   : > { %5559 = dma.vmem_to_hbm [thread:$0]  (%p5614_p12), %s5106_s18, 512, %s7686_s13, [#allocation23], %s6338_s28, %s6338_s28, %s6339_s17  }
 0x9bb   : > { %6286 = dma.done.wait (%p5614_p12), [#allocation5], 1024  }
 0x9bc   : > { %6288 = vsyncadd (%p5614_p12), [#allocation5], 4294966272 }
 0x9bd   : > { %6290 = dma.done.wait (%p5614_p12), [#allocation20], 768  }
 0x9be   : > { %6292 = vsyncadd (%p5614_p12), [#allocation20], 4294966528 }
 0x9bf   : > { %6294 = dma.done.wait (%p5614_p12), [#allocation23], 512  }
 0x9c0   : > { %6296 = vsyncadd (%p5614_p12), [#allocation23], 4294966784 }
 0x9c1 PF: > { %p31_p10 = scmp.ge.s32.totalorder %s6529_s20, 4   ;;  %s7750_s25 = smov %s6303_s26 }
 0x9c2   : > { %s7751_s26 = smov %s6307_s27  ;;  %s7752_s27 = smov %s6541_s22 }
 0x9c3   : > { %s7753_s28 = smov %s6529_s20  ;;  %33 = sbr.rel (!%p31_p10) target bundleno = 14 (0xe), region = 167 }
 0x9c8   :  { %5136 = vsyncpa [#allocation4], 1 }
 0x9c9   :  { %5138 = vsyncpa [#allocation4 + $0x1], 1 }
 0x9ca   :  { %5139 = vsyncpa [#allocation7], 1 }
 0x9cb   :  { %5141 = vsyncpa [#allocation7 + $0x1], 1 }
 0x9cc   :  { %5142 = vsyncpa [#allocation10], 1 }
 0x9cd   :  { %5143 = vsyncpa [#allocation13], 1 }
 0x9ce   :  { %5144 = vsyncpa [#allocation16], 1 }
 0x9cf   :  { %5145 = vsyncpa [#allocation5], 1 }
 0x9d0   :  { %5147 = vsyncpa [#allocation5 + $0x1], 1 }
 0x9d1   :  { %5148 = vsyncpa [#allocation20], 1 }
 0x9d2   :  { %5149 = vsyncpa [#allocation23], 1 }

</bundles_post_ra>
